<compile_context>
chip_gen: v6e
topology: v6e:2x2x1
jax: 0.10.0
libtpu: 0.0.40
codegen_flags: <defaults>
</compile_context>

<pallas_src>
import functools

import jax
import jax.numpy as jnp
from jax.experimental import pallas as pl
from jax.experimental.pallas import tpu as pltpu


def _round_up(x, m):
    return (x + m - 1) // m * m


def _const_spec(shape):
    """BlockSpec for a grid-invariant (weight/bias) input: constant index map,
    single-buffered when the installed Pallas supports pipeline_mode=Buffered(1)."""
    index_map = lambda i: (0,) * len(shape)
    try:
        return pl.BlockSpec(shape, index_map,
                            pipeline_mode=pl.Buffered(buffer_count=1))
    except Exception:  # older API without pipeline_mode / Buffered(1)
        return pl.BlockSpec(shape, index_map)


# --------------------------------------------------------------------------- fused kernel
def _gru_net_kernel(x_ref, *refs, n_layers, seq_len, chunk, b_tile, h_pad, has_seq):
    """refs = [w_ih_t, w_hh_rz_t, w_hh_n_t, b_proj, b_hn] * n_layers
            + [w_fc_t, b_fc, out, gi_scratch, (seq_scratch)]."""
    T, B, H = seq_len, b_tile, h_pad
    PER_LAYER = 5
    layer_refs = [refs[PER_LAYER * l:PER_LAYER * (l + 1)] for l in range(n_layers)]
    rest = refs[PER_LAYER * n_layers:]
    w_fc_ref, b_fc_ref, out_ref, gi_ref = rest[0], rest[1], rest[2], rest[3]
    seq_ref = rest[4] if has_seq else None

    n_chunks = -(-T // chunk)
    h = jnp.zeros((B, H), jnp.float32)

    for l, (w_ih_t_ref, w_hh_rz_t_ref, w_hh_n_t_ref, b_proj_ref, b_hn_ref) \
            in enumerate(layer_refs):
        # Loop-invariant weight loads hoisted out of the recurrence (bf16).
        w_ih_t = w_ih_t_ref[...]
        w_hh_rz_t = w_hh_rz_t_ref[...]
        w_hh_n_t = w_hh_n_t_ref[...]
        b_proj = b_proj_ref[...]          # b_ih (with b_hh_r/b_hh_z folded in), f32
        b_hn = b_hn_ref[...]              # b_hh for the n gate, f32
        write_seq = has_seq and (l + 1 < n_layers)   # last layer only needs h_T

        h = jnp.zeros((B, H), jnp.float32)
        for c in range(n_chunks):
            t0 = c * chunk
            tc = min(chunk, T - t0)

            # ---- hoisted input projection for this time chunk: one big MXU matmul.
            if l == 0:
                x_blk = x_ref[t0:t0 + tc]                # (tc, B, D) f32
            else:
                x_blk = seq_ref[t0:t0 + tc]              # (tc, B, H) inter-layer handoff
            d_in = x_blk.shape[-1]
            x2d = x_blk.reshape(tc * B, d_in).astype(jnp.bfloat16)
            gi = jnp.dot(x2d, w_ih_t, preferred_element_type=jnp.float32) + b_proj
            gi_ref[0:tc] = gi.reshape(tc, B, 3 * H)

            # ---- sequential recurrence over this chunk (small latency-critical mms).
            def step(t_local, h_prev, t0=t0, write_seq=write_seq,
                     w_hh_rz_t=w_hh_rz_t, w_hh_n_t=w_hh_n_t, b_hn=b_hn):
                gi_t = gi_ref[t_local]                                   # (B, 3H) f32
                h_bf = h_prev.astype(jnp.bfloat16)
                # Per-gate-group hidden matmuls keep peak live registers small.
                gh_rz = jnp.dot(h_bf, w_hh_rz_t, preferred_element_type=jnp.float32)
                rz = jax.nn.sigmoid(gi_t[:, :2 * H] + gh_rz)             # fused r/z
                r, z = rz[:, :H], rz[:, H:]
                gh_n = jnp.dot(h_bf, w_hh_n_t,
                               preferred_element_type=jnp.float32) + b_hn
                n = jnp.tanh(gi_t[:, 2 * H:] + r * gh_n)
                h_new = (1.0 - z) * n + z * h_prev
                if write_seq:
                    seq_ref[t0 + t_local] = h_new.astype(seq_ref.dtype)
                return h_new

            h = jax.lax.fori_loop(0, tc, step, h,
                                  unroll=(True if tc <= 8 else 2))

    # ---- fused FC epilogue. self.dropout is identity in eval mode.
    out_ref[...] = (jnp.dot(h.astype(jnp.bfloat16), w_fc_ref[...],
                            preferred_element_type=jnp.float32)
                    + b_fc_ref[...]).astype(out_ref.dtype)


# --------------------------------------------------------------------------- wrapper
def gru_net_forward(x_btd, params, hidden_dim, output_dim, n_layers, *,
                    b_tile=None, gi_chunk_budget_bytes=6 << 20):
    """x_btd: (B, T, D_in) batch-first, like the PyTorch module. Returns (B, output_dim)."""
    B, T, D_in = x_btd.shape
    H = hidden_dim
    H_pad = _round_up(H, 128)
    O_pad = _round_up(output_dim, 128)
    D8 = _round_up(D_in, 8)          # only pad features to the sublane quantum, not 128

    # Batch tile: feed as many MXU rows as affordable (<=128), at least 8 sublanes.
    # (On v7x, prefer configs with >= 2 batch tiles so both TensorCores get work.)
    if b_tile is None:
        b_tile = min(_round_up(B, 8), 128)
    b_tile = max(8, _round_up(b_tile, 8))
    B_pad = _round_up(B, b_tile)

    # Time-chunk size for the hoisted input projection so the gi scratch stays small.
    per_t_bytes = b_tile * 3 * H_pad * 4
    chunk = int(min(T, max(8, gi_chunk_budget_bytes // per_t_bytes)))
    chunk = max(1, chunk)

    seq_dtype = jnp.bfloat16 if (n_layers > 1 and b_tile % 16 == 0) else jnp.float32
    seq_itemsize = 2 if seq_dtype == jnp.bfloat16 else 4

    # ---- pack inputs (time-major, zero padded; padded lanes stay exactly zero
    #      because padded weights/biases are zero and h0 == 0).
    x_tbd = jnp.transpose(x_btd, (1, 0, 2)).astype(jnp.float32)
    x_pad = jnp.zeros((T, B_pad, D8), jnp.float32).at[:, :B, :D_in].set(x_tbd)

    def pack_layer(w_ih, w_hh, b_ih, b_hh, d_in, d_pad):
        # PyTorch (3H, d_in)/(3H, H) -> transposed, gate-blocked, lane-aligned, bf16.
        w_ih_t = jnp.zeros((d_pad, 3 * H_pad), jnp.float32)
        b_proj = jnp.zeros((1, 3 * H_pad), jnp.float32)
        for g in range(3):
            w_ih_t = w_ih_t.at[:d_in, g * H_pad:g * H_pad + H].set(
                w_ih[g * H:(g + 1) * H, :].T)
            bias = b_ih[g * H:(g + 1) * H]
            if g < 2:                      # fold b_hh_r / b_hh_z into the projection
                bias = bias + b_hh[g * H:(g + 1) * H]
            b_proj = b_proj.at[0, g * H_pad:g * H_pad + H].set(bias)
        w_hh_rz_t = jnp.zeros((H_pad, 2 * H_pad), jnp.float32)
        for g in range(2):
            w_hh_rz_t = w_hh_rz_t.at[:H, g * H_pad:g * H_pad + H].set(
                w_hh[g * H:(g + 1) * H, :].T)
        w_hh_n_t = jnp.zeros((H_pad, H_pad), jnp.float32).at[:H, :H].set(
            w_hh[2 * H:3 * H, :].T)
        b_hn = jnp.zeros((1, H_pad), jnp.float32).at[0, :H].set(b_hh[2 * H:3 * H])
        return (w_ih_t.astype(jnp.bfloat16), w_hh_rz_t.astype(jnp.bfloat16),
                w_hh_n_t.astype(jnp.bfloat16), b_proj, b_hn)

    inputs = [x_pad]
    in_specs = [pl.BlockSpec((T, b_tile, D8), lambda i: (0, i, 0))]
    for layer in range(n_layers):
        w_ih, w_hh, b_ih, b_hh = params[f"gru_l{layer}"]
        d_in = D_in if layer == 0 else H
        d_pad = D8 if layer == 0 else H_pad
        packed = pack_layer(w_ih, w_hh, b_ih, b_hh, d_in, d_pad)
        inputs += list(packed)
        in_specs += [_const_spec(p.shape) for p in packed]

    w_fc, b_fc = params["fc"]
    w_fc_t = jnp.zeros((H_pad, O_pad), jnp.float32).at[:H, :output_dim].set(w_fc.T)
    b_fc_p = jnp.zeros((1, O_pad), jnp.float32).at[0, :output_dim].set(b_fc)
    inputs += [w_fc_t.astype(jnp.bfloat16), b_fc_p]
    in_specs += [_const_spec((H_pad, O_pad)), _const_spec((1, O_pad))]

    scratch_shapes = [pltpu.VMEM((chunk, b_tile, 3 * H_pad), jnp.float32)]  # gi chunk
    if n_layers > 1:
        scratch_shapes.append(pltpu.VMEM((T, b_tile, H_pad), seq_dtype))    # handoff

    # ---- explicit VMEM budget (scoped default is 16/32 MiB; physical 64 MiB on v7x).
    budget = 2 * T * b_tile * D8 * 4                      # x block (double-buffered)
    budget += chunk * b_tile * 3 * H_pad * 4              # gi scratch
    if n_layers > 1:
        budget += T * b_tile * H_pad * seq_itemsize       # seq scratch
    for layer in range(n_layers):
        d_pad = D8 if layer == 0 else H_pad
        budget += (d_pad + H_pad) * 3 * H_pad * 2         # W_ih + W_hh (bf16, 1-buffered)
        budget += 4 * H_pad * 4                           # biases
    budget += H_pad * O_pad * 2 + O_pad * 4               # fc weight + bias
    budget += 2 * b_tile * O_pad * 4                      # out block (double-buffered)
    vmem_limit = int(min(max(budget + (8 << 20), 32 << 20), 64 << 20))

    kernel = functools.partial(_gru_net_kernel, n_layers=n_layers, seq_len=T,
                               chunk=chunk, b_tile=b_tile, h_pad=H_pad,
                               has_seq=(n_layers > 1))

    out_pad = pl.pallas_call(
        kernel,
        out_shape=jax.ShapeDtypeStruct((B_pad, O_pad), jnp.float32),
        grid_spec=pltpu.PrefetchScalarGridSpec(
            num_scalar_prefetch=0,
            grid=(B_pad // b_tile,),                 # batch tiles (parallel across TCs)
            in_specs=in_specs,
            out_specs=pl.BlockSpec((b_tile, O_pad), lambda i: (i, 0)),
            scratch_shapes=scratch_shapes),
        compiler_params=pltpu.CompilerParams(
            dimension_semantics=("parallel",),       # time recurrence stays in-kernel
            vmem_limit_bytes=vmem_limit),
    )(*inputs)
    # TODO(synk): nn.GRU inter-layer dropout and self.dropout are identity in eval mode;
    # training-mode dropout is not implemented.
    return out_pad[:B, :output_dim]


# --------------------------------------------------------------------------- reference
def gru_net_reference(x_btd, params, hidden_dim, n_layers):
    B, T, _ = x_btd.shape
    H = hidden_dim
    seq = jnp.transpose(x_btd, (1, 0, 2)).astype(jnp.float32)
    for layer in range(n_layers):
        w_ih, w_hh, b_ih, b_hh = params[f"gru_l{layer}"]
        h = jnp.zeros((B, H), jnp.float32)
        outs = []
        for t in range(T):
            gi = seq[t] @ w_ih.T + b_ih
            gh = h @ w_hh.T + b_hh
            r = jax.nn.sigmoid(gi[:, :H] + gh[:, :H])
            z = jax.nn.sigmoid(gi[:, H:2 * H] + gh[:, H:2 * H])
            n = jnp.tanh(gi[:, 2 * H:] + r * gh[:, 2 * H:])
            h = (1.0 - z) * n + z * h
            outs.append(h)
        seq = jnp.stack(outs, axis=0)
    w_fc, b_fc = params["fc"]
    return seq[-1] @ w_fc.T + b_fc


# --------------------------------------------------------------------------- params init
def init_params(key, input_dim, hidden_dim, output_dim, n_layers):
    params = {}
    k = 1.0 / jnp.sqrt(hidden_dim)
    for layer in range(n_layers):
        d_in = input_dim if layer == 0 else hidden_dim
        key, k1, k2, k3, k4 = jax.random.split(key, 5)
        params[f"gru_l{layer}"] = (
            jax.random.uniform(k1, (3 * hidden_dim, d_in), jnp.float32, -k, k),       # W_ih
            jax.random.uniform(k2, (3 * hidden_dim, hidden_dim), jnp.float32, -k, k), # W_hh
            jax.random.uniform(k3, (3 * hidden_dim,), jnp.float32, -k, k),            # b_ih
            jax.random.uniform(k4, (3 * hidden_dim,), jnp.float32, -k, k),            # b_hh
        )
    key, k1, k2 = jax.random.split(key, 3)
    kf = 1.0 / jnp.sqrt(hidden_dim)
    params["fc"] = (
        jax.random.uniform(k1, (output_dim, hidden_dim), jnp.float32, -kf, kf),
        jax.random.uniform(k2, (output_dim,), jnp.float32, -kf, kf),
    )
    return params


if __name__ == "__main__":
    B, T, D_IN, HIDDEN, OUT, N_LAYERS = 2, 8, 4, 32, 1, 2

    key = jax.random.PRNGKey(0)
    key, kx = jax.random.split(key)
    x = jax.random.normal(kx, (B, T, D_IN), jnp.float32)
    params = init_params(key, D_IN, HIDDEN, OUT, N_LAYERS)

    out = gru_net_forward(x, params, HIDDEN, OUT, N_LAYERS)
    out = jax.block_until_ready(out)

    ref = gru_net_reference(x, params, HIDDEN, N_LAYERS)
    assert out.shape == (B, OUT), out.shape
    # bf16 weights / matmul inputs with f32 accumulation -> looser tolerance vs f32 ref.
    assert jnp.allclose(out, ref, atol=2e-2, rtol=2e-2), (out, ref)

    print("KERNEL_OK")
</pallas_src>

<mosaic_0001>
module attributes {stable_mosaic.version = 11 : i64} {
  func.func @_gru_net_kernel(%arg0: i32, %arg1: memref<8x8x8xf32, #tpu.memory_space<vmem>>, %arg2: memref<8x384xbf16, #tpu.memory_space<vmem>>, %arg3: memref<128x256xbf16, #tpu.memory_space<vmem>>, %arg4: memref<128x128xbf16, #tpu.memory_space<vmem>>, %arg5: memref<1x384xf32, #tpu.memory_space<vmem>>, %arg6: memref<1x128xf32, #tpu.memory_space<vmem>>, %arg7: memref<128x384xbf16, #tpu.memory_space<vmem>>, %arg8: memref<128x256xbf16, #tpu.memory_space<vmem>>, %arg9: memref<128x128xbf16, #tpu.memory_space<vmem>>, %arg10: memref<1x384xf32, #tpu.memory_space<vmem>>, %arg11: memref<1x128xf32, #tpu.memory_space<vmem>>, %arg12: memref<128x128xbf16, #tpu.memory_space<vmem>>, %arg13: memref<1x128xf32, #tpu.memory_space<vmem>>, %arg14: memref<8x128xf32, #tpu.memory_space<vmem>>, %arg15: memref<8x8x384xf32, #tpu.memory_space<vmem>>, %arg16: memref<8x8x128xf32, #tpu.memory_space<vmem>>) attributes {dimension_semantics = [#tpu.dimension_semantics<parallel>], iteration_bounds = array<i64: 1>, scalar_prefetch = 0 : i64, scratch_operands = 2 : i64, tpu.core_type = #tpu.core_type<tc>, window_params = [{transform_indices = @transform_0, window_bounds = array<i64: 8, 8, 8>}, {pipeline_mode = #tpu.pipeline_mode<synchronous>, transform_indices = @transform_1, window_bounds = array<i64: 8, 384>}, {pipeline_mode = #tpu.pipeline_mode<synchronous>, transform_indices = @transform_2, window_bounds = array<i64: 128, 256>}, {pipeline_mode = #tpu.pipeline_mode<synchronous>, transform_indices = @transform_3, window_bounds = array<i64: 128, 128>}, {pipeline_mode = #tpu.pipeline_mode<synchronous>, transform_indices = @transform_4, window_bounds = array<i64: 1, 384>}, {pipeline_mode = #tpu.pipeline_mode<synchronous>, transform_indices = @transform_5, window_bounds = array<i64: 1, 128>}, {pipeline_mode = #tpu.pipeline_mode<synchronous>, transform_indices = @transform_6, window_bounds = array<i64: 128, 384>}, {pipeline_mode = #tpu.pipeline_mode<synchronous>, transform_indices = @transform_7, window_bounds = array<i64: 128, 256>}, {pipeline_mode = #tpu.pipeline_mode<synchronous>, transform_indices = @transform_8, window_bounds = array<i64: 128, 128>}, {pipeline_mode = #tpu.pipeline_mode<synchronous>, transform_indices = @transform_9, window_bounds = array<i64: 1, 384>}, {pipeline_mode = #tpu.pipeline_mode<synchronous>, transform_indices = @transform_10, window_bounds = array<i64: 1, 128>}, {pipeline_mode = #tpu.pipeline_mode<synchronous>, transform_indices = @transform_11, window_bounds = array<i64: 128, 128>}, {pipeline_mode = #tpu.pipeline_mode<synchronous>, transform_indices = @transform_12, window_bounds = array<i64: 1, 128>}, {transform_indices = @transform_13, window_bounds = array<i64: 8, 128>}]} {
    %c0 = arith.constant 0 : index
    %c0_0 = arith.constant 0 : index
    %0 = vector.load %arg2[%c0, %c0_0] : memref<8x384xbf16, #tpu.memory_space<vmem>>, vector<8x384xbf16>
    %c0_1 = arith.constant 0 : index
    %c0_2 = arith.constant 0 : index
    %1 = vector.load %arg3[%c0_1, %c0_2] : memref<128x256xbf16, #tpu.memory_space<vmem>>, vector<128x256xbf16>
    %c0_3 = arith.constant 0 : index
    %c0_4 = arith.constant 0 : index
    %2 = vector.load %arg4[%c0_3, %c0_4] : memref<128x128xbf16, #tpu.memory_space<vmem>>, vector<128x128xbf16>
    %c0_5 = arith.constant 0 : index
    %c0_6 = arith.constant 0 : index
    %3 = vector.load %arg5[%c0_5, %c0_6] : memref<1x384xf32, #tpu.memory_space<vmem>>, vector<1x384xf32>
    %c0_7 = arith.constant 0 : index
    %c0_8 = arith.constant 0 : index
    %4 = vector.load %arg6[%c0_7, %c0_8] : memref<1x128xf32, #tpu.memory_space<vmem>>, vector<1x128xf32>
    %cst = arith.constant 0.000000e+00 : f32
    %5 = vector.broadcast %cst : f32 to vector<8x128xf32>
    %c0_9 = arith.constant 0 : index
    %c0_10 = arith.constant 0 : index
    %c0_11 = arith.constant 0 : index
    %6 = vector.load %arg1[%c0_9, %c0_10, %c0_11] : memref<8x8x8xf32, #tpu.memory_space<vmem>>, vector<8x8x8xf32>
    %7 = vector.shape_cast %6 : vector<8x8x8xf32> to vector<64x8xf32>
    %8 = arith.truncf %7 : vector<64x8xf32> to vector<64x8xbf16>
    %cst_12 = arith.constant dense<0.000000e+00> : vector<64x384xf32>
    %9 = tpu.matmul %8, %0, %cst_12 {dimension_numbers = #tpu.dot_dimension_numbers<[1], [0], [0], [1], [0, 0, 1, 1], [], []>} : vector<64x8xbf16>, vector<8x384xbf16>, vector<64x384xf32> -> vector<64x384xf32>
    %10 = vector.broadcast %3 : vector<1x384xf32> to vector<64x384xf32>
    %11 = arith.addf %9, %10 : vector<64x384xf32>
    %12 = vector.shape_cast %11 : vector<64x384xf32> to vector<8x8x384xf32>
    %c0_13 = arith.constant 0 : index
    %c0_14 = arith.constant 0 : index
    %c0_15 = arith.constant 0 : index
    %13 = vector.load %arg15[%c0_13, %c0_14, %c0_15] : memref<8x8x384xf32, #tpu.memory_space<vmem>>, vector<8x8x384xf32>
    tpu.vector_store %arg15[%c0_13, %c0_14, %c0_15], %12 {strides = array<i32>} : memref<8x8x384xf32, #tpu.memory_space<vmem>>, vector<8x8x384xf32>,
    %c0_i32 = arith.constant 0 : i32
    %14 = arith.index_cast %c0_i32 : i32 to index
    %c0_16 = arith.constant 0 : index
    %c0_17 = arith.constant 0 : index
    %15 = vector.load %arg15[%14, %c0_16, %c0_17] : memref<8x8x384xf32, #tpu.memory_space<vmem>>, vector<1x8x384xf32>
    %16 = vector.shape_cast %15 : vector<1x8x384xf32> to vector<8x384xf32>
    %17 = arith.truncf %5 : vector<8x128xf32> to vector<8x128xbf16>
    %cst_18 = arith.constant dense<0.000000e+00> : vector<8x256xf32>
    %18 = tpu.matmul %17, %1, %cst_18 {dimension_numbers = #tpu.dot_dimension_numbers<[1], [0], [0], [1], [0, 0, 1, 1], [], []>} : vector<8x128xbf16>, vector<128x256xbf16>, vector<8x256xf32> -> vector<8x256xf32>
    %19 = vector.extract_strided_slice %16 {offsets = [0, 0], sizes = [8, 256], strides = [1, 1]} : vector<8x384xf32> to vector<8x256xf32>
    %20 = arith.addf %19, %18 : vector<8x256xf32>
    %21 = arith.negf %20 : vector<8x256xf32>
    %22 = math.exp %21 : vector<8x256xf32>
    %cst_19 = arith.constant 1.000000e+00 : f32
    %23 = vector.broadcast %cst_19 : f32 to vector<8x256xf32>
    %24 = arith.addf %23, %22 : vector<8x256xf32>
    %25 = arith.divf %23, %24 : vector<8x256xf32>
    %26 = vector.extract_strided_slice %25 {offsets = [0, 0], sizes = [8, 128], strides = [1, 1]} : vector<8x256xf32> to vector<8x128xf32>
    %27 = vector.extract_strided_slice %25 {offsets = [0, 128], sizes = [8, 128], strides = [1, 1]} : vector<8x256xf32> to vector<8x128xf32>
    %cst_20 = arith.constant dense<0.000000e+00> : vector<8x128xf32>
    %28 = tpu.matmul %17, %2, %cst_20 {dimension_numbers = #tpu.dot_dimension_numbers<[1], [0], [0], [1], [0, 0, 1, 1], [], []>} : vector<8x128xbf16>, vector<128x128xbf16>, vector<8x128xf32> -> vector<8x128xf32>
    %29 = vector.broadcast %4 : vector<1x128xf32> to vector<8x128xf32>
    %30 = arith.addf %28, %29 : vector<8x128xf32>
    %31 = vector.extract_strided_slice %16 {offsets = [0, 256], sizes = [8, 128], strides = [1, 1]} : vector<8x384xf32> to vector<8x128xf32>
    %32 = arith.mulf %26, %30 : vector<8x128xf32>
    %33 = arith.addf %31, %32 : vector<8x128xf32>
    %34 = math.tanh %33 : vector<8x128xf32>
    %cst_21 = arith.constant 1.000000e+00 : f32
    %35 = vector.broadcast %cst_21 : f32 to vector<8x128xf32>
    %36 = arith.subf %35, %27 : vector<8x128xf32>
    %37 = arith.mulf %36, %34 : vector<8x128xf32>
    %38 = arith.mulf %27, %5 : vector<8x128xf32>
    %39 = arith.addf %37, %38 : vector<8x128xf32>
    %c0_i32_22 = arith.constant 0 : i32
    %40 = arith.addi %c0_i32_22, %c0_i32 : i32
    %41 = arith.index_cast %40 : i32 to index
    %c0_23 = arith.constant 0 : index
    %c0_24 = arith.constant 0 : index
    %42 = vector.load %arg16[%41, %c0_23, %c0_24] : memref<8x8x128xf32, #tpu.memory_space<vmem>>, vector<1x8x128xf32>
    %43 = vector.shape_cast %42 : vector<1x8x128xf32> to vector<8x128xf32>
    %44 = vector.shape_cast %39 : vector<8x128xf32> to vector<1x8x128xf32>
    tpu.vector_store %arg16[%41, %c0_23, %c0_24], %44 {strides = array<i32>} : memref<8x8x128xf32, #tpu.memory_space<vmem>>, vector<1x8x128xf32>,
    %c1_i32 = arith.constant 1 : i32
    %45 = arith.index_cast %c1_i32 : i32 to index
    %c0_25 = arith.constant 0 : index
    %c0_26 = arith.constant 0 : index
    %46 = vector.load %arg15[%45, %c0_25, %c0_26] : memref<8x8x384xf32, #tpu.memory_space<vmem>>, vector<1x8x384xf32>
    %47 = vector.shape_cast %46 : vector<1x8x384xf32> to vector<8x384xf32>
    %48 = arith.truncf %39 : vector<8x128xf32> to vector<8x128xbf16>
    %cst_27 = arith.constant dense<0.000000e+00> : vector<8x256xf32>
    %49 = tpu.matmul %48, %1, %cst_27 {dimension_numbers = #tpu.dot_dimension_numbers<[1], [0], [0], [1], [0, 0, 1, 1], [], []>} : vector<8x128xbf16>, vector<128x256xbf16>, vector<8x256xf32> -> vector<8x256xf32>
    %50 = vector.extract_strided_slice %47 {offsets = [0, 0], sizes = [8, 256], strides = [1, 1]} : vector<8x384xf32> to vector<8x256xf32>
    %51 = arith.addf %50, %49 : vector<8x256xf32>
    %52 = arith.negf %51 : vector<8x256xf32>
    %53 = math.exp %52 : vector<8x256xf32>
    %cst_28 = arith.constant 1.000000e+00 : f32
    %54 = vector.broadcast %cst_28 : f32 to vector<8x256xf32>
    %55 = arith.addf %54, %53 : vector<8x256xf32>
    %56 = arith.divf %54, %55 : vector<8x256xf32>
    %57 = vector.extract_strided_slice %56 {offsets = [0, 0], sizes = [8, 128], strides = [1, 1]} : vector<8x256xf32> to vector<8x128xf32>
    %58 = vector.extract_strided_slice %56 {offsets = [0, 128], sizes = [8, 128], strides = [1, 1]} : vector<8x256xf32> to vector<8x128xf32>
    %cst_29 = arith.constant dense<0.000000e+00> : vector<8x128xf32>
    %59 = tpu.matmul %48, %2, %cst_29 {dimension_numbers = #tpu.dot_dimension_numbers<[1], [0], [0], [1], [0, 0, 1, 1], [], []>} : vector<8x128xbf16>, vector<128x128xbf16>, vector<8x128xf32> -> vector<8x128xf32>
    %60 = vector.broadcast %4 : vector<1x128xf32> to vector<8x128xf32>
    %61 = arith.addf %59, %60 : vector<8x128xf32>
    %62 = vector.extract_strided_slice %47 {offsets = [0, 256], sizes = [8, 128], strides = [1, 1]} : vector<8x384xf32> to vector<8x128xf32>
    %63 = arith.mulf %57, %61 : vector<8x128xf32>
    %64 = arith.addf %62, %63 : vector<8x128xf32>
    %65 = math.tanh %64 : vector<8x128xf32>
    %cst_30 = arith.constant 1.000000e+00 : f32
    %66 = vector.broadcast %cst_30 : f32 to vector<8x128xf32>
    %67 = arith.subf %66, %58 : vector<8x128xf32>
    %68 = arith.mulf %67, %65 : vector<8x128xf32>
    %69 = arith.mulf %58, %39 : vector<8x128xf32>
    %70 = arith.addf %68, %69 : vector<8x128xf32>
    %c0_i32_31 = arith.constant 0 : i32
    %71 = arith.addi %c0_i32_31, %c1_i32 : i32
    %72 = arith.index_cast %71 : i32 to index
    %c0_32 = arith.constant 0 : index
    %c0_33 = arith.constant 0 : index
    %73 = vector.load %arg16[%72, %c0_32, %c0_33] : memref<8x8x128xf32, #tpu.memory_space<vmem>>, vector<1x8x128xf32>
    %74 = vector.shape_cast %73 : vector<1x8x128xf32> to vector<8x128xf32>
    %75 = vector.shape_cast %70 : vector<8x128xf32> to vector<1x8x128xf32>
    tpu.vector_store %arg16[%72, %c0_32, %c0_33], %75 {strides = array<i32>} : memref<8x8x128xf32, #tpu.memory_space<vmem>>, vector<1x8x128xf32>,
    %c2_i32 = arith.constant 2 : i32
    %76 = arith.index_cast %c2_i32 : i32 to index
    %c0_34 = arith.constant 0 : index
    %c0_35 = arith.constant 0 : index
    %77 = vector.load %arg15[%76, %c0_34, %c0_35] : memref<8x8x384xf32, #tpu.memory_space<vmem>>, vector<1x8x384xf32>
    %78 = vector.shape_cast %77 : vector<1x8x384xf32> to vector<8x384xf32>
    %79 = arith.truncf %70 : vector<8x128xf32> to vector<8x128xbf16>
    %cst_36 = arith.constant dense<0.000000e+00> : vector<8x256xf32>
    %80 = tpu.matmul %79, %1, %cst_36 {dimension_numbers = #tpu.dot_dimension_numbers<[1], [0], [0], [1], [0, 0, 1, 1], [], []>} : vector<8x128xbf16>, vector<128x256xbf16>, vector<8x256xf32> -> vector<8x256xf32>
    %81 = vector.extract_strided_slice %78 {offsets = [0, 0], sizes = [8, 256], strides = [1, 1]} : vector<8x384xf32> to vector<8x256xf32>
    %82 = arith.addf %81, %80 : vector<8x256xf32>
    %83 = arith.negf %82 : vector<8x256xf32>
    %84 = math.exp %83 : vector<8x256xf32>
    %cst_37 = arith.constant 1.000000e+00 : f32
    %85 = vector.broadcast %cst_37 : f32 to vector<8x256xf32>
    %86 = arith.addf %85, %84 : vector<8x256xf32>
    %87 = arith.divf %85, %86 : vector<8x256xf32>
    %88 = vector.extract_strided_slice %87 {offsets = [0, 0], sizes = [8, 128], strides = [1, 1]} : vector<8x256xf32> to vector<8x128xf32>
    %89 = vector.extract_strided_slice %87 {offsets = [0, 128], sizes = [8, 128], strides = [1, 1]} : vector<8x256xf32> to vector<8x128xf32>
    %cst_38 = arith.constant dense<0.000000e+00> : vector<8x128xf32>
    %90 = tpu.matmul %79, %2, %cst_38 {dimension_numbers = #tpu.dot_dimension_numbers<[1], [0], [0], [1], [0, 0, 1, 1], [], []>} : vector<8x128xbf16>, vector<128x128xbf16>, vector<8x128xf32> -> vector<8x128xf32>
    %91 = vector.broadcast %4 : vector<1x128xf32> to vector<8x128xf32>
    %92 = arith.addf %90, %91 : vector<8x128xf32>
    %93 = vector.extract_strided_slice %78 {offsets = [0, 256], sizes = [8, 128], strides = [1, 1]} : vector<8x384xf32> to vector<8x128xf32>
    %94 = arith.mulf %88, %92 : vector<8x128xf32>
    %95 = arith.addf %93, %94 : vector<8x128xf32>
    %96 = math.tanh %95 : vector<8x128xf32>
    %cst_39 = arith.constant 1.000000e+00 : f32
    %97 = vector.broadcast %cst_39 : f32 to vector<8x128xf32>
    %98 = arith.subf %97, %89 : vector<8x128xf32>
    %99 = arith.mulf %98, %96 : vector<8x128xf32>
    %100 = arith.mulf %89, %70 : vector<8x128xf32>
    %101 = arith.addf %99, %100 : vector<8x128xf32>
    %c0_i32_40 = arith.constant 0 : i32
    %102 = arith.addi %c0_i32_40, %c2_i32 : i32
    %103 = arith.index_cast %102 : i32 to index
    %c0_41 = arith.constant 0 : index
    %c0_42 = arith.constant 0 : index
    %104 = vector.load %arg16[%103, %c0_41, %c0_42] : memref<8x8x128xf32, #tpu.memory_space<vmem>>, vector<1x8x128xf32>
    %105 = vector.shape_cast %104 : vector<1x8x128xf32> to vector<8x128xf32>
    %106 = vector.shape_cast %101 : vector<8x128xf32> to vector<1x8x128xf32>
    tpu.vector_store %arg16[%103, %c0_41, %c0_42], %106 {strides = array<i32>} : memref<8x8x128xf32, #tpu.memory_space<vmem>>, vector<1x8x128xf32>,
    %c3_i32 = arith.constant 3 : i32
    %107 = arith.index_cast %c3_i32 : i32 to index
    %c0_43 = arith.constant 0 : index
    %c0_44 = arith.constant 0 : index
    %108 = vector.load %arg15[%107, %c0_43, %c0_44] : memref<8x8x384xf32, #tpu.memory_space<vmem>>, vector<1x8x384xf32>
    %109 = vector.shape_cast %108 : vector<1x8x384xf32> to vector<8x384xf32>
    %110 = arith.truncf %101 : vector<8x128xf32> to vector<8x128xbf16>
    %cst_45 = arith.constant dense<0.000000e+00> : vector<8x256xf32>
    %111 = tpu.matmul %110, %1, %cst_45 {dimension_numbers = #tpu.dot_dimension_numbers<[1], [0], [0], [1], [0, 0, 1, 1], [], []>} : vector<8x128xbf16>, vector<128x256xbf16>, vector<8x256xf32> -> vector<8x256xf32>
    %112 = vector.extract_strided_slice %109 {offsets = [0, 0], sizes = [8, 256], strides = [1, 1]} : vector<8x384xf32> to vector<8x256xf32>
    %113 = arith.addf %112, %111 : vector<8x256xf32>
    %114 = arith.negf %113 : vector<8x256xf32>
    %115 = math.exp %114 : vector<8x256xf32>
    %cst_46 = arith.constant 1.000000e+00 : f32
    %116 = vector.broadcast %cst_46 : f32 to vector<8x256xf32>
    %117 = arith.addf %116, %115 : vector<8x256xf32>
    %118 = arith.divf %116, %117 : vector<8x256xf32>
    %119 = vector.extract_strided_slice %118 {offsets = [0, 0], sizes = [8, 128], strides = [1, 1]} : vector<8x256xf32> to vector<8x128xf32>
    %120 = vector.extract_strided_slice %118 {offsets = [0, 128], sizes = [8, 128], strides = [1, 1]} : vector<8x256xf32> to vector<8x128xf32>
    %cst_47 = arith.constant dense<0.000000e+00> : vector<8x128xf32>
    %121 = tpu.matmul %110, %2, %cst_47 {dimension_numbers = #tpu.dot_dimension_numbers<[1], [0], [0], [1], [0, 0, 1, 1], [], []>} : vector<8x128xbf16>, vector<128x128xbf16>, vector<8x128xf32> -> vector<8x128xf32>
    %122 = vector.broadcast %4 : vector<1x128xf32> to vector<8x128xf32>
    %123 = arith.addf %121, %122 : vector<8x128xf32>
    %124 = vector.extract_strided_slice %109 {offsets = [0, 256], sizes = [8, 128], strides = [1, 1]} : vector<8x384xf32> to vector<8x128xf32>
    %125 = arith.mulf %119, %123 : vector<8x128xf32>
    %126 = arith.addf %124, %125 : vector<8x128xf32>
    %127 = math.tanh %126 : vector<8x128xf32>
    %cst_48 = arith.constant 1.000000e+00 : f32
    %128 = vector.broadcast %cst_48 : f32 to vector<8x128xf32>
    %129 = arith.subf %128, %120 : vector<8x128xf32>
    %130 = arith.mulf %129, %127 : vector<8x128xf32>
    %131 = arith.mulf %120, %101 : vector<8x128xf32>
    %132 = arith.addf %130, %131 : vector<8x128xf32>
    %c0_i32_49 = arith.constant 0 : i32
    %133 = arith.addi %c0_i32_49, %c3_i32 : i32
    %134 = arith.index_cast %133 : i32 to index
    %c0_50 = arith.constant 0 : index
    %c0_51 = arith.constant 0 : index
    %135 = vector.load %arg16[%134, %c0_50, %c0_51] : memref<8x8x128xf32, #tpu.memory_space<vmem>>, vector<1x8x128xf32>
    %136 = vector.shape_cast %135 : vector<1x8x128xf32> to vector<8x128xf32>
    %137 = vector.shape_cast %132 : vector<8x128xf32> to vector<1x8x128xf32>
    tpu.vector_store %arg16[%134, %c0_50, %c0_51], %137 {strides = array<i32>} : memref<8x8x128xf32, #tpu.memory_space<vmem>>, vector<1x8x128xf32>,
    %c4_i32 = arith.constant 4 : i32
    %138 = arith.index_cast %c4_i32 : i32 to index
    %c0_52 = arith.constant 0 : index
    %c0_53 = arith.constant 0 : index
    %139 = vector.load %arg15[%138, %c0_52, %c0_53] : memref<8x8x384xf32, #tpu.memory_space<vmem>>, vector<1x8x384xf32>
    %140 = vector.shape_cast %139 : vector<1x8x384xf32> to vector<8x384xf32>
    %141 = arith.truncf %132 : vector<8x128xf32> to vector<8x128xbf16>
    %cst_54 = arith.constant dense<0.000000e+00> : vector<8x256xf32>
    %142 = tpu.matmul %141, %1, %cst_54 {dimension_numbers = #tpu.dot_dimension_numbers<[1], [0], [0], [1], [0, 0, 1, 1], [], []>} : vector<8x128xbf16>, vector<128x256xbf16>, vector<8x256xf32> -> vector<8x256xf32>
    %143 = vector.extract_strided_slice %140 {offsets = [0, 0], sizes = [8, 256], strides = [1, 1]} : vector<8x384xf32> to vector<8x256xf32>
    %144 = arith.addf %143, %142 : vector<8x256xf32>
    %145 = arith.negf %144 : vector<8x256xf32>
    %146 = math.exp %145 : vector<8x256xf32>
    %cst_55 = arith.constant 1.000000e+00 : f32
    %147 = vector.broadcast %cst_55 : f32 to vector<8x256xf32>
    %148 = arith.addf %147, %146 : vector<8x256xf32>
    %149 = arith.divf %147, %148 : vector<8x256xf32>
    %150 = vector.extract_strided_slice %149 {offsets = [0, 0], sizes = [8, 128], strides = [1, 1]} : vector<8x256xf32> to vector<8x128xf32>
    %151 = vector.extract_strided_slice %149 {offsets = [0, 128], sizes = [8, 128], strides = [1, 1]} : vector<8x256xf32> to vector<8x128xf32>
    %cst_56 = arith.constant dense<0.000000e+00> : vector<8x128xf32>
    %152 = tpu.matmul %141, %2, %cst_56 {dimension_numbers = #tpu.dot_dimension_numbers<[1], [0], [0], [1], [0, 0, 1, 1], [], []>} : vector<8x128xbf16>, vector<128x128xbf16>, vector<8x128xf32> -> vector<8x128xf32>
    %153 = vector.broadcast %4 : vector<1x128xf32> to vector<8x128xf32>
    %154 = arith.addf %152, %153 : vector<8x128xf32>
    %155 = vector.extract_strided_slice %140 {offsets = [0, 256], sizes = [8, 128], strides = [1, 1]} : vector<8x384xf32> to vector<8x128xf32>
    %156 = arith.mulf %150, %154 : vector<8x128xf32>
    %157 = arith.addf %155, %156 : vector<8x128xf32>
    %158 = math.tanh %157 : vector<8x128xf32>
    %cst_57 = arith.constant 1.000000e+00 : f32
    %159 = vector.broadcast %cst_57 : f32 to vector<8x128xf32>
    %160 = arith.subf %159, %151 : vector<8x128xf32>
    %161 = arith.mulf %160, %158 : vector<8x128xf32>
    %162 = arith.mulf %151, %132 : vector<8x128xf32>
    %163 = arith.addf %161, %162 : vector<8x128xf32>
    %c0_i32_58 = arith.constant 0 : i32
    %164 = arith.addi %c0_i32_58, %c4_i32 : i32
    %165 = arith.index_cast %164 : i32 to index
    %c0_59 = arith.constant 0 : index
    %c0_60 = arith.constant 0 : index
    %166 = vector.load %arg16[%165, %c0_59, %c0_60] : memref<8x8x128xf32, #tpu.memory_space<vmem>>, vector<1x8x128xf32>
    %167 = vector.shape_cast %166 : vector<1x8x128xf32> to vector<8x128xf32>
    %168 = vector.shape_cast %163 : vector<8x128xf32> to vector<1x8x128xf32>
    tpu.vector_store %arg16[%165, %c0_59, %c0_60], %168 {strides = array<i32>} : memref<8x8x128xf32, #tpu.memory_space<vmem>>, vector<1x8x128xf32>,
    %c5_i32 = arith.constant 5 : i32
    %169 = arith.index_cast %c5_i32 : i32 to index
    %c0_61 = arith.constant 0 : index
    %c0_62 = arith.constant 0 : index
    %170 = vector.load %arg15[%169, %c0_61, %c0_62] : memref<8x8x384xf32, #tpu.memory_space<vmem>>, vector<1x8x384xf32>
    %171 = vector.shape_cast %170 : vector<1x8x384xf32> to vector<8x384xf32>
    %172 = arith.truncf %163 : vector<8x128xf32> to vector<8x128xbf16>
    %cst_63 = arith.constant dense<0.000000e+00> : vector<8x256xf32>
    %173 = tpu.matmul %172, %1, %cst_63 {dimension_numbers = #tpu.dot_dimension_numbers<[1], [0], [0], [1], [0, 0, 1, 1], [], []>} : vector<8x128xbf16>, vector<128x256xbf16>, vector<8x256xf32> -> vector<8x256xf32>
    %174 = vector.extract_strided_slice %171 {offsets = [0, 0], sizes = [8, 256], strides = [1, 1]} : vector<8x384xf32> to vector<8x256xf32>
    %175 = arith.addf %174, %173 : vector<8x256xf32>
    %176 = arith.negf %175 : vector<8x256xf32>
    %177 = math.exp %176 : vector<8x256xf32>
    %cst_64 = arith.constant 1.000000e+00 : f32
    %178 = vector.broadcast %cst_64 : f32 to vector<8x256xf32>
    %179 = arith.addf %178, %177 : vector<8x256xf32>
    %180 = arith.divf %178, %179 : vector<8x256xf32>
    %181 = vector.extract_strided_slice %180 {offsets = [0, 0], sizes = [8, 128], strides = [1, 1]} : vector<8x256xf32> to vector<8x128xf32>
    %182 = vector.extract_strided_slice %180 {offsets = [0, 128], sizes = [8, 128], strides = [1, 1]} : vector<8x256xf32> to vector<8x128xf32>
    %cst_65 = arith.constant dense<0.000000e+00> : vector<8x128xf32>
    %183 = tpu.matmul %172, %2, %cst_65 {dimension_numbers = #tpu.dot_dimension_numbers<[1], [0], [0], [1], [0, 0, 1, 1], [], []>} : vector<8x128xbf16>, vector<128x128xbf16>, vector<8x128xf32> -> vector<8x128xf32>
    %184 = vector.broadcast %4 : vector<1x128xf32> to vector<8x128xf32>
    %185 = arith.addf %183, %184 : vector<8x128xf32>
    %186 = vector.extract_strided_slice %171 {offsets = [0, 256], sizes = [8, 128], strides = [1, 1]} : vector<8x384xf32> to vector<8x128xf32>
    %187 = arith.mulf %181, %185 : vector<8x128xf32>
    %188 = arith.addf %186, %187 : vector<8x128xf32>
    %189 = math.tanh %188 : vector<8x128xf32>
    %cst_66 = arith.constant 1.000000e+00 : f32
    %190 = vector.broadcast %cst_66 : f32 to vector<8x128xf32>
    %191 = arith.subf %190, %182 : vector<8x128xf32>
    %192 = arith.mulf %191, %189 : vector<8x128xf32>
    %193 = arith.mulf %182, %163 : vector<8x128xf32>
    %194 = arith.addf %192, %193 : vector<8x128xf32>
    %c0_i32_67 = arith.constant 0 : i32
    %195 = arith.addi %c0_i32_67, %c5_i32 : i32
    %196 = arith.index_cast %195 : i32 to index
    %c0_68 = arith.constant 0 : index
    %c0_69 = arith.constant 0 : index
    %197 = vector.load %arg16[%196, %c0_68, %c0_69] : memref<8x8x128xf32, #tpu.memory_space<vmem>>, vector<1x8x128xf32>
    %198 = vector.shape_cast %197 : vector<1x8x128xf32> to vector<8x128xf32>
    %199 = vector.shape_cast %194 : vector<8x128xf32> to vector<1x8x128xf32>
    tpu.vector_store %arg16[%196, %c0_68, %c0_69], %199 {strides = array<i32>} : memref<8x8x128xf32, #tpu.memory_space<vmem>>, vector<1x8x128xf32>,
    %c6_i32 = arith.constant 6 : i32
    %200 = arith.index_cast %c6_i32 : i32 to index
    %c0_70 = arith.constant 0 : index
    %c0_71 = arith.constant 0 : index
    %201 = vector.load %arg15[%200, %c0_70, %c0_71] : memref<8x8x384xf32, #tpu.memory_space<vmem>>, vector<1x8x384xf32>
    %202 = vector.shape_cast %201 : vector<1x8x384xf32> to vector<8x384xf32>
    %203 = arith.truncf %194 : vector<8x128xf32> to vector<8x128xbf16>
    %cst_72 = arith.constant dense<0.000000e+00> : vector<8x256xf32>
    %204 = tpu.matmul %203, %1, %cst_72 {dimension_numbers = #tpu.dot_dimension_numbers<[1], [0], [0], [1], [0, 0, 1, 1], [], []>} : vector<8x128xbf16>, vector<128x256xbf16>, vector<8x256xf32> -> vector<8x256xf32>
    %205 = vector.extract_strided_slice %202 {offsets = [0, 0], sizes = [8, 256], strides = [1, 1]} : vector<8x384xf32> to vector<8x256xf32>
    %206 = arith.addf %205, %204 : vector<8x256xf32>
    %207 = arith.negf %206 : vector<8x256xf32>
    %208 = math.exp %207 : vector<8x256xf32>
    %cst_73 = arith.constant 1.000000e+00 : f32
    %209 = vector.broadcast %cst_73 : f32 to vector<8x256xf32>
    %210 = arith.addf %209, %208 : vector<8x256xf32>
    %211 = arith.divf %209, %210 : vector<8x256xf32>
    %212 = vector.extract_strided_slice %211 {offsets = [0, 0], sizes = [8, 128], strides = [1, 1]} : vector<8x256xf32> to vector<8x128xf32>
    %213 = vector.extract_strided_slice %211 {offsets = [0, 128], sizes = [8, 128], strides = [1, 1]} : vector<8x256xf32> to vector<8x128xf32>
    %cst_74 = arith.constant dense<0.000000e+00> : vector<8x128xf32>
    %214 = tpu.matmul %203, %2, %cst_74 {dimension_numbers = #tpu.dot_dimension_numbers<[1], [0], [0], [1], [0, 0, 1, 1], [], []>} : vector<8x128xbf16>, vector<128x128xbf16>, vector<8x128xf32> -> vector<8x128xf32>
    %215 = vector.broadcast %4 : vector<1x128xf32> to vector<8x128xf32>
    %216 = arith.addf %214, %215 : vector<8x128xf32>
    %217 = vector.extract_strided_slice %202 {offsets = [0, 256], sizes = [8, 128], strides = [1, 1]} : vector<8x384xf32> to vector<8x128xf32>
    %218 = arith.mulf %212, %216 : vector<8x128xf32>
    %219 = arith.addf %217, %218 : vector<8x128xf32>
    %220 = math.tanh %219 : vector<8x128xf32>
    %cst_75 = arith.constant 1.000000e+00 : f32
    %221 = vector.broadcast %cst_75 : f32 to vector<8x128xf32>
    %222 = arith.subf %221, %213 : vector<8x128xf32>
    %223 = arith.mulf %222, %220 : vector<8x128xf32>
    %224 = arith.mulf %213, %194 : vector<8x128xf32>
    %225 = arith.addf %223, %224 : vector<8x128xf32>
    %c0_i32_76 = arith.constant 0 : i32
    %226 = arith.addi %c0_i32_76, %c6_i32 : i32
    %227 = arith.index_cast %226 : i32 to index
    %c0_77 = arith.constant 0 : index
    %c0_78 = arith.constant 0 : index
    %228 = vector.load %arg16[%227, %c0_77, %c0_78] : memref<8x8x128xf32, #tpu.memory_space<vmem>>, vector<1x8x128xf32>
    %229 = vector.shape_cast %228 : vector<1x8x128xf32> to vector<8x128xf32>
    %230 = vector.shape_cast %225 : vector<8x128xf32> to vector<1x8x128xf32>
    tpu.vector_store %arg16[%227, %c0_77, %c0_78], %230 {strides = array<i32>} : memref<8x8x128xf32, #tpu.memory_space<vmem>>, vector<1x8x128xf32>,
    %c7_i32 = arith.constant 7 : i32
    %231 = arith.index_cast %c7_i32 : i32 to index
    %c0_79 = arith.constant 0 : index
    %c0_80 = arith.constant 0 : index
    %232 = vector.load %arg15[%231, %c0_79, %c0_80] : memref<8x8x384xf32, #tpu.memory_space<vmem>>, vector<1x8x384xf32>
    %233 = vector.shape_cast %232 : vector<1x8x384xf32> to vector<8x384xf32>
    %234 = arith.truncf %225 : vector<8x128xf32> to vector<8x128xbf16>
    %cst_81 = arith.constant dense<0.000000e+00> : vector<8x256xf32>
    %235 = tpu.matmul %234, %1, %cst_81 {dimension_numbers = #tpu.dot_dimension_numbers<[1], [0], [0], [1], [0, 0, 1, 1], [], []>} : vector<8x128xbf16>, vector<128x256xbf16>, vector<8x256xf32> -> vector<8x256xf32>
    %236 = vector.extract_strided_slice %233 {offsets = [0, 0], sizes = [8, 256], strides = [1, 1]} : vector<8x384xf32> to vector<8x256xf32>
    %237 = arith.addf %236, %235 : vector<8x256xf32>
    %238 = arith.negf %237 : vector<8x256xf32>
    %239 = math.exp %238 : vector<8x256xf32>
    %cst_82 = arith.constant 1.000000e+00 : f32
    %240 = vector.broadcast %cst_82 : f32 to vector<8x256xf32>
    %241 = arith.addf %240, %239 : vector<8x256xf32>
    %242 = arith.divf %240, %241 : vector<8x256xf32>
    %243 = vector.extract_strided_slice %242 {offsets = [0, 0], sizes = [8, 128], strides = [1, 1]} : vector<8x256xf32> to vector<8x128xf32>
    %244 = vector.extract_strided_slice %242 {offsets = [0, 128], sizes = [8, 128], strides = [1, 1]} : vector<8x256xf32> to vector<8x128xf32>
    %cst_83 = arith.constant dense<0.000000e+00> : vector<8x128xf32>
    %245 = tpu.matmul %234, %2, %cst_83 {dimension_numbers = #tpu.dot_dimension_numbers<[1], [0], [0], [1], [0, 0, 1, 1], [], []>} : vector<8x128xbf16>, vector<128x128xbf16>, vector<8x128xf32> -> vector<8x128xf32>
    %246 = vector.broadcast %4 : vector<1x128xf32> to vector<8x128xf32>
    %247 = arith.addf %245, %246 : vector<8x128xf32>
    %248 = vector.extract_strided_slice %233 {offsets = [0, 256], sizes = [8, 128], strides = [1, 1]} : vector<8x384xf32> to vector<8x128xf32>
    %249 = arith.mulf %243, %247 : vector<8x128xf32>
    %250 = arith.addf %248, %249 : vector<8x128xf32>
    %251 = math.tanh %250 : vector<8x128xf32>
    %cst_84 = arith.constant 1.000000e+00 : f32
    %252 = vector.broadcast %cst_84 : f32 to vector<8x128xf32>
    %253 = arith.subf %252, %244 : vector<8x128xf32>
    %254 = arith.mulf %253, %251 : vector<8x128xf32>
    %255 = arith.mulf %244, %225 : vector<8x128xf32>
    %256 = arith.addf %254, %255 : vector<8x128xf32>
    %c0_i32_85 = arith.constant 0 : i32
    %257 = arith.addi %c0_i32_85, %c7_i32 : i32
    %258 = arith.index_cast %257 : i32 to index
    %c0_86 = arith.constant 0 : index
    %c0_87 = arith.constant 0 : index
    %259 = vector.load %arg16[%258, %c0_86, %c0_87] : memref<8x8x128xf32, #tpu.memory_space<vmem>>, vector<1x8x128xf32>
    %260 = vector.shape_cast %259 : vector<1x8x128xf32> to vector<8x128xf32>
    %261 = vector.shape_cast %256 : vector<8x128xf32> to vector<1x8x128xf32>
    tpu.vector_store %arg16[%258, %c0_86, %c0_87], %261 {strides = array<i32>} : memref<8x8x128xf32, #tpu.memory_space<vmem>>, vector<1x8x128xf32>,
    %c8_i32 = arith.constant 8 : i32
    %c0_88 = arith.constant 0 : index
    %c0_89 = arith.constant 0 : index
    %262 = vector.load %arg7[%c0_88, %c0_89] : memref<128x384xbf16, #tpu.memory_space<vmem>>, vector<128x384xbf16>
    %c0_90 = arith.constant 0 : index
    %c0_91 = arith.constant 0 : index
    %263 = vector.load %arg8[%c0_90, %c0_91] : memref<128x256xbf16, #tpu.memory_space<vmem>>, vector<128x256xbf16>
    %c0_92 = arith.constant 0 : index
    %c0_93 = arith.constant 0 : index
    %264 = vector.load %arg9[%c0_92, %c0_93] : memref<128x128xbf16, #tpu.memory_space<vmem>>, vector<128x128xbf16>
    %c0_94 = arith.constant 0 : index
    %c0_95 = arith.constant 0 : index
    %265 = vector.load %arg10[%c0_94, %c0_95] : memref<1x384xf32, #tpu.memory_space<vmem>>, vector<1x384xf32>
    %c0_96 = arith.constant 0 : index
    %c0_97 = arith.constant 0 : index
    %266 = vector.load %arg11[%c0_96, %c0_97] : memref<1x128xf32, #tpu.memory_space<vmem>>, vector<1x128xf32>
    %cst_98 = arith.constant 0.000000e+00 : f32
    %267 = vector.broadcast %cst_98 : f32 to vector<8x128xf32>
    %c0_99 = arith.constant 0 : index
    %c0_100 = arith.constant 0 : index
    %c0_101 = arith.constant 0 : index
    %268 = vector.load %arg16[%c0_99, %c0_100, %c0_101] : memref<8x8x128xf32, #tpu.memory_space<vmem>>, vector<8x8x128xf32>
    %269 = vector.shape_cast %268 : vector<8x8x128xf32> to vector<64x128xf32>
    %270 = arith.truncf %269 : vector<64x128xf32> to vector<64x128xbf16>
    %cst_102 = arith.constant dense<0.000000e+00> : vector<64x384xf32>
    %271 = tpu.matmul %270, %262, %cst_102 {dimension_numbers = #tpu.dot_dimension_numbers<[1], [0], [0], [1], [0, 0, 1, 1], [], []>} : vector<64x128xbf16>, vector<128x384xbf16>, vector<64x384xf32> -> vector<64x384xf32>
    %272 = vector.broadcast %265 : vector<1x384xf32> to vector<64x384xf32>
    %273 = arith.addf %271, %272 : vector<64x384xf32>
    %274 = vector.shape_cast %273 : vector<64x384xf32> to vector<8x8x384xf32>
    %c0_103 = arith.constant 0 : index
    %c0_104 = arith.constant 0 : index
    %c0_105 = arith.constant 0 : index
    %275 = vector.load %arg15[%c0_103, %c0_104, %c0_105] : memref<8x8x384xf32, #tpu.memory_space<vmem>>, vector<8x8x384xf32>
    tpu.vector_store %arg15[%c0_103, %c0_104, %c0_105], %274 {strides = array<i32>} : memref<8x8x384xf32, #tpu.memory_space<vmem>>, vector<8x8x384xf32>,
    %c0_i32_106 = arith.constant 0 : i32
    %276 = arith.index_cast %c0_i32_106 : i32 to index
    %c0_107 = arith.constant 0 : index
    %c0_108 = arith.constant 0 : index
    %277 = vector.load %arg15[%276, %c0_107, %c0_108] : memref<8x8x384xf32, #tpu.memory_space<vmem>>, vector<1x8x384xf32>
    %278 = vector.shape_cast %277 : vector<1x8x384xf32> to vector<8x384xf32>
    %279 = arith.truncf %267 : vector<8x128xf32> to vector<8x128xbf16>
    %cst_109 = arith.constant dense<0.000000e+00> : vector<8x256xf32>
    %280 = tpu.matmul %279, %263, %cst_109 {dimension_numbers = #tpu.dot_dimension_numbers<[1], [0], [0], [1], [0, 0, 1, 1], [], []>} : vector<8x128xbf16>, vector<128x256xbf16>, vector<8x256xf32> -> vector<8x256xf32>
    %281 = vector.extract_strided_slice %278 {offsets = [0, 0], sizes = [8, 256], strides = [1, 1]} : vector<8x384xf32> to vector<8x256xf32>
    %282 = arith.addf %281, %280 : vector<8x256xf32>
    %283 = arith.negf %282 : vector<8x256xf32>
    %284 = math.exp %283 : vector<8x256xf32>
    %cst_110 = arith.constant 1.000000e+00 : f32
    %285 = vector.broadcast %cst_110 : f32 to vector<8x256xf32>
    %286 = arith.addf %285, %284 : vector<8x256xf32>
    %287 = arith.divf %285, %286 : vector<8x256xf32>
    %288 = vector.extract_strided_slice %287 {offsets = [0, 0], sizes = [8, 128], strides = [1, 1]} : vector<8x256xf32> to vector<8x128xf32>
    %289 = vector.extract_strided_slice %287 {offsets = [0, 128], sizes = [8, 128], strides = [1, 1]} : vector<8x256xf32> to vector<8x128xf32>
    %cst_111 = arith.constant dense<0.000000e+00> : vector<8x128xf32>
    %290 = tpu.matmul %279, %264, %cst_111 {dimension_numbers = #tpu.dot_dimension_numbers<[1], [0], [0], [1], [0, 0, 1, 1], [], []>} : vector<8x128xbf16>, vector<128x128xbf16>, vector<8x128xf32> -> vector<8x128xf32>
    %291 = vector.broadcast %266 : vector<1x128xf32> to vector<8x128xf32>
    %292 = arith.addf %290, %291 : vector<8x128xf32>
    %293 = vector.extract_strided_slice %278 {offsets = [0, 256], sizes = [8, 128], strides = [1, 1]} : vector<8x384xf32> to vector<8x128xf32>
    %294 = arith.mulf %288, %292 : vector<8x128xf32>
    %295 = arith.addf %293, %294 : vector<8x128xf32>
    %296 = math.tanh %295 : vector<8x128xf32>
    %cst_112 = arith.constant 1.000000e+00 : f32
    %297 = vector.broadcast %cst_112 : f32 to vector<8x128xf32>
    %298 = arith.subf %297, %289 : vector<8x128xf32>
    %299 = arith.mulf %298, %296 : vector<8x128xf32>
    %300 = arith.mulf %289, %267 : vector<8x128xf32>
    %301 = arith.addf %299, %300 : vector<8x128xf32>
    %c1_i32_113 = arith.constant 1 : i32
    %302 = arith.index_cast %c1_i32_113 : i32 to index
    %c0_114 = arith.constant 0 : index
    %c0_115 = arith.constant 0 : index
    %303 = vector.load %arg15[%302, %c0_114, %c0_115] : memref<8x8x384xf32, #tpu.memory_space<vmem>>, vector<1x8x384xf32>
    %304 = vector.shape_cast %303 : vector<1x8x384xf32> to vector<8x384xf32>
    %305 = arith.truncf %301 : vector<8x128xf32> to vector<8x128xbf16>
    %cst_116 = arith.constant dense<0.000000e+00> : vector<8x256xf32>
    %306 = tpu.matmul %305, %263, %cst_116 {dimension_numbers = #tpu.dot_dimension_numbers<[1], [0], [0], [1], [0, 0, 1, 1], [], []>} : vector<8x128xbf16>, vector<128x256xbf16>, vector<8x256xf32> -> vector<8x256xf32>
    %307 = vector.extract_strided_slice %304 {offsets = [0, 0], sizes = [8, 256], strides = [1, 1]} : vector<8x384xf32> to vector<8x256xf32>
    %308 = arith.addf %307, %306 : vector<8x256xf32>
    %309 = arith.negf %308 : vector<8x256xf32>
    %310 = math.exp %309 : vector<8x256xf32>
    %cst_117 = arith.constant 1.000000e+00 : f32
    %311 = vector.broadcast %cst_117 : f32 to vector<8x256xf32>
    %312 = arith.addf %311, %310 : vector<8x256xf32>
    %313 = arith.divf %311, %312 : vector<8x256xf32>
    %314 = vector.extract_strided_slice %313 {offsets = [0, 0], sizes = [8, 128], strides = [1, 1]} : vector<8x256xf32> to vector<8x128xf32>
    %315 = vector.extract_strided_slice %313 {offsets = [0, 128], sizes = [8, 128], strides = [1, 1]} : vector<8x256xf32> to vector<8x128xf32>
    %cst_118 = arith.constant dense<0.000000e+00> : vector<8x128xf32>
    %316 = tpu.matmul %305, %264, %cst_118 {dimension_numbers = #tpu.dot_dimension_numbers<[1], [0], [0], [1], [0, 0, 1, 1], [], []>} : vector<8x128xbf16>, vector<128x128xbf16>, vector<8x128xf32> -> vector<8x128xf32>
    %317 = vector.broadcast %266 : vector<1x128xf32> to vector<8x128xf32>
    %318 = arith.addf %316, %317 : vector<8x128xf32>
    %319 = vector.extract_strided_slice %304 {offsets = [0, 256], sizes = [8, 128], strides = [1, 1]} : vector<8x384xf32> to vector<8x128xf32>
    %320 = arith.mulf %314, %318 : vector<8x128xf32>
    %321 = arith.addf %319, %320 : vector<8x128xf32>
    %322 = math.tanh %321 : vector<8x128xf32>
    %cst_119 = arith.constant 1.000000e+00 : f32
    %323 = vector.broadcast %cst_119 : f32 to vector<8x128xf32>
    %324 = arith.subf %323, %315 : vector<8x128xf32>
    %325 = arith.mulf %324, %322 : vector<8x128xf32>
    %326 = arith.mulf %315, %301 : vector<8x128xf32>
    %327 = arith.addf %325, %326 : vector<8x128xf32>
    %c2_i32_120 = arith.constant 2 : i32
    %328 = arith.index_cast %c2_i32_120 : i32 to index
    %c0_121 = arith.constant 0 : index
    %c0_122 = arith.constant 0 : index
    %329 = vector.load %arg15[%328, %c0_121, %c0_122] : memref<8x8x384xf32, #tpu.memory_space<vmem>>, vector<1x8x384xf32>
    %330 = vector.shape_cast %329 : vector<1x8x384xf32> to vector<8x384xf32>
    %331 = arith.truncf %327 : vector<8x128xf32> to vector<8x128xbf16>
    %cst_123 = arith.constant dense<0.000000e+00> : vector<8x256xf32>
    %332 = tpu.matmul %331, %263, %cst_123 {dimension_numbers = #tpu.dot_dimension_numbers<[1], [0], [0], [1], [0, 0, 1, 1], [], []>} : vector<8x128xbf16>, vector<128x256xbf16>, vector<8x256xf32> -> vector<8x256xf32>
    %333 = vector.extract_strided_slice %330 {offsets = [0, 0], sizes = [8, 256], strides = [1, 1]} : vector<8x384xf32> to vector<8x256xf32>
    %334 = arith.addf %333, %332 : vector<8x256xf32>
    %335 = arith.negf %334 : vector<8x256xf32>
    %336 = math.exp %335 : vector<8x256xf32>
    %cst_124 = arith.constant 1.000000e+00 : f32
    %337 = vector.broadcast %cst_124 : f32 to vector<8x256xf32>
    %338 = arith.addf %337, %336 : vector<8x256xf32>
    %339 = arith.divf %337, %338 : vector<8x256xf32>
    %340 = vector.extract_strided_slice %339 {offsets = [0, 0], sizes = [8, 128], strides = [1, 1]} : vector<8x256xf32> to vector<8x128xf32>
    %341 = vector.extract_strided_slice %339 {offsets = [0, 128], sizes = [8, 128], strides = [1, 1]} : vector<8x256xf32> to vector<8x128xf32>
    %cst_125 = arith.constant dense<0.000000e+00> : vector<8x128xf32>
    %342 = tpu.matmul %331, %264, %cst_125 {dimension_numbers = #tpu.dot_dimension_numbers<[1], [0], [0], [1], [0, 0, 1, 1], [], []>} : vector<8x128xbf16>, vector<128x128xbf16>, vector<8x128xf32> -> vector<8x128xf32>
    %343 = vector.broadcast %266 : vector<1x128xf32> to vector<8x128xf32>
    %344 = arith.addf %342, %343 : vector<8x128xf32>
    %345 = vector.extract_strided_slice %330 {offsets = [0, 256], sizes = [8, 128], strides = [1, 1]} : vector<8x384xf32> to vector<8x128xf32>
    %346 = arith.mulf %340, %344 : vector<8x128xf32>
    %347 = arith.addf %345, %346 : vector<8x128xf32>
    %348 = math.tanh %347 : vector<8x128xf32>
    %cst_126 = arith.constant 1.000000e+00 : f32
    %349 = vector.broadcast %cst_126 : f32 to vector<8x128xf32>
    %350 = arith.subf %349, %341 : vector<8x128xf32>
    %351 = arith.mulf %350, %348 : vector<8x128xf32>
    %352 = arith.mulf %341, %327 : vector<8x128xf32>
    %353 = arith.addf %351, %352 : vector<8x128xf32>
    %c3_i32_127 = arith.constant 3 : i32
    %354 = arith.index_cast %c3_i32_127 : i32 to index
    %c0_128 = arith.constant 0 : index
    %c0_129 = arith.constant 0 : index
    %355 = vector.load %arg15[%354, %c0_128, %c0_129] : memref<8x8x384xf32, #tpu.memory_space<vmem>>, vector<1x8x384xf32>
    %356 = vector.shape_cast %355 : vector<1x8x384xf32> to vector<8x384xf32>
    %357 = arith.truncf %353 : vector<8x128xf32> to vector<8x128xbf16>
    %cst_130 = arith.constant dense<0.000000e+00> : vector<8x256xf32>
    %358 = tpu.matmul %357, %263, %cst_130 {dimension_numbers = #tpu.dot_dimension_numbers<[1], [0], [0], [1], [0, 0, 1, 1], [], []>} : vector<8x128xbf16>, vector<128x256xbf16>, vector<8x256xf32> -> vector<8x256xf32>
    %359 = vector.extract_strided_slice %356 {offsets = [0, 0], sizes = [8, 256], strides = [1, 1]} : vector<8x384xf32> to vector<8x256xf32>
    %360 = arith.addf %359, %358 : vector<8x256xf32>
    %361 = arith.negf %360 : vector<8x256xf32>
    %362 = math.exp %361 : vector<8x256xf32>
    %cst_131 = arith.constant 1.000000e+00 : f32
    %363 = vector.broadcast %cst_131 : f32 to vector<8x256xf32>
    %364 = arith.addf %363, %362 : vector<8x256xf32>
    %365 = arith.divf %363, %364 : vector<8x256xf32>
    %366 = vector.extract_strided_slice %365 {offsets = [0, 0], sizes = [8, 128], strides = [1, 1]} : vector<8x256xf32> to vector<8x128xf32>
    %367 = vector.extract_strided_slice %365 {offsets = [0, 128], sizes = [8, 128], strides = [1, 1]} : vector<8x256xf32> to vector<8x128xf32>
    %cst_132 = arith.constant dense<0.000000e+00> : vector<8x128xf32>
    %368 = tpu.matmul %357, %264, %cst_132 {dimension_numbers = #tpu.dot_dimension_numbers<[1], [0], [0], [1], [0, 0, 1, 1], [], []>} : vector<8x128xbf16>, vector<128x128xbf16>, vector<8x128xf32> -> vector<8x128xf32>
    %369 = vector.broadcast %266 : vector<1x128xf32> to vector<8x128xf32>
    %370 = arith.addf %368, %369 : vector<8x128xf32>
    %371 = vector.extract_strided_slice %356 {offsets = [0, 256], sizes = [8, 128], strides = [1, 1]} : vector<8x384xf32> to vector<8x128xf32>
    %372 = arith.mulf %366, %370 : vector<8x128xf32>
    %373 = arith.addf %371, %372 : vector<8x128xf32>
    %374 = math.tanh %373 : vector<8x128xf32>
    %cst_133 = arith.constant 1.000000e+00 : f32
    %375 = vector.broadcast %cst_133 : f32 to vector<8x128xf32>
    %376 = arith.subf %375, %367 : vector<8x128xf32>
    %377 = arith.mulf %376, %374 : vector<8x128xf32>
    %378 = arith.mulf %367, %353 : vector<8x128xf32>
    %379 = arith.addf %377, %378 : vector<8x128xf32>
    %c4_i32_134 = arith.constant 4 : i32
    %380 = arith.index_cast %c4_i32_134 : i32 to index
    %c0_135 = arith.constant 0 : index
    %c0_136 = arith.constant 0 : index
    %381 = vector.load %arg15[%380, %c0_135, %c0_136] : memref<8x8x384xf32, #tpu.memory_space<vmem>>, vector<1x8x384xf32>
    %382 = vector.shape_cast %381 : vector<1x8x384xf32> to vector<8x384xf32>
    %383 = arith.truncf %379 : vector<8x128xf32> to vector<8x128xbf16>
    %cst_137 = arith.constant dense<0.000000e+00> : vector<8x256xf32>
    %384 = tpu.matmul %383, %263, %cst_137 {dimension_numbers = #tpu.dot_dimension_numbers<[1], [0], [0], [1], [0, 0, 1, 1], [], []>} : vector<8x128xbf16>, vector<128x256xbf16>, vector<8x256xf32> -> vector<8x256xf32>
    %385 = vector.extract_strided_slice %382 {offsets = [0, 0], sizes = [8, 256], strides = [1, 1]} : vector<8x384xf32> to vector<8x256xf32>
    %386 = arith.addf %385, %384 : vector<8x256xf32>
    %387 = arith.negf %386 : vector<8x256xf32>
    %388 = math.exp %387 : vector<8x256xf32>
    %cst_138 = arith.constant 1.000000e+00 : f32
    %389 = vector.broadcast %cst_138 : f32 to vector<8x256xf32>
    %390 = arith.addf %389, %388 : vector<8x256xf32>
    %391 = arith.divf %389, %390 : vector<8x256xf32>
    %392 = vector.extract_strided_slice %391 {offsets = [0, 0], sizes = [8, 128], strides = [1, 1]} : vector<8x256xf32> to vector<8x128xf32>
    %393 = vector.extract_strided_slice %391 {offsets = [0, 128], sizes = [8, 128], strides = [1, 1]} : vector<8x256xf32> to vector<8x128xf32>
    %cst_139 = arith.constant dense<0.000000e+00> : vector<8x128xf32>
    %394 = tpu.matmul %383, %264, %cst_139 {dimension_numbers = #tpu.dot_dimension_numbers<[1], [0], [0], [1], [0, 0, 1, 1], [], []>} : vector<8x128xbf16>, vector<128x128xbf16>, vector<8x128xf32> -> vector<8x128xf32>
    %395 = vector.broadcast %266 : vector<1x128xf32> to vector<8x128xf32>
    %396 = arith.addf %394, %395 : vector<8x128xf32>
    %397 = vector.extract_strided_slice %382 {offsets = [0, 256], sizes = [8, 128], strides = [1, 1]} : vector<8x384xf32> to vector<8x128xf32>
    %398 = arith.mulf %392, %396 : vector<8x128xf32>
    %399 = arith.addf %397, %398 : vector<8x128xf32>
    %400 = math.tanh %399 : vector<8x128xf32>
    %cst_140 = arith.constant 1.000000e+00 : f32
    %401 = vector.broadcast %cst_140 : f32 to vector<8x128xf32>
    %402 = arith.subf %401, %393 : vector<8x128xf32>
    %403 = arith.mulf %402, %400 : vector<8x128xf32>
    %404 = arith.mulf %393, %379 : vector<8x128xf32>
    %405 = arith.addf %403, %404 : vector<8x128xf32>
    %c5_i32_141 = arith.constant 5 : i32
    %406 = arith.index_cast %c5_i32_141 : i32 to index
    %c0_142 = arith.constant 0 : index
    %c0_143 = arith.constant 0 : index
    %407 = vector.load %arg15[%406, %c0_142, %c0_143] : memref<8x8x384xf32, #tpu.memory_space<vmem>>, vector<1x8x384xf32>
    %408 = vector.shape_cast %407 : vector<1x8x384xf32> to vector<8x384xf32>
    %409 = arith.truncf %405 : vector<8x128xf32> to vector<8x128xbf16>
    %cst_144 = arith.constant dense<0.000000e+00> : vector<8x256xf32>
    %410 = tpu.matmul %409, %263, %cst_144 {dimension_numbers = #tpu.dot_dimension_numbers<[1], [0], [0], [1], [0, 0, 1, 1], [], []>} : vector<8x128xbf16>, vector<128x256xbf16>, vector<8x256xf32> -> vector<8x256xf32>
    %411 = vector.extract_strided_slice %408 {offsets = [0, 0], sizes = [8, 256], strides = [1, 1]} : vector<8x384xf32> to vector<8x256xf32>
    %412 = arith.addf %411, %410 : vector<8x256xf32>
    %413 = arith.negf %412 : vector<8x256xf32>
    %414 = math.exp %413 : vector<8x256xf32>
    %cst_145 = arith.constant 1.000000e+00 : f32
    %415 = vector.broadcast %cst_145 : f32 to vector<8x256xf32>
    %416 = arith.addf %415, %414 : vector<8x256xf32>
    %417 = arith.divf %415, %416 : vector<8x256xf32>
    %418 = vector.extract_strided_slice %417 {offsets = [0, 0], sizes = [8, 128], strides = [1, 1]} : vector<8x256xf32> to vector<8x128xf32>
    %419 = vector.extract_strided_slice %417 {offsets = [0, 128], sizes = [8, 128], strides = [1, 1]} : vector<8x256xf32> to vector<8x128xf32>
    %cst_146 = arith.constant dense<0.000000e+00> : vector<8x128xf32>
    %420 = tpu.matmul %409, %264, %cst_146 {dimension_numbers = #tpu.dot_dimension_numbers<[1], [0], [0], [1], [0, 0, 1, 1], [], []>} : vector<8x128xbf16>, vector<128x128xbf16>, vector<8x128xf32> -> vector<8x128xf32>
    %421 = vector.broadcast %266 : vector<1x128xf32> to vector<8x128xf32>
    %422 = arith.addf %420, %421 : vector<8x128xf32>
    %423 = vector.extract_strided_slice %408 {offsets = [0, 256], sizes = [8, 128], strides = [1, 1]} : vector<8x384xf32> to vector<8x128xf32>
    %424 = arith.mulf %418, %422 : vector<8x128xf32>
    %425 = arith.addf %423, %424 : vector<8x128xf32>
    %426 = math.tanh %425 : vector<8x128xf32>
    %cst_147 = arith.constant 1.000000e+00 : f32
    %427 = vector.broadcast %cst_147 : f32 to vector<8x128xf32>
    %428 = arith.subf %427, %419 : vector<8x128xf32>
    %429 = arith.mulf %428, %426 : vector<8x128xf32>
    %430 = arith.mulf %419, %405 : vector<8x128xf32>
    %431 = arith.addf %429, %430 : vector<8x128xf32>
    %c6_i32_148 = arith.constant 6 : i32
    %432 = arith.index_cast %c6_i32_148 : i32 to index
    %c0_149 = arith.constant 0 : index
    %c0_150 = arith.constant 0 : index
    %433 = vector.load %arg15[%432, %c0_149, %c0_150] : memref<8x8x384xf32, #tpu.memory_space<vmem>>, vector<1x8x384xf32>
    %434 = vector.shape_cast %433 : vector<1x8x384xf32> to vector<8x384xf32>
    %435 = arith.truncf %431 : vector<8x128xf32> to vector<8x128xbf16>
    %cst_151 = arith.constant dense<0.000000e+00> : vector<8x256xf32>
    %436 = tpu.matmul %435, %263, %cst_151 {dimension_numbers = #tpu.dot_dimension_numbers<[1], [0], [0], [1], [0, 0, 1, 1], [], []>} : vector<8x128xbf16>, vector<128x256xbf16>, vector<8x256xf32> -> vector<8x256xf32>
    %437 = vector.extract_strided_slice %434 {offsets = [0, 0], sizes = [8, 256], strides = [1, 1]} : vector<8x384xf32> to vector<8x256xf32>
    %438 = arith.addf %437, %436 : vector<8x256xf32>
    %439 = arith.negf %438 : vector<8x256xf32>
    %440 = math.exp %439 : vector<8x256xf32>
    %cst_152 = arith.constant 1.000000e+00 : f32
    %441 = vector.broadcast %cst_152 : f32 to vector<8x256xf32>
    %442 = arith.addf %441, %440 : vector<8x256xf32>
    %443 = arith.divf %441, %442 : vector<8x256xf32>
    %444 = vector.extract_strided_slice %443 {offsets = [0, 0], sizes = [8, 128], strides = [1, 1]} : vector<8x256xf32> to vector<8x128xf32>
    %445 = vector.extract_strided_slice %443 {offsets = [0, 128], sizes = [8, 128], strides = [1, 1]} : vector<8x256xf32> to vector<8x128xf32>
    %cst_153 = arith.constant dense<0.000000e+00> : vector<8x128xf32>
    %446 = tpu.matmul %435, %264, %cst_153 {dimension_numbers = #tpu.dot_dimension_numbers<[1], [0], [0], [1], [0, 0, 1, 1], [], []>} : vector<8x128xbf16>, vector<128x128xbf16>, vector<8x128xf32> -> vector<8x128xf32>
    %447 = vector.broadcast %266 : vector<1x128xf32> to vector<8x128xf32>
    %448 = arith.addf %446, %447 : vector<8x128xf32>
    %449 = vector.extract_strided_slice %434 {offsets = [0, 256], sizes = [8, 128], strides = [1, 1]} : vector<8x384xf32> to vector<8x128xf32>
    %450 = arith.mulf %444, %448 : vector<8x128xf32>
    %451 = arith.addf %449, %450 : vector<8x128xf32>
    %452 = math.tanh %451 : vector<8x128xf32>
    %cst_154 = arith.constant 1.000000e+00 : f32
    %453 = vector.broadcast %cst_154 : f32 to vector<8x128xf32>
    %454 = arith.subf %453, %445 : vector<8x128xf32>
    %455 = arith.mulf %454, %452 : vector<8x128xf32>
    %456 = arith.mulf %445, %431 : vector<8x128xf32>
    %457 = arith.addf %455, %456 : vector<8x128xf32>
    %c7_i32_155 = arith.constant 7 : i32
    %458 = arith.index_cast %c7_i32_155 : i32 to index
    %c0_156 = arith.constant 0 : index
    %c0_157 = arith.constant 0 : index
    %459 = vector.load %arg15[%458, %c0_156, %c0_157] : memref<8x8x384xf32, #tpu.memory_space<vmem>>, vector<1x8x384xf32>
    %460 = vector.shape_cast %459 : vector<1x8x384xf32> to vector<8x384xf32>
    %461 = arith.truncf %457 : vector<8x128xf32> to vector<8x128xbf16>
    %cst_158 = arith.constant dense<0.000000e+00> : vector<8x256xf32>
    %462 = tpu.matmul %461, %263, %cst_158 {dimension_numbers = #tpu.dot_dimension_numbers<[1], [0], [0], [1], [0, 0, 1, 1], [], []>} : vector<8x128xbf16>, vector<128x256xbf16>, vector<8x256xf32> -> vector<8x256xf32>
    %463 = vector.extract_strided_slice %460 {offsets = [0, 0], sizes = [8, 256], strides = [1, 1]} : vector<8x384xf32> to vector<8x256xf32>
    %464 = arith.addf %463, %462 : vector<8x256xf32>
    %465 = arith.negf %464 : vector<8x256xf32>
    %466 = math.exp %465 : vector<8x256xf32>
    %cst_159 = arith.constant 1.000000e+00 : f32
    %467 = vector.broadcast %cst_159 : f32 to vector<8x256xf32>
    %468 = arith.addf %467, %466 : vector<8x256xf32>
    %469 = arith.divf %467, %468 : vector<8x256xf32>
    %470 = vector.extract_strided_slice %469 {offsets = [0, 0], sizes = [8, 128], strides = [1, 1]} : vector<8x256xf32> to vector<8x128xf32>
    %471 = vector.extract_strided_slice %469 {offsets = [0, 128], sizes = [8, 128], strides = [1, 1]} : vector<8x256xf32> to vector<8x128xf32>
    %cst_160 = arith.constant dense<0.000000e+00> : vector<8x128xf32>
    %472 = tpu.matmul %461, %264, %cst_160 {dimension_numbers = #tpu.dot_dimension_numbers<[1], [0], [0], [1], [0, 0, 1, 1], [], []>} : vector<8x128xbf16>, vector<128x128xbf16>, vector<8x128xf32> -> vector<8x128xf32>
    %473 = vector.broadcast %266 : vector<1x128xf32> to vector<8x128xf32>
    %474 = arith.addf %472, %473 : vector<8x128xf32>
    %475 = vector.extract_strided_slice %460 {offsets = [0, 256], sizes = [8, 128], strides = [1, 1]} : vector<8x384xf32> to vector<8x128xf32>
    %476 = arith.mulf %470, %474 : vector<8x128xf32>
    %477 = arith.addf %475, %476 : vector<8x128xf32>
    %478 = math.tanh %477 : vector<8x128xf32>
    %cst_161 = arith.constant 1.000000e+00 : f32
    %479 = vector.broadcast %cst_161 : f32 to vector<8x128xf32>
    %480 = arith.subf %479, %471 : vector<8x128xf32>
    %481 = arith.mulf %480, %478 : vector<8x128xf32>
    %482 = arith.mulf %471, %457 : vector<8x128xf32>
    %483 = arith.addf %481, %482 : vector<8x128xf32>
    %c8_i32_162 = arith.constant 8 : i32
    %484 = arith.truncf %483 : vector<8x128xf32> to vector<8x128xbf16>
    %c0_163 = arith.constant 0 : index
    %c0_164 = arith.constant 0 : index
    %485 = vector.load %arg12[%c0_163, %c0_164] : memref<128x128xbf16, #tpu.memory_space<vmem>>, vector<128x128xbf16>
    %cst_165 = arith.constant dense<0.000000e+00> : vector<8x128xf32>
    %486 = tpu.matmul %484, %485, %cst_165 {dimension_numbers = #tpu.dot_dimension_numbers<[1], [0], [0], [1], [0, 0, 1, 1], [], []>} : vector<8x128xbf16>, vector<128x128xbf16>, vector<8x128xf32> -> vector<8x128xf32>
    %c0_166 = arith.constant 0 : index
    %c0_167 = arith.constant 0 : index
    %487 = vector.load %arg13[%c0_166, %c0_167] : memref<1x128xf32, #tpu.memory_space<vmem>>, vector<1x128xf32>
    %488 = vector.broadcast %487 : vector<1x128xf32> to vector<8x128xf32>
    %489 = arith.addf %486, %488 : vector<8x128xf32>
    %c0_168 = arith.constant 0 : index
    %c0_169 = arith.constant 0 : index
    %490 = vector.load %arg14[%c0_168, %c0_169] : memref<8x128xf32, #tpu.memory_space<vmem>>, vector<8x128xf32>
    tpu.vector_store %arg14[%c0_168, %c0_169], %489 {strides = array<i32>} : memref<8x128xf32, #tpu.memory_space<vmem>>, vector<8x128xf32>,
    return
  }
  func.func @transform_0(%arg0: i32) -> (i32, i32, i32) {
    %c0_i32 = arith.constant 0 : i32
    %c0_i32_0 = arith.constant 0 : i32
    %c0_i32_1 = arith.constant 0 : i32
    return %c0_i32, %arg0, %c0_i32_0 : i32, i32, i32
  }
  func.func @transform_1(%arg0: i32) -> (i32, i32) {
    %c0_i32 = arith.constant 0 : i32
    %c0_i32_0 = arith.constant 0 : i32
    %c0_i32_1 = arith.constant 0 : i32
    return %c0_i32, %c0_i32_0 : i32, i32
  }
  func.func @transform_2(%arg0: i32) -> (i32, i32) {
    %c0_i32 = arith.constant 0 : i32
    %c0_i32_0 = arith.constant 0 : i32
    %c0_i32_1 = arith.constant 0 : i32
    return %c0_i32, %c0_i32_0 : i32, i32
  }
  func.func @transform_3(%arg0: i32) -> (i32, i32) {
    %c0_i32 = arith.constant 0 : i32
    %c0_i32_0 = arith.constant 0 : i32
    %c0_i32_1 = arith.constant 0 : i32
    return %c0_i32, %c0_i32_0 : i32, i32
  }
  func.func @transform_4(%arg0: i32) -> (i32, i32) {
    %c0_i32 = arith.constant 0 : i32
    %c0_i32_0 = arith.constant 0 : i32
    %c0_i32_1 = arith.constant 0 : i32
    return %c0_i32, %c0_i32_0 : i32, i32
  }
  func.func @transform_5(%arg0: i32) -> (i32, i32) {
    %c0_i32 = arith.constant 0 : i32
    %c0_i32_0 = arith.constant 0 : i32
    %c0_i32_1 = arith.constant 0 : i32
    return %c0_i32, %c0_i32_0 : i32, i32
  }
  func.func @transform_6(%arg0: i32) -> (i32, i32) {
    %c0_i32 = arith.constant 0 : i32
    %c0_i32_0 = arith.constant 0 : i32
    %c0_i32_1 = arith.constant 0 : i32
    return %c0_i32, %c0_i32_0 : i32, i32
  }
  func.func @transform_7(%arg0: i32) -> (i32, i32) {
    %c0_i32 = arith.constant 0 : i32
    %c0_i32_0 = arith.constant 0 : i32
    %c0_i32_1 = arith.constant 0 : i32
    return %c0_i32, %c0_i32_0 : i32, i32
  }
  func.func @transform_8(%arg0: i32) -> (i32, i32) {
    %c0_i32 = arith.constant 0 : i32
    %c0_i32_0 = arith.constant 0 : i32
    %c0_i32_1 = arith.constant 0 : i32
    return %c0_i32, %c0_i32_0 : i32, i32
  }
  func.func @transform_9(%arg0: i32) -> (i32, i32) {
    %c0_i32 = arith.constant 0 : i32
    %c0_i32_0 = arith.constant 0 : i32
    %c0_i32_1 = arith.constant 0 : i32
    return %c0_i32, %c0_i32_0 : i32, i32
  }
  func.func @transform_10(%arg0: i32) -> (i32, i32) {
    %c0_i32 = arith.constant 0 : i32
    %c0_i32_0 = arith.constant 0 : i32
    %c0_i32_1 = arith.constant 0 : i32
    return %c0_i32, %c0_i32_0 : i32, i32
  }
  func.func @transform_11(%arg0: i32) -> (i32, i32) {
    %c0_i32 = arith.constant 0 : i32
    %c0_i32_0 = arith.constant 0 : i32
    %c0_i32_1 = arith.constant 0 : i32
    return %c0_i32, %c0_i32_0 : i32, i32
  }
  func.func @transform_12(%arg0: i32) -> (i32, i32) {
    %c0_i32 = arith.constant 0 : i32
    %c0_i32_0 = arith.constant 0 : i32
    %c0_i32_1 = arith.constant 0 : i32
    return %c0_i32, %c0_i32_0 : i32, i32
  }
  func.func @transform_13(%arg0: i32) -> (i32, i32) {
    %c0_i32 = arith.constant 0 : i32
    %c0_i32_0 = arith.constant 0 : i32
    return %arg0, %c0_i32 : i32, i32
  }
}

</mosaic_0001>

<bundles_post_ra>
// kernel: tpu_custom_call.1
= control target key start
LH: loop header
LB: loop body
LE: loop exit
PB: predicated region body
PF: predicated region fallthrough
CT: control target
= control target key end

     0   :  { %18 = vsyncpa [#allocation5], 0  ;;  %s5223_s0 = inlined_call_operand.hbm [shape: f32[8,8,8], index: 0, kind: input, shape index: {}]   ;;  %s5224_s1 = inlined_call_operand.hbm [shape: bf16[8,384], index: 1, kind: input, shape index: {}]   ;;  %s5225_s2 = inlined_call_operand.hbm [shape: bf16[128,256], index: 2, kind: input, shape index: {}]   ;;  %s5226_s3 = inlined_call_operand.hbm [shape: bf16[128,128], index: 3, kind: input, shape index: {}]   ;;  %s5227_s4 = inlined_call_operand.vmem [shape: f32[1,384], index: 4, kind: input, shape index: {}]   ;;  %s5228_s5 = inlined_call_operand.vmem [shape: f32[1,128], index: 5, kind: input, shape index: {}]   ;;  %s5229_s6 = inlined_call_operand.hbm [shape: bf16[128,384], index: 6, kind: input, shape index: {}]   ;;  %s5230_s7 = inlined_call_operand.hbm [shape: bf16[128,256], index: 7, kind: input, shape index: {}]   ;;  %s5231_s8 = inlined_call_operand.hbm [shape: bf16[128,128], index: 8, kind: input, shape index: {}]   ;;  %s5232_s9 = inlined_call_operand.vmem [shape: f32[1,384], index: 9, kind: input, shape index: {}]   ;;  %s5233_s10 = inlined_call_operand.vmem [shape: f32[1,128], index: 10, kind: input, shape index: {}]   ;;  %s5234_s11 = inlined_call_operand.hbm [shape: bf16[128,128], index: 11, kind: input, shape index: {}]   ;;  %s5235_s12 = inlined_call_operand.vmem [shape: f32[1,128], index: 12, kind: input, shape index: {}]   ;;  %s5236_s13 = inlined_call_operand.hbm [shape: f32[8,128], index: 13, kind: output, shape index: {}]  }
   0x1   :  { %19 = vsyncpa [#allocation8], 0 }
   0x2   :  { %20 = vsyncpa [#allocation11], 0 }
   0x3   :  { %21 = vsyncpa [#allocation14], 0 }
   0x4   :  { %22 = vsyncpa [#allocation17], 0 }
   0x5   :  { %23 = vsyncpa [#allocation6], 0  ;;  %s4107_s25 = smov [#allocation7]   ;;  %s4108_s27 = smov [#allocation10]  }
   0x6   :  { %s42_s26 = sshll.u32 %s4107_s25, 4  ;;  %s63_s28 = sshll.u32 %s4108_s27, 4  ;;  %s43_s26 = int_to_ptr.vmem [resolvable:$true] %s42_s26  ;;  %s64_s28 = int_to_ptr.vmem [resolvable:$true] %s63_s28 }
   0x7   :  { %s3923_s29 = scalar_lea.vmem %s43_s26, 192  ;;  %p3928_p1 = scmp.lt.s32.totalorder %s43_s26, %s43_s26 }
   0x8   :  { %p3924_p0 = scmp.ne.s32.totalorder %s43_s26, %s3923_s29  ;;  %p3929_p2 = scmp.lt.s32.totalorder %s3923_s29, %s3923_s29 }
   0xa   :  { %p3930_p3 = por %p3929_p2, %p3928_p1 }
   0xc   :  { %p3931_p4 = pnand %p3930_p3, %p3924_p0 }
   0xe   :  { %3934 = shalt.err (!%p3931_p4)
}
   0xf   :  { %45 = dma.hbm_to_vmem [thread:$0]  %s5224_s1, 192, %s43_s26, [#allocation8]  }
  0x10   :  { %s3943_s15 = scalar_lea.vmem %s64_s28, 1024  ;;  %p3948_p6 = scmp.lt.s32.totalorder %s64_s28, %s64_s28 }
  0x11   :  { %p3944_p5 = scmp.ne.s32.totalorder %s64_s28, %s3943_s15  ;;  %p3949_p7 = scmp.lt.s32.totalorder %s3943_s15, %s3943_s15 }
  0x13   :  { %p3950_p8 = por %p3949_p7, %p3948_p6 }
  0x15   :  { %p3951_p9 = pnand %p3950_p8, %p3944_p5 }
  0x17   :  { %3954 = shalt.err (!%p3951_p9)
}
  0x18   :  { %s4109_s16 = smov 64   ;;  %s4110_s17 = smov 4  }
  0x19   :  { %69 = dma.hbm_to_vmem [thread:$0]  %s5226_s3, 1024, %s64_s28, [#allocation11], %s4109_s16, %s4109_s16, %s4110_s17  }
  0x1a   :  { %s4111_s20 = smov [#allocation13]   ;;  %s4112_s22 = smov [#allocation4]  }
  0x1b   :  { %s91_s21 = sshll.u32 %s4111_s20, 4  ;;  %s29_s1 = sshll.u32 %s4112_s22, 4  ;;  %s92_s21 = int_to_ptr.vmem [resolvable:$true] %s91_s21  ;;  %s30_s1 = int_to_ptr.vmem [resolvable:$true] %s29_s1 }
  0x1c   :  { %s3963_s23 = scalar_lea.vmem %s92_s21, 2048  ;;  %p3968_p11 = scmp.lt.s32.totalorder %s92_s21, %s92_s21 }
  0x1d   :  { %p3964_p10 = scmp.ne.s32.totalorder %s92_s21, %s3963_s23  ;;  %p3969_p12 = scmp.lt.s32.totalorder %s3963_s23, %s3963_s23 }
  0x1f   :  { %p3970_p13 = por %p3969_p12, %p3968_p11 }
  0x21   :  { %p3971_p0 = pnand %p3970_p13, %p3964_p10 }
  0x23   :  { %3974 = shalt.err (!%p3971_p0)
}
  0x24   :  { %s4113_s24 = smov 128   ;;  %s4114_s25 = smov 8  }
  0x25   :  { %97 = dma.hbm_to_vmem [thread:$0]  %s5230_s7, 2048, %s92_s21, [#allocation14], %s4113_s24, %s4113_s24, %s4114_s25  }
  0x26   :  { %s3983_s3 = scalar_lea.vmem %s30_s1, 1024  ;;  %p3988_p2 = scmp.lt.s32.totalorder %s30_s1, %s30_s1 }
  0x27   :  { %p3984_p1 = scmp.ne.s32.totalorder %s30_s1, %s3983_s3  ;;  %p3989_p3 = scmp.lt.s32.totalorder %s3983_s3, %s3983_s3 }
  0x29   :  { %p3990_p4 = por %p3989_p3, %p3988_p2 }
  0x2b   :  { %p3991_p5 = pnand %p3990_p4, %p3984_p1 }
  0x2d   :  { %3994 = shalt.err (!%p3991_p5)
}
  0x2e   :  { %35 = dma.hbm_to_vmem [thread:$0]  %s5223_s0, 1024, %s30_s1, [#allocation5], %s4113_s24, %s4113_s24, %s4114_s25  }
  0x2f   :  { %s4115_s30 = smov [#allocation9]   ;;  %s4116_s15 = smov [#allocation12]  }
  0x30   :  { %s51_s14 = sshll.u32 %s4115_s30, 4  ;;  %s79_s18 = sshll.u32 %s4116_s15, 4  ;;  %s52_s14 = int_to_ptr.vmem [resolvable:$true] %s51_s14  ;;  %s80_s18 = int_to_ptr.vmem [resolvable:$true] %s79_s18 }
  0x31   :  { %s4003_s19 = scalar_lea.vmem %s52_s14, 2048  ;;  %p4008_p7 = scmp.lt.s32.totalorder %s52_s14, %s52_s14 }
  0x32   :  { %p4004_p6 = scmp.ne.s32.totalorder %s52_s14, %s4003_s19  ;;  %p4009_p8 = scmp.lt.s32.totalorder %s4003_s19, %s4003_s19 }
  0x34   :  { %p4010_p9 = por %p4009_p8, %p4008_p7 }
  0x36   :  { %p4011_p10 = pnand %p4010_p9, %p4004_p6 }
  0x38   :  { %4014 = shalt.err (!%p4011_p10)
}
  0x39   :  { %57 = dma.hbm_to_vmem [thread:$0]  %s5225_s2, 2048, %s52_s14, [#allocation8], %s4113_s24, %s4113_s24, %s4114_s25  }
  0x3a   :  { %s4023_s21 = scalar_lea.vmem %s80_s18, 3072  ;;  %p4028_p12 = scmp.lt.s32.totalorder %s80_s18, %s80_s18 }
  0x3b   :  { %p4024_p11 = scmp.ne.s32.totalorder %s80_s18, %s4023_s21  ;;  %p4029_p13 = scmp.lt.s32.totalorder %s4023_s21, %s4023_s21 }
  0x3d   :  { %p4030_p0 = por %p4029_p13, %p4028_p12 }
  0x3f   :  { %p4031_p1 = pnand %p4030_p0, %p4024_p11 }
  0x41   :  { %4034 = shalt.err (!%p4031_p1)
}
  0x42   :  { %s4117_s0 = smov 192   ;;  %s4118_s22 = smov 12  }
  0x43   :  { %85 = dma.hbm_to_vmem [thread:$0]  %s5229_s6, 3072, %s80_s18, [#allocation11], %s4117_s0, %s4117_s0, %s4118_s22  }
  0x44   :  { %s4119_s26 = smov [#allocation15]   ;;  %s4120_s3 = smov [#allocation16]  }
  0x45   :  { %s103_s27 = sshll.u32 %s4119_s26, 4  ;;  %s119_s28 = sshll.u32 %s4120_s3, 4  ;;  %s104_s27 = int_to_ptr.vmem [resolvable:$true] %s103_s27  ;;  %s120_s28 = int_to_ptr.vmem [resolvable:$true] %s119_s28 }
  0x46   :  { %s4043_s2 = scalar_lea.vmem %s104_s27, 1024  ;;  %p4048_p3 = scmp.lt.s32.totalorder %s104_s27, %s104_s27 }
  0x47   :  { %p4044_p2 = scmp.ne.s32.totalorder %s104_s27, %s4043_s2  ;;  %p4049_p4 = scmp.lt.s32.totalorder %s4043_s2, %s4043_s2 }
  0x49   :  { %p4050_p5 = por %p4049_p4, %p4048_p3 }
  0x4b   :  { %p4051_p6 = pnand %p4050_p5, %p4044_p2 }
  0x4d   :  { %4054 = shalt.err (!%p4051_p6)
}
  0x4e   :  { %109 = dma.hbm_to_vmem [thread:$0]  %s5231_s8, 1024, %s104_s27, [#allocation14], %s4109_s16, %s4109_s16, %s4110_s17  }
  0x4f   :  { %s4063_s6 = scalar_lea.vmem %s120_s28, 1024  ;;  %p4068_p8 = scmp.lt.s32.totalorder %s120_s28, %s120_s28 }
  0x50   :  { %p4064_p7 = scmp.ne.s32.totalorder %s120_s28, %s4063_s6  ;;  %p4069_p9 = scmp.lt.s32.totalorder %s4063_s6, %s4063_s6 }
  0x52   :  { %p4070_p10 = por %p4069_p9, %p4068_p8 }
  0x54   :  { %p4071_p11 = pnand %p4070_p10, %p4064_p7 }
  0x56   :  { %4074 = shalt.err (!%p4071_p11)
}
  0x57   :  { %125 = dma.hbm_to_vmem [thread:$0]  %s5234_s11, 1024, %s120_s28, [#allocation17], %s4109_s16, %s4109_s16, %s4110_s17  }
  0x58   :  { %4095 = dma.done.wait [#allocation5], 1024  }
  0x59   :  { %4096 = vsyncadd [#allocation5], 4294966272 }
  0x5a   :  { %4097 = dma.done.wait [#allocation8], 2240  }
  0x5b   :  { %4098 = vsyncadd [#allocation8], 4294965056 }
  0x5c   :  { %4099 = dma.done.wait [#allocation11], 4096  }
  0x5d   :  { %4100 = vsyncadd [#allocation11], 4294963200 }
  0x5e   :  { %4101 = dma.done.wait [#allocation14], 3072  }
  0x5f   :  { %4102 = vsyncadd [#allocation14], 4294964224 }
  0x60   :  { %4103 = dma.done.wait [#allocation17], 1024  }
  0x61   :  { %4104 = vsyncadd [#allocation17], 4294966272  ;;  %v5240_v0 = vmov 0   ;;  %v153_v1 = vld [vmem:[#allocation7] sm:$0xff]  ;;  %vm238_vm0 = vcmask 1043456   ;;  %v190_v3 = vld [vmem:[#allocation4 + $0x8] sm:$0xff]  ;;  %v202_v44 = vlaneseq }
  0x62   :  { %280 = vmatprep.mubr.bf16.mxu0 %v5240_v0  ;;  %v189_v2 = vld [vmem:[#allocation4] sm:$0xff]  ;;  %v2911_v4 = vcombine.high %v153_v1, %v153_v1  ;;  %v2910_v5 = vcombine.low %v153_v1, %v153_v1  ;;  %vm225_vm1 = vcmask 64512   ;;  %v4237_v10 = vld [vmem:[#allocation9 + $0x64] ss:$8 sps:$4 sm:$0xff]   ;;  %v4240_v11 = vld [vmem:[#allocation9 + $0x60] ss:$8 sps:$4 sm:$0xff]  }
  0x63   :  { %v197_v6 = vpack.c.bf16 %v190_v3, %v189_v2  ;;  %v4229_v7 = vld [vmem:[#allocation9 + $0x74] ss:$8 sps:$4 sm:$0xff]   ;;  %v4234_v9 = vld [vmem:[#allocation9 + $0x70] ss:$8 sps:$4 sm:$0xff]   ;;  %v191_v12 = vld [vmem:[#allocation4 + $0x10] sm:$0xff]  ;;  %v5242_v22 = vmov 0.0  }
  0x64   :  { %2913 = vmatprep.subr.msk.bf16.mxu0 %vm238_vm0, %v2911_v4  ;;  %v240_v8 = vsel %vm238_vm0, %v2910_v5, 0  ;;  %v192_v13 = vld [vmem:[#allocation4 + $0x18] sm:$0xff]  ;;  %v4245_v14 = vld [vmem:[#allocation9 + $0x54] ss:$8 sps:$4 sm:$0xff]   ;;  %v4260_v24 = vld [vmem:[#allocation9 + $0x40] ss:$8 sps:$4 sm:$0xff]  }
  0x65   :  { %3209 = vmatprep.mubr.msk.bf16.mxu1 %vm225_vm1, %v197_v6  ;;  %263 = vmatpush1.bf16.msra.mxu0 %v240_v8  ;;  %v3620_v15 = vld [vmem:[#allocation7 + $0x8] ss:$0 sps:$4 sm:$0xff]   ;;  %v198_v16 = vpack.c.bf16 %v192_v13, %v191_v12  ;;  %v4247_v17 = vld [vmem:[#allocation9 + $0x50] ss:$8 sps:$4 sm:$0xff]   ;;  %v4250_v18 = vld [vmem:[#allocation9 + $0x44] ss:$8 sps:$4 sm:$0xff]  }
  0x66   :  { %493 = vmatprep.subr.bf16.mxu0 %v4229_v7  ;;  %v193_v19 = vld [vmem:[#allocation4 + $0x20] sm:$0xff]  ;;  %3581 = vmatprep.subr.msk.bf16.mxu1 %vm238_vm0, %v3620_v15  ;;  %v246_v20 = vsel %vm238_vm0, %v3620_v15, 0  ;;  %v194_v21 = vld [vmem:[#allocation4 + $0x28] sm:$0xff]  ;;  %v195_v29 = vld [vmem:[#allocation4 + $0x30] sm:$0xff]  ;;  %vm4123_vm2 = vmmov 0   ;;  %v4366_v45 = vshrl.u32 %v202_v44, 7 }
  0x67   :  { %3208 = vmatpush3.bf16.msra.mxu1 %v246_v20  ;;  %v4256_v23 = vld [vmem:[#allocation10 + $0x38] sm:$0xff]   ;;  %v199_v25 = vpack.c.bf16 %v194_v21, %v193_v19  ;;  %v4270_v28 = vld [vmem:[#allocation10 + $0x30] sm:$0xff]   ;;  %v4276_v31 = vld [vmem:[#allocation9 + $0x24] ss:$8 sps:$4 sm:$0xff]   ;;  %s4124_s7 = smov [#allocation18]  }
  0x68   :  { %2914 = vmatmul.mubr.msk.bf16.vlgmr.msra.gmra.mxu0 %vm225_vm1, %v197_v6  ;;  %3217 = vmatprep.subr.bf16.mxu1 %v5242_v22  ;;  %v4264_v26 = vld [vmem:[#allocation9 + $0x34] ss:$8 sps:$4 sm:$0xff]   ;;  %v4267_v27 = vld [vmem:[#allocation9 + $0x30] ss:$8 sps:$4 sm:$0xff]   ;;  %v4278_v32 = vld [vmem:[#allocation9 + $0x20] ss:$8 sps:$4 sm:$0xff]  }
  0x69   :  { %494 = vmatpush1.bf16.msra.mxu0 %v4234_v9  ;;  %290 = vmatprep.mubr.bf16.mxu0 %v5240_v0  ;;  %v196_v30 = vld [vmem:[#allocation4 + $0x38] sm:$0xff]  ;;  %v4284_v35 = vld [vmem:[#allocation9 + $0x14] ss:$8 sps:$4 sm:$0xff]   ;;  %v4289_v36 = vld [vmem:[#allocation10 + $0x20] sm:$0xff]   ;;  %5246 = vst [vmem:[#allocation25_spill] sm:$0xff] %v4366_v45  ;;  %v5239_v46 = vsub.s32 0, %v4366_v45 }
  0x6a   :  { %495 = vmatprep.subr.bf16.mxu0 %v4237_v10  ;;  %3210 = vmatmul.mubr.msk.bf16.vlgmr.msra.gmra.mxu1 %vm225_vm1, %v198_v16  ;;  %v4281_v33 = vld [vmem:[#allocation10 + $0x28] sm:$0xff]   ;;  %v200_v34 = vpack.c.bf16 %v196_v30, %v195_v29  ;;  %v4293_v37 = vld [vmem:[#allocation9 + $0x10] ss:$8 sps:$4 sm:$0xff]   ;;  %v4324_v43 = vld [vmem:[#allocation10] sm:$0xff]   ;;  %v5238_v49 = vsub.s32 1, %v4366_v45  ;;  %v5237_v52 = vsub.s32 2, %v4366_v45 }
  0x6b   :  { %3218 = vmatpush3.bf16.msra.mxu1 %v4256_v23  ;;  %3213 = vmatprep.mubr.msk.bf16.mxu1 %vm225_vm1, %v199_v25  ;;  %v4298_v38 = vld [vmem:[#allocation9 + $0x4] ss:$8 sps:$4 sm:$0xff]   ;;  %v4302_v39 = vld [vmem:[#allocation10 + $0x18] sm:$0xff]   ;;  %v4305_v40 = vld [vmem:[#allocation9] ss:$8 sps:$4 sm:$0xff]   ;;  %s2897_s20 = sshll.u32 %s4124_s7, 4  ;;  %s2898_s20 = int_to_ptr.vmem [resolvable:$true] %s2897_s20 }
  0x6c   :  { %3219 = vmatprep.subr.bf16.mxu1 %v5242_v22  ;;  %v4312_v41 = vld [vmem:[#allocation10 + $0x10] sm:$0xff]   ;;  %v4318_v42 = vld [vmem:[#allocation10 + $0x8] sm:$0xff]   ;;  %s4075_s21 = scalar_lea.vmem %s2898_s20, 128  ;;  %p4080_p13 = scmp.lt.s32.totalorder %s2898_s20, %s2898_s20 }
  0x6d   :  { %496 = vmatpush1.bf16.msra.mxu0 %v4240_v11  ;;  %v187_v47 = vld [vmem:[%s5227_s4] sm:$0x7]  ;;  %p4076_p12 = scmp.ne.s32.totalorder %s2898_s20, %s4075_s21  ;;  %p4081_p0 = scmp.lt.s32.totalorder %s4075_s21, %s4075_s21 }
  0x6e   :  { %497 = vmatprep.subr.bf16.mxu0 %v4245_v14  ;;  %v205_v51 = vrot.slane %v187_v47, %v5239_v46  ;;  %v209_v54 = vrot.slane %v187_v47, %v5238_v49  ;;  %v4384_v58 = vrot.slane %v187_v47, %v5237_v52 }
  0x6f   :  { %3220 = vmatpush3.bf16.msra.mxu1 %v4270_v28  ;;  %p4082_p1 = por %p4081_p0, %p4080_p13 }
  0x70   :  { %2915 = vmatmul.mubr.msk.bf16.gmra.mxu0 %vm225_vm1, %v198_v16  ;;  %3221 = vmatprep.subr.bf16.mxu1 %v5242_v22 }
  0x71   :  { %498 = vmatpush1.bf16.msra.mxu0 %v4247_v17  ;;  %300 = vmatprep.mubr.bf16.mxu0 %v5240_v0  ;;  %p4083_p2 = pnand %p4082_p1, %p4076_p12 }
  0x72   :  { %499 = vmatprep.subr.bf16.mxu0 %v4250_v18  ;;  %3214 = vmatmul.mubr.msk.bf16.gmra.mxu1 %vm225_vm1, %v200_v34 }
  0x73   :  { %3222 = vmatpush3.bf16.msra.mxu1 %v4281_v33  ;;  %3233 = vmatprep.mubr.msk.bf16.mxu1 %vm4123_vm2, %v5242_v22 }
  0x74   :  { %3223 = vmatprep.subr.bf16.mxu1 %v5242_v22 }
  0x75   :  { %500 = vmatpush1.bf16.msra.mxu0 %v4260_v24 }
  0x76   :  { %501 = vmatprep.subr.bf16.mxu0 %v4264_v26 }
  0x77   :  { %3224 = vmatpush3.bf16.msra.mxu1 %v4289_v36 }
  0x78   :  { %2916 = vmatmul.mubr.msk.bf16.gmra.mxu0 %vm225_vm1, %v199_v25  ;;  %3225 = vmatprep.subr.bf16.mxu1 %v5242_v22 }
  0x79   :  { %502 = vmatpush1.bf16.msra.mxu0 %v4267_v27  ;;  %310 = vmatprep.mubr.bf16.mxu0 %v5240_v0 }
  0x7a   :  { %503 = vmatprep.subr.bf16.mxu0 %v4276_v31 }
  0x7b   :  { %3226 = vmatpush3.bf16.msra.mxu1 %v4302_v39 }
  0x7c   :  { %3227 = vmatprep.subr.bf16.mxu1 %v5242_v22 }
  0x7d   :  { %504 = vmatpush1.bf16.msra.mxu0 %v4278_v32 }
  0x7e   :  { %505 = vmatprep.subr.bf16.mxu0 %v4284_v35 }
  0x7f   :  { %3228 = vmatpush3.bf16.msra.mxu1 %v4312_v41 }
  0x80   :  { %2917 = vmatmul.mubr.msk.bf16.gmra.mxu0 %vm225_vm1, %v200_v34  ;;  %3229 = vmatprep.subr.bf16.mxu1 %v5242_v22 }
  0x81   :  { %506 = vmatpush1.bf16.msra.mxu0 %v4293_v37  ;;  %525 = vmatprep.mubr.bf16.mxu0 %v5240_v0 }
  0x82   :  { %507 = vmatprep.subr.bf16.mxu0 %v4298_v38 }
  0x83   :  { %3230 = vmatpush3.bf16.msra.mxu1 %v4318_v42 }
  0x84   :  { %3231 = vmatprep.subr.bf16.mxu1 %v5242_v22 }
  0x85   :  { %508 = vmatpush1.bf16.msra.mxu0 %v4305_v40 }
  0x86   :  { %655 = vmatprep.subr.bf16.mxu0 %v4229_v7 }
  0x87   :  { %3232 = vmatpush3.bf16.msra.mxu1 %v4324_v43 }
  0x88   :  { %526 = vmatmul.mubr.bf16.vlgmr.msra.gmra.mxu0 %v5240_v0  ;;  %3237 = vmatprep.subr.bf16.mxu1 %v5242_v22 }
  0x89   :  { %656 = vmatpush1.bf16.msra.mxu0 %v4234_v9  ;;  %687 = vmatprep.mubr.bf16.mxu0 %v5240_v0 }
  0x8a   :  { %657 = vmatprep.subr.bf16.mxu0 %v4237_v10  ;;  %3234 = vmatmul.mubr.bf16.vlgmr.msra.gmra.mxu1 %v5240_v0 }
  0x8b   :  { %3238 = vmatpush3.bf16.msra.mxu1 %v4256_v23  ;;  %3253 = vmatprep.mubr.msk.bf16.mxu1 %vm4123_vm2, %v5242_v22 }
  0x8c   :  { %3239 = vmatprep.subr.bf16.mxu1 %v5242_v22 }
  0x8d   :  { %658 = vmatpush1.bf16.msra.mxu0 %v4240_v11 }
  0x8e   :  { %659 = vmatprep.subr.bf16.mxu0 %v4245_v14 }
  0x8f   :  { %3240 = vmatpush3.bf16.msra.mxu1 %v4270_v28 }
  0x90   :  { %3241 = vmatprep.subr.bf16.mxu1 %v5242_v22 }
  0x91   :  { %660 = vmatpush1.bf16.msra.mxu0 %v4247_v17 }
  0x92   :  { %661 = vmatprep.subr.bf16.mxu0 %v4250_v18 }
  0x93   :  { %3242 = vmatpush3.bf16.msra.mxu1 %v4281_v33 }
  0x94   :  { %3243 = vmatprep.subr.bf16.mxu1 %v5242_v22 }
  0x95   :  { %662 = vmatpush1.bf16.msra.mxu0 %v4260_v24 }
  0x96   :  { %663 = vmatprep.subr.bf16.mxu0 %v4264_v26 }
  0x97   :  { %3244 = vmatpush3.bf16.msra.mxu1 %v4289_v36 }
  0x98   :  { %3245 = vmatprep.subr.bf16.mxu1 %v5242_v22 }
  0x99   :  { %664 = vmatpush1.bf16.msra.mxu0 %v4267_v27 }
  0x9a   :  { %665 = vmatprep.subr.bf16.mxu0 %v4276_v31 }
  0x9b   :  { %3246 = vmatpush3.bf16.msra.mxu1 %v4302_v39 }
  0x9c   :  { %3247 = vmatprep.subr.bf16.mxu1 %v5242_v22 }
  0x9d   :  { %666 = vmatpush1.bf16.msra.mxu0 %v4278_v32 }
  0x9e   :  { %667 = vmatprep.subr.bf16.mxu0 %v4284_v35 }
  0x9f   :  { %3248 = vmatpush3.bf16.msra.mxu1 %v4312_v41 }
  0xa0   :  { %3249 = vmatprep.subr.bf16.mxu1 %v5242_v22 }
  0xa1   :  { %668 = vmatpush1.bf16.msra.mxu0 %v4293_v37 }
  0xa2   :  { %669 = vmatprep.subr.bf16.mxu0 %v4298_v38 }
  0xa3   :  { %3250 = vmatpush3.bf16.msra.mxu1 %v4318_v42 }
  0xa4   :  { %3251 = vmatprep.subr.bf16.mxu1 %v5242_v22 }
  0xa5   :  { %670 = vmatpush1.bf16.msra.mxu0 %v4305_v40 }
  0xa6   :  { %764 = vmatprep.subr.bf16.mxu0 %v4229_v7 }
  0xa7   :  { %3252 = vmatpush3.bf16.msra.mxu1 %v4324_v43 }
  0xa8   :  { %3257 = vmatprep.subr.bf16.mxu1 %v5242_v22 }
 0x128   :  { %v282_v48 = vpop.f32.mrf.mxu0 }
 0x12a   :  { %v284_v50 = vpop.f32.mrf.mxu0  ;;  %v3211_v62 = vpop.f32.mrf.mxu1 }
 0x12b   :  { %v4391_v1 = vadd.f32 %v3211_v62, %v4384_v58 }
 0x12c   :  { %v286_v53 = vpop.f32.mrf.mxu0  ;;  %v355_v3 = vpop.f32.mrf.mxu1 }
 0x12d   :  { %v4378_v55 = vadd.f32 %v286_v53, %v205_v51 }
 0x12e   :  { %v288_v56 = vpop.f32.mrf.mxu0  ;;  %v3212_v6 = vpop.f32.mrf.mxu1 }
 0x12f   :  { %v4380_v57 = vadd.f32 %v288_v56, %v209_v54  ;;  %v4398_v12 = vadd.f32 %v3212_v6, %v4384_v58 }
 0x130   :  { %v292_v59 = vpop.f32.mrf.mxu0  ;;  %v358_v15 = vpop.f32.mrf.mxu1 }
 0x131   :  { %v4386_v60 = vadd.f32 %v292_v59, %v205_v51  ;;  %v4403_v19 = vadd.f32 %v358_v15, %v4384_v58 }
 0x132   :  { %v294_v61 = vpop.f32.mrf.mxu0  ;;  %v3215_v21 = vpop.f32.mrf.mxu1 }
 0x133   :  { %v4388_v63 = vadd.f32 %v294_v61, %v209_v54  ;;  %v4408_v29 = vadd.f32 %v3215_v21, %v4384_v58 }
 0x134   :  { %v296_v2 = vpop.f32.mrf.mxu0  ;;  %v371_v34 = vpop.f32.mrf.mxu1 }
 0x135   :  { %v4393_v4 = vadd.f32 %v296_v2, %v205_v51  ;;  %5247 = vst [vmem:[#allocation26_spill] sm:$0xff] %v4408_v29  ;;  %v4413_v47 = vadd.f32 %v371_v34, %v4384_v58  ;;  %v283_v34 = vadd.f32 %v282_v48, %v205_v51 }
 0x136   :  { %v298_v5 = vpop.f32.mrf.mxu0  ;;  %v3216_v56 = vpop.f32.mrf.mxu1 }
 0x137   :  { %v4395_v8 = vadd.f32 %v298_v5, %v209_v54  ;;  %v4418_v61 = vadd.f32 %v3216_v56, %v4384_v58 }
 0x138   :  { %v302_v13 = vpop.f32.mrf.mxu0  ;;  %v374_v2 = vpop.f32.mrf.mxu1 }
 0x139   :  { %v4400_v16 = vadd.f32 %v302_v13, %v205_v51  ;;  %5248 = vst [vmem:[#allocation27_spill] sm:$0xff] %v4418_v61  ;;  %v4423_v6 = vadd.f32 %v374_v2, %v4384_v58 }
 0x13a   :  { %v304_v20 = vpop.f32.mrf.mxu0 }
 0x13b   :  { %v4405_v25 = vadd.f32 %v304_v20, %v209_v54 }
 0x13c   :  { %v306_v30 = vpop.f32.mrf.mxu0 }
 0x13d   :  { %v4410_v44 = vadd.f32 %v306_v30, %v205_v51 }
 0x13e   :  { %v308_v53 = vpop.f32.mrf.mxu0 }
 0x13f   :  { %v4415_v59 = vadd.f32 %v308_v53, %v209_v54 }
 0x140   :  { %v312_v62 = vpop.f32.mrf.mxu0 }
 0x141   :  { %v4420_v5 = vadd.f32 %v312_v62, %v205_v51  ;;  %v285_v62 = vadd.f32 %v284_v50, %v209_v54 }
 0x142   :  { %v314_v13 = vpop.f32.mrf.mxu0 }
 0x143   :  { %v4425_v15 = vadd.f32 %v314_v13, %v209_v54 }
 0x144   :  { %v316_v20 = vpop.f32.mrf.mxu0 }
 0x145   :  { %5249 = vst [vmem:[#allocation28_spill] sm:$0xff] %v4425_v15  ;;  %v4427_v21 = vadd.f32 %v316_v20, %v205_v51  ;;  %v4434_v51 = vld [vmem:[%s5228_s5] ss:$0 sm:$0xff] }
 0x146   :  { %v318_v30 = vpop.f32.mrf.mxu0 }
 0x147   :  { %5250 = vst [vmem:[#allocation29_spill] sm:$0xff] %v4427_v21  ;;  %v4429_v53 = vadd.f32 %v318_v30, %v209_v54 }
 0x148   :  { %v527_v52 = vpop.f32.mrf.mxu0 }
 0x149   :  { %v534_v56 = vadd.f32 %v527_v52, %v283_v34 }
 0x14a   :  { %v529_v49 = vpop.f32.mrf.mxu0  ;;  %v636_v45 = vpop.f32.mrf.mxu1 }
 0x14b   :  { %v2938_v46 = vmul.f32 -1.442695, %v534_v56  ;;  %v535_v2 = vadd.f32 %v529_v49, %v285_v62  ;;  %v356_v49 = vadd.f32 %v355_v3, %v4384_v58  ;;  %v5252_v58 = vmov 0  }
 0x14c   :  { %v531_v0 = vpop.f32.mrf.mxu0  ;;  %v3235_v13 = vpop.f32.mrf.mxu1 }
 0x14d   :  { %3707 = vpow2.f32 %v2938_v46  ;;  %v2939_v61 = vmul.f32 -1.442695, %v535_v2  ;;  %v637_v46 = vadd.f32 %v4434_v51, %v636_v45  ;;  %v5251_v45 = vmov 0.0  }
 0x14e   :  { %v532_v22 = vpop.f32.mrf.mxu0  ;;  %v639_v29 = vpop.f32.mrf.mxu1 }
 0x14f   :  { %3709 = vpow2.f32 %v2939_v61 }
 0x150   :  { %v3236_v20 = vpop.f32.mrf.mxu1 }
 0x15a   :  { %v3708_v21 = vpop.eup %3707 }
 0x15b   :  { %v542_v15 = vadd.f32 1.0, %v3708_v21 }
 0x15c   :  { %v3710_v48 = vpop.eup %3709 }
 0x15d   :  { %3711 = vrcp.f32 %v542_v15  ;;  %v543_v0 = vadd.f32 1.0, %v3710_v48 }
 0x15f   :  { %3713 = vrcp.f32 %v543_v0 }
 0x16a   :  { %v3712_v22 = vpop.eup %3711 }
 0x16b   :  { %v642_v50 = vmul.f32 %v3712_v22, %v637_v46 }
 0x16c   :  { %v3714_v54 = vpop.eup %3713 }
 0x16d   :  { %v643_v52 = vadd.f32 %v642_v50, %v356_v49  ;;  %v645_v29 = vsub.f32 1.0, %v3714_v54  ;;  %v647_v21 = vmul.f32 0.0, %v3714_v54 }
 0x16f   :  { %3715 = vtanh.f32 %v643_v52 }
 0x17c   :  { %v3716_v61 = vpop.eup %3715 }
 0x17d   :  { %v646_v15 = vmul.f32 %v3716_v61, %v645_v29 }
 0x17f   :  { %v4438_v30 = vadd.f32 %v647_v21, %v646_v15 }
 0x181   :  { %v654_v34 = vpack.c.bf16 %v4438_v30, %v4438_v30 }
 0x183   :  { %688 = vmatmul.mubr.bf16.vlgmr.msra.gmra.mxu0 %v654_v34  ;;  %3254 = vmatmul.mubr.bf16.vlgmr.msra.gmra.mxu1 %v654_v34 }
 0x184   :  { %765 = vmatpush1.bf16.msra.mxu0 %v4234_v9  ;;  %3258 = vmatpush3.bf16.msra.mxu1 %v4256_v23 }
 0x185   :  { %766 = vmatprep.subr.bf16.mxu0 %v4237_v10  ;;  %3259 = vmatprep.subr.bf16.mxu1 %v5251_v45 }
 0x186   :  { %796 = vmatprep.mubr.bf16.mxu0 %v5252_v58  ;;  %3273 = vmatprep.mubr.msk.bf16.mxu1 %vm4123_vm2, %v5251_v45 }
 0x188   :  { %767 = vmatpush1.bf16.msra.mxu0 %v4240_v11  ;;  %3260 = vmatpush3.bf16.msra.mxu1 %v4270_v28 }
 0x189   :  { %768 = vmatprep.subr.bf16.mxu0 %v4245_v14  ;;  %3261 = vmatprep.subr.bf16.mxu1 %v5251_v45 }
 0x18c   :  { %769 = vmatpush1.bf16.msra.mxu0 %v4247_v17  ;;  %3262 = vmatpush3.bf16.msra.mxu1 %v4281_v33 }
 0x18d   :  { %770 = vmatprep.subr.bf16.mxu0 %v4250_v18  ;;  %3263 = vmatprep.subr.bf16.mxu1 %v5251_v45 }
 0x190   :  { %771 = vmatpush1.bf16.msra.mxu0 %v4260_v24  ;;  %3264 = vmatpush3.bf16.msra.mxu1 %v4289_v36 }
 0x191   :  { %772 = vmatprep.subr.bf16.mxu0 %v4264_v26  ;;  %3265 = vmatprep.subr.bf16.mxu1 %v5251_v45 }
 0x194   :  { %773 = vmatpush1.bf16.msra.mxu0 %v4267_v27  ;;  %3266 = vmatpush3.bf16.msra.mxu1 %v4302_v39 }
 0x195   :  { %774 = vmatprep.subr.bf16.mxu0 %v4276_v31  ;;  %3267 = vmatprep.subr.bf16.mxu1 %v5251_v45 }
 0x198   :  { %775 = vmatpush1.bf16.msra.mxu0 %v4278_v32  ;;  %3268 = vmatpush3.bf16.msra.mxu1 %v4312_v41 }
 0x199   :  { %776 = vmatprep.subr.bf16.mxu0 %v4284_v35  ;;  %3269 = vmatprep.subr.bf16.mxu1 %v5251_v45 }
 0x19c   :  { %777 = vmatpush1.bf16.msra.mxu0 %v4293_v37  ;;  %3270 = vmatpush3.bf16.msra.mxu1 %v4318_v42 }
 0x19d   :  { %778 = vmatprep.subr.bf16.mxu0 %v4298_v38  ;;  %3271 = vmatprep.subr.bf16.mxu1 %v5251_v45 }
 0x1a0   :  { %779 = vmatpush1.bf16.msra.mxu0 %v4305_v40  ;;  %3272 = vmatpush3.bf16.msra.mxu1 %v4324_v43 }
 0x1a1   :  { %873 = vmatprep.subr.bf16.mxu0 %v4229_v7  ;;  %3277 = vmatprep.subr.bf16.mxu1 %v5251_v45 }
 0x243   :  { %v689_v3 = vpop.f32.mrf.mxu0  ;;  %v744_v56 = vpop.f32.mrf.mxu1 }
 0x244   :  { %v696_v62 = vadd.f32 %v689_v3, %v4378_v55  ;;  %v745_v15 = vadd.f32 %v4434_v51, %v744_v56 }
 0x245   :  { %v691_v2 = vpop.f32.mrf.mxu0  ;;  %v3255_v13 = vpop.f32.mrf.mxu1 }
 0x246   :  { %v2949_v20 = vmul.f32 -1.442695, %v696_v62  ;;  %v697_v49 = vadd.f32 %v691_v2, %v4380_v57 }
 0x247   :  { %v693_v48 = vpop.f32.mrf.mxu0  ;;  %v747_v0 = vpop.f32.mrf.mxu1 }
 0x248   :  { %3717 = vpow2.f32 %v2949_v20  ;;  %v2950_v50 = vmul.f32 -1.442695, %v697_v49 }
 0x249   :  { %v694_v46 = vpop.f32.mrf.mxu0  ;;  %v3256_v22 = vpop.f32.mrf.mxu1 }
 0x24a   :  { %3719 = vpow2.f32 %v2950_v50 }
 0x255   :  { %v3718_v52 = vpop.eup %3717 }
 0x256   :  { %v704_v54 = vadd.f32 1.0, %v3718_v52 }
 0x257   :  { %v3720_v29 = vpop.eup %3719 }
 0x258   :  { %3721 = vrcp.f32 %v704_v54  ;;  %v705_v61 = vadd.f32 1.0, %v3720_v29 }
 0x25a   :  { %3723 = vrcp.f32 %v705_v61 }
 0x265   :  { %v3722_v55 = vpop.eup %3721 }
 0x266   :  { %v750_v21 = vmul.f32 %v3722_v55, %v745_v15 }
 0x267   :  { %v3724_v3 = vpop.eup %3723 }
 0x268   :  { %v751_v34 = vadd.f32 %v750_v21, %v4403_v19  ;;  %v753_v62 = vsub.f32 1.0, %v3724_v3  ;;  %v755_v57 = vmul.f32 %v3724_v3, %v4438_v30 }
 0x26a   :  { %3725 = vtanh.f32 %v751_v34 }
 0x277   :  { %v3726_v13 = vpop.eup %3725 }
 0x278   :  { %v754_v20 = vmul.f32 %v3726_v13, %v753_v62 }
 0x27a   :  { %v4482_v2 = vadd.f32 %v755_v57, %v754_v20 }
 0x27c   :  { %v763_v48 = vpack.c.bf16 %v4482_v2, %v4482_v2 }
 0x27e   :  { %797 = vmatmul.mubr.bf16.vlgmr.msra.gmra.mxu0 %v763_v48  ;;  %3274 = vmatmul.mubr.bf16.vlgmr.msra.gmra.mxu1 %v763_v48 }
 0x27f   :  { %874 = vmatpush1.bf16.msra.mxu0 %v4234_v9  ;;  %3278 = vmatpush3.bf16.msra.mxu1 %v4256_v23 }
 0x280   :  { %875 = vmatprep.subr.bf16.mxu0 %v4237_v10  ;;  %3279 = vmatprep.subr.bf16.mxu1 %v5251_v45 }
 0x281   :  { %905 = vmatprep.mubr.bf16.mxu0 %v5252_v58  ;;  %3293 = vmatprep.mubr.msk.bf16.mxu1 %vm4123_vm2, %v5251_v45 }
 0x283   :  { %876 = vmatpush1.bf16.msra.mxu0 %v4240_v11  ;;  %3280 = vmatpush3.bf16.msra.mxu1 %v4270_v28 }
 0x284   :  { %877 = vmatprep.subr.bf16.mxu0 %v4245_v14  ;;  %3281 = vmatprep.subr.bf16.mxu1 %v5251_v45 }
 0x287   :  { %878 = vmatpush1.bf16.msra.mxu0 %v4247_v17  ;;  %3282 = vmatpush3.bf16.msra.mxu1 %v4281_v33 }
 0x288   :  { %879 = vmatprep.subr.bf16.mxu0 %v4250_v18  ;;  %3283 = vmatprep.subr.bf16.mxu1 %v5251_v45 }
 0x28b   :  { %880 = vmatpush1.bf16.msra.mxu0 %v4260_v24  ;;  %3284 = vmatpush3.bf16.msra.mxu1 %v4289_v36 }
 0x28c   :  { %881 = vmatprep.subr.bf16.mxu0 %v4264_v26  ;;  %3285 = vmatprep.subr.bf16.mxu1 %v5251_v45 }
 0x28f   :  { %882 = vmatpush1.bf16.msra.mxu0 %v4267_v27  ;;  %3286 = vmatpush3.bf16.msra.mxu1 %v4302_v39 }
 0x290   :  { %883 = vmatprep.subr.bf16.mxu0 %v4276_v31  ;;  %3287 = vmatprep.subr.bf16.mxu1 %v5251_v45 }
 0x293   :  { %884 = vmatpush1.bf16.msra.mxu0 %v4278_v32  ;;  %3288 = vmatpush3.bf16.msra.mxu1 %v4312_v41 }
 0x294   :  { %885 = vmatprep.subr.bf16.mxu0 %v4284_v35  ;;  %3289 = vmatprep.subr.bf16.mxu1 %v5251_v45 }
 0x297   :  { %886 = vmatpush1.bf16.msra.mxu0 %v4293_v37  ;;  %3290 = vmatpush3.bf16.msra.mxu1 %v4318_v42 }
 0x298   :  { %887 = vmatprep.subr.bf16.mxu0 %v4298_v38  ;;  %3291 = vmatprep.subr.bf16.mxu1 %v5251_v45 }
 0x29b   :  { %888 = vmatpush1.bf16.msra.mxu0 %v4305_v40  ;;  %3292 = vmatpush3.bf16.msra.mxu1 %v4324_v43 }
 0x29c   :  { %982 = vmatprep.subr.bf16.mxu0 %v4229_v7  ;;  %3297 = vmatprep.subr.bf16.mxu1 %v5251_v45 }
 0x33e   :  { %v798_v19 = vpop.f32.mrf.mxu0  ;;  %v853_v56 = vpop.f32.mrf.mxu1 }
 0x33f   :  { %v805_v0 = vadd.f32 %v798_v19, %v4386_v60  ;;  %v854_v62 = vadd.f32 %v4434_v51, %v853_v56 }
 0x340   :  { %v800_v46 = vpop.f32.mrf.mxu0  ;;  %v3275_v22 = vpop.f32.mrf.mxu1 }
 0x341   :  { %v2951_v49 = vmul.f32 -1.442695, %v805_v0  ;;  %v806_v61 = vadd.f32 %v800_v46, %v4388_v63 }
 0x342   :  { %v802_v50 = vpop.f32.mrf.mxu0  ;;  %v856_v52 = vpop.f32.mrf.mxu1 }
 0x343   :  { %3727 = vpow2.f32 %v2951_v49  ;;  %v2952_v15 = vmul.f32 -1.442695, %v806_v61 }
 0x344   :  { %v803_v54 = vpop.f32.mrf.mxu0  ;;  %v3276_v29 = vpop.f32.mrf.mxu1 }
 0x345   :  { %3729 = vpow2.f32 %v2952_v15 }
 0x350   :  { %v3728_v55 = vpop.eup %3727 }
 0x351   :  { %v813_v21 = vadd.f32 1.0, %v3728_v55 }
 0x352   :  { %v3730_v34 = vpop.eup %3729 }
 0x353   :  { %3731 = vrcp.f32 %v813_v21  ;;  %v814_v3 = vadd.f32 1.0, %v3730_v34 }
 0x355   :  { %3733 = vrcp.f32 %v814_v3 }
 0x360   :  { %v3732_v60 = vpop.eup %3731 }
 0x361   :  { %v859_v13 = vmul.f32 %v3732_v60, %v854_v62 }
 0x362   :  { %v3734_v57 = vpop.eup %3733 }
 0x363   :  { %v860_v20 = vadd.f32 %v859_v13, %v4391_v1  ;;  %v862_v48 = vsub.f32 1.0, %v3734_v57  ;;  %v864_v63 = vmul.f32 %v3734_v57, %v4482_v2 }
 0x365   :  { %3735 = vtanh.f32 %v860_v20 }
 0x372   :  { %v3736_v19 = vpop.eup %3735 }
 0x373   :  { %v863_v0 = vmul.f32 %v3736_v19, %v862_v48  ;;  %v4574_v19 = vld [vmem:[#allocation9 + $0x70] ss:$8 sps:$4 sm:$0xff]  }
 0x375   :  { %v4526_v46 = vadd.f32 %v864_v63, %v863_v0  ;;  %v4585_v0 = vld [vmem:[#allocation9 + $0x60] ss:$8 sps:$4 sm:$0xff]   ;;  %v4589_v63 = vld [vmem:[#allocation9 + $0x54] ss:$8 sps:$4 sm:$0xff]  }
 0x377   :  { %v872_v22 = vpack.c.bf16 %v4526_v46, %v4526_v46 }
 0x379   :  { %906 = vmatmul.mubr.bf16.vlgmr.msra.gmra.mxu0 %v872_v22  ;;  %3294 = vmatmul.mubr.bf16.vlgmr.msra.gmra.mxu1 %v872_v22 }
 0x37a   :  { %983 = vmatpush1.bf16.msra.mxu0 %v4234_v9  ;;  %3298 = vmatpush3.bf16.msra.mxu1 %v4256_v23 }
 0x37b   :  { %984 = vmatprep.subr.bf16.mxu0 %v4237_v10  ;;  %3299 = vmatprep.subr.bf16.mxu1 %v5251_v45 }
 0x37c   :  { %1014 = vmatprep.mubr.bf16.mxu0 %v5252_v58  ;;  %3313 = vmatprep.mubr.msk.bf16.mxu1 %vm4123_vm2, %v5251_v45 }
 0x37e   :  { %985 = vmatpush1.bf16.msra.mxu0 %v4240_v11  ;;  %3300 = vmatpush3.bf16.msra.mxu1 %v4270_v28 }
 0x37f   :  { %986 = vmatprep.subr.bf16.mxu0 %v4245_v14  ;;  %3301 = vmatprep.subr.bf16.mxu1 %v5251_v45 }
 0x382   :  { %987 = vmatpush1.bf16.msra.mxu0 %v4247_v17  ;;  %3302 = vmatpush3.bf16.msra.mxu1 %v4281_v33 }
 0x383   :  { %988 = vmatprep.subr.bf16.mxu0 %v4250_v18  ;;  %3303 = vmatprep.subr.bf16.mxu1 %v5251_v45 }
 0x386   :  { %989 = vmatpush1.bf16.msra.mxu0 %v4260_v24  ;;  %3304 = vmatpush3.bf16.msra.mxu1 %v4289_v36 }
 0x387   :  { %990 = vmatprep.subr.bf16.mxu0 %v4264_v26  ;;  %3305 = vmatprep.subr.bf16.mxu1 %v5251_v45 }
 0x38a   :  { %991 = vmatpush1.bf16.msra.mxu0 %v4267_v27  ;;  %3306 = vmatpush3.bf16.msra.mxu1 %v4302_v39 }
 0x38b   :  { %992 = vmatprep.subr.bf16.mxu0 %v4276_v31  ;;  %3307 = vmatprep.subr.bf16.mxu1 %v5251_v45 }
 0x38e   :  { %993 = vmatpush1.bf16.msra.mxu0 %v4278_v32  ;;  %3308 = vmatpush3.bf16.msra.mxu1 %v4312_v41 }
 0x38f   :  { %994 = vmatprep.subr.bf16.mxu0 %v4284_v35  ;;  %3309 = vmatprep.subr.bf16.mxu1 %v5251_v45 }
 0x392   :  { %995 = vmatpush1.bf16.msra.mxu0 %v4293_v37  ;;  %3310 = vmatpush3.bf16.msra.mxu1 %v4318_v42 }
 0x393   :  { %996 = vmatprep.subr.bf16.mxu0 %v4298_v38  ;;  %3311 = vmatprep.subr.bf16.mxu1 %v5251_v45 }
 0x396   :  { %997 = vmatpush1.bf16.msra.mxu0 %v4305_v40  ;;  %3312 = vmatpush3.bf16.msra.mxu1 %v4324_v43 }
 0x397   :  { %1091 = vmatprep.subr.bf16.mxu0 %v4229_v7  ;;  %3317 = vmatprep.subr.bf16.mxu1 %v5251_v45 }
 0x439   :  { %v907_v9 = vpop.f32.mrf.mxu0  ;;  %v962_v10 = vpop.f32.mrf.mxu1 }
 0x43a   :  { %v914_v11 = vadd.f32 %v907_v9, %v4393_v4  ;;  %v963_v21 = vadd.f32 %v4434_v51, %v962_v10 }
 0x43b   :  { %v909_v14 = vpop.f32.mrf.mxu0  ;;  %v3295_v17 = vpop.f32.mrf.mxu1 }
 0x43c   :  { %v2953_v1 = vmul.f32 -1.442695, %v914_v11  ;;  %v915_v54 = vadd.f32 %v909_v14, %v4395_v8 }
 0x43d   :  { %v911_v56 = vpop.f32.mrf.mxu0  ;;  %v965_v49 = vpop.f32.mrf.mxu1 }
 0x43e   :  { %3737 = vpow2.f32 %v2953_v1  ;;  %v2954_v29 = vmul.f32 -1.442695, %v915_v54 }
 0x43f   :  { %v912_v50 = vpop.f32.mrf.mxu0  ;;  %v3296_v52 = vpop.f32.mrf.mxu1 }
 0x440   :  { %3739 = vpow2.f32 %v2954_v29 }
 0x44b   :  { %v3738_v61 = vpop.eup %3737 }
 0x44c   :  { %v922_v7 = vadd.f32 1.0, %v3738_v61 }
 0x44d   :  { %v3740_v15 = vpop.eup %3739 }
 0x44e   :  { %3741 = vrcp.f32 %v922_v7  ;;  %v923_v55 = vadd.f32 1.0, %v3740_v15  ;;  %v4631_v7 = vld [vmem:[#allocation10 + $0x38] sm:$0xff]   ;;  %v4646_v15 = vld [vmem:[#allocation10 + $0x28] sm:$0xff]  }
 0x450   :  { %3743 = vrcp.f32 %v923_v55  ;;  %v4649_v55 = vld [vmem:[#allocation9 + $0x44] ss:$8 sps:$4 sm:$0xff]  }
 0x45b   :  { %v3742_v4 = vpop.eup %3741 }
 0x45c   :  { %v968_v34 = vmul.f32 %v3742_v4, %v963_v21  ;;  %v4653_v21 = vld [vmem:[#allocation9 + $0x40] ss:$8 sps:$4 sm:$0xff]  }
 0x45d   :  { %v3744_v62 = vpop.eup %3743  ;;  %v4656_v4 = vld [vmem:[#allocation10 + $0x20] sm:$0xff]  }
 0x45e   :  { %v969_v3 = vadd.f32 %v968_v34, %v4398_v12  ;;  %v971_v60 = vsub.f32 1.0, %v3744_v62  ;;  %v973_v8 = vmul.f32 %v3744_v62, %v4526_v46  ;;  %v4578_v12 = vld [vmem:[#allocation9 + $0x64] ss:$8 sps:$4 sm:$0xff]   ;;  %v4659_v34 = vld [vmem:[#allocation9 + $0x34] ss:$8 sps:$4 sm:$0xff]  }
 0x45f   :  { %v4667_v62 = vld [vmem:[#allocation9 + $0x24] ss:$8 sps:$4 sm:$0xff]  }
 0x460   :  { %3745 = vtanh.f32 %v969_v3  ;;  %v4663_v3 = vld [vmem:[#allocation9 + $0x30] ss:$8 sps:$4 sm:$0xff]  }
 0x46d   :  { %v3746_v13 = vpop.eup %3745 }
 0x46e   :  { %v972_v20 = vmul.f32 %v3746_v13, %v971_v60  ;;  %v4671_v60 = vld [vmem:[#allocation9 + $0x20] ss:$8 sps:$4 sm:$0xff]   ;;  %v4675_v13 = vld [vmem:[#allocation9 + $0x14] ss:$8 sps:$4 sm:$0xff]  }
 0x470   :  { %v4570_v57 = vadd.f32 %v973_v8, %v972_v20  ;;  %v4679_v20 = vld [vmem:[#allocation9 + $0x10] ss:$8 sps:$4 sm:$0xff]  }
 0x472   :  { %v981_v48 = vpack.c.bf16 %v4570_v57, %v4570_v57 }
 0x474   :  { %1015 = vmatmul.mubr.bf16.vlgmr.msra.gmra.mxu0 %v981_v48  ;;  %3314 = vmatmul.mubr.bf16.vlgmr.msra.gmra.mxu1 %v981_v48 }
 0x475   :  { %1092 = vmatpush1.bf16.msra.mxu0 %v4574_v19  ;;  %3318 = vmatpush3.bf16.msra.mxu1 %v4256_v23  ;;  %v4593_v23 = vld [vmem:[#allocation9 + $0x50] ss:$8 sps:$4 sm:$0xff]  }
 0x476   :  { %1093 = vmatprep.subr.bf16.mxu0 %v4578_v12  ;;  %3319 = vmatprep.subr.bf16.mxu1 %v5251_v45 }
 0x477   :  { %1123 = vmatprep.mubr.bf16.mxu0 %v5252_v58  ;;  %3333 = vmatprep.mubr.msk.bf16.mxu1 %vm4123_vm2, %v5251_v45 }
 0x479   :  { %1094 = vmatpush1.bf16.msra.mxu0 %v4585_v0  ;;  %3320 = vmatpush3.bf16.msra.mxu1 %v4270_v28 }
 0x47a   :  { %1095 = vmatprep.subr.bf16.mxu0 %v4589_v63  ;;  %3321 = vmatprep.subr.bf16.mxu1 %v5251_v45 }
 0x47d   :  { %1096 = vmatpush1.bf16.msra.mxu0 %v4593_v23  ;;  %3322 = vmatpush3.bf16.msra.mxu1 %v4281_v33 }
 0x47e   :  { %1097 = vmatprep.subr.bf16.mxu0 %v4250_v18  ;;  %3323 = vmatprep.subr.bf16.mxu1 %v5251_v45  ;;  %v4617_v18 = vld [vmem:[#allocation9 + $0x74] ss:$8 sps:$4 sm:$0xff]  }
 0x481   :  { %1098 = vmatpush1.bf16.msra.mxu0 %v4260_v24  ;;  %3324 = vmatpush3.bf16.msra.mxu1 %v4289_v36 }
 0x482   :  { %1099 = vmatprep.subr.bf16.mxu0 %v4264_v26  ;;  %3325 = vmatprep.subr.bf16.mxu1 %v5251_v45 }
 0x485   :  { %1100 = vmatpush1.bf16.msra.mxu0 %v4267_v27  ;;  %3326 = vmatpush3.bf16.msra.mxu1 %v4302_v39 }
 0x486   :  { %1101 = vmatprep.subr.bf16.mxu0 %v4276_v31  ;;  %3327 = vmatprep.subr.bf16.mxu1 %v5251_v45 }
 0x489   :  { %1102 = vmatpush1.bf16.msra.mxu0 %v4278_v32  ;;  %3328 = vmatpush3.bf16.msra.mxu1 %v4312_v41 }
 0x48a   :  { %1103 = vmatprep.subr.bf16.mxu0 %v4284_v35  ;;  %3329 = vmatprep.subr.bf16.mxu1 %v5251_v45 }
 0x48d   :  { %1104 = vmatpush1.bf16.msra.mxu0 %v4293_v37  ;;  %3330 = vmatpush3.bf16.msra.mxu1 %v4318_v42 }
 0x48e   :  { %1105 = vmatprep.subr.bf16.mxu0 %v4298_v38  ;;  %3331 = vmatprep.subr.bf16.mxu1 %v5251_v45 }
 0x491   :  { %1106 = vmatpush1.bf16.msra.mxu0 %v4305_v40  ;;  %3332 = vmatpush3.bf16.msra.mxu1 %v4324_v43 }
 0x492   :  { %1200 = vmatprep.subr.bf16.mxu0 %v4617_v18  ;;  %3337 = vmatprep.subr.bf16.mxu1 %v5251_v45 }
 0x534   :  { %v1016_v24 = vpop.f32.mrf.mxu0  ;;  %v1071_v26 = vpop.f32.mrf.mxu1 }
 0x535   :  { %v1023_v27 = vadd.f32 %v1016_v24, %v4400_v16  ;;  %v1072_v17 = vadd.f32 %v4434_v51, %v1071_v26 }
 0x536   :  { %v1018_v28 = vpop.f32.mrf.mxu0  ;;  %v3315_v31 = vpop.f32.mrf.mxu1 }
 0x537   :  { %v2955_v32 = vmul.f32 -1.442695, %v1023_v27  ;;  %v1024_v38 = vadd.f32 %v1018_v28, %v4405_v25 }
 0x538   :  { %v1020_v33 = vpop.f32.mrf.mxu0  ;;  %v1074_v35 = vpop.f32.mrf.mxu1 }
 0x539   :  { %3747 = vpow2.f32 %v2955_v32  ;;  %v2956_v22 = vmul.f32 -1.442695, %v1024_v38 }
 0x53a   :  { %v1021_v36 = vpop.f32.mrf.mxu0  ;;  %v3316_v37 = vpop.f32.mrf.mxu1 }
 0x53b   :  { %3749 = vpow2.f32 %v2956_v22 }
 0x546   :  { %v3748_v9 = vpop.eup %3747 }
 0x547   :  { %v1031_v10 = vadd.f32 1.0, %v3748_v9 }
 0x548   :  { %v3750_v11 = vpop.eup %3749 }
 0x549   :  { %3751 = vrcp.f32 %v1031_v10  ;;  %v1032_v14 = vadd.f32 1.0, %v3750_v11 }
 0x54b   :  { %3753 = vrcp.f32 %v1032_v14 }
 0x556   :  { %v3752_v16 = vpop.eup %3751 }
 0x557   :  { %v1077_v1 = vmul.f32 %v3752_v16, %v1072_v17 }
 0x558   :  { %v3754_v49 = vpop.eup %3753 }
 0x559   :  { %v1078_v56 = vadd.f32 %v1077_v1, %v4413_v47  ;;  %v1080_v50 = vsub.f32 1.0, %v3754_v49  ;;  %v1082_v25 = vmul.f32 %v3754_v49, %v4570_v57  ;;  %v4640_v47 = vld [vmem:[#allocation10 + $0x30] sm:$0xff]  }
 0x55a   :  { %v3638_v1 = vld [vmem:[#allocation12 + $0xb0] ss:$12 sps:$4 sm:$0xff]  }
 0x55b   :  { %3755 = vtanh.f32 %v1078_v56 }
 0x568   :  { %v3756_v52 = vpop.eup %3755 }
 0x569   :  { %v1081_v54 = vmul.f32 %v3756_v52, %v1080_v50 }
 0x56b   :  { %v4626_v29 = vadd.f32 %v1082_v25, %v1081_v54 }
 0x56d   :  { %v1090_v61 = vpack.c.bf16 %v4626_v29, %v4626_v29 }
 0x56f   :  { %1124 = vmatmul.mubr.bf16.vlgmr.msra.gmra.mxu0 %v1090_v61  ;;  %3334 = vmatmul.mubr.bf16.vlgmr.msra.gmra.mxu1 %v1090_v61 }
 0x570   :  { %1201 = vmatpush1.bf16.msra.mxu0 %v4574_v19  ;;  %3338 = vmatpush3.bf16.msra.mxu1 %v4631_v7 }
 0x571   :  { %1202 = vmatprep.subr.bf16.mxu0 %v4578_v12  ;;  %3339 = vmatprep.subr.bf16.mxu1 %v5251_v45 }
 0x572   :  { %1232 = vmatprep.mubr.bf16.mxu0 %v5252_v58  ;;  %3353 = vmatprep.mubr.msk.bf16.mxu1 %vm4123_vm2, %v5251_v45 }
 0x574   :  { %1203 = vmatpush1.bf16.msra.mxu0 %v4585_v0  ;;  %3340 = vmatpush3.bf16.msra.mxu1 %v4640_v47 }
 0x575   :  { %1204 = vmatprep.subr.bf16.mxu0 %v4589_v63  ;;  %3341 = vmatprep.subr.bf16.mxu1 %v5251_v45 }
 0x578   :  { %1205 = vmatpush1.bf16.msra.mxu0 %v4593_v23  ;;  %3342 = vmatpush3.bf16.msra.mxu1 %v4646_v15 }
 0x579   :  { %1206 = vmatprep.subr.bf16.mxu0 %v4649_v55  ;;  %3343 = vmatprep.subr.bf16.mxu1 %v5251_v45 }
 0x57c   :  { %1207 = vmatpush1.bf16.msra.mxu0 %v4653_v21  ;;  %3344 = vmatpush3.bf16.msra.mxu1 %v4656_v4 }
 0x57d   :  { %1208 = vmatprep.subr.bf16.mxu0 %v4659_v34  ;;  %3345 = vmatprep.subr.bf16.mxu1 %v5251_v45 }
 0x580   :  { %1209 = vmatpush1.bf16.msra.mxu0 %v4663_v3  ;;  %3346 = vmatpush3.bf16.msra.mxu1 %v4302_v39  ;;  %v4683_v39 = vld [vmem:[#allocation9 + $0x4] ss:$8 sps:$4 sm:$0xff]  }
 0x581   :  { %1210 = vmatprep.subr.bf16.mxu0 %v4667_v62  ;;  %3347 = vmatprep.subr.bf16.mxu1 %v5251_v45 }
 0x584   :  { %1211 = vmatpush1.bf16.msra.mxu0 %v4671_v60  ;;  %3348 = vmatpush3.bf16.msra.mxu1 %v4312_v41 }
 0x585   :  { %1212 = vmatprep.subr.bf16.mxu0 %v4675_v13  ;;  %3349 = vmatprep.subr.bf16.mxu1 %v5251_v45 }
 0x588   :  { %1213 = vmatpush1.bf16.msra.mxu0 %v4679_v20  ;;  %3350 = vmatpush3.bf16.msra.mxu1 %v4318_v42 }
 0x589   :  { %1214 = vmatprep.subr.bf16.mxu0 %v4683_v39  ;;  %3351 = vmatprep.subr.bf16.mxu1 %v5251_v45 }
 0x58c   :  { %1215 = vmatpush1.bf16.msra.mxu0 %v4305_v40  ;;  %3352 = vmatpush3.bf16.msra.mxu1 %v4324_v43 }
 0x58d   :  { %1309 = vmatprep.subr.bf16.mxu0 %v4617_v18  ;;  %3357 = vmatprep.subr.bf16.mxu1 %v5251_v45 }
 0x62f   :  { %v1125_v41 = vpop.f32.mrf.mxu0  ;;  %v1180_v8 = vpop.f32.mrf.mxu1 }
 0x630   :  { %v1132_v48 = vadd.f32 %v1125_v41, %v4410_v44  ;;  %v1181_v37 = vadd.f32 %v4434_v51, %v1180_v8 }
 0x631   :  { %v1127_v24 = vpop.f32.mrf.mxu0  ;;  %v3335_v42 = vpop.f32.mrf.mxu1 }
 0x632   :  { %v2957_v26 = vmul.f32 -1.442695, %v1132_v48  ;;  %v1133_v40 = vadd.f32 %v1127_v24, %v4415_v59 }
 0x633   :  { %v1129_v27 = vpop.f32.mrf.mxu0  ;;  %v1183_v28 = vpop.f32.mrf.mxu1 }
 0x634   :  { %3757 = vpow2.f32 %v2957_v26  ;;  %v2958_v33 = vmul.f32 -1.442695, %v1133_v40  ;;  %v3635_v28 = vld [vmem:[#allocation12 + $0xa8] ss:$12 sps:$4 sm:$0xff]   ;;  %v1487_v40 = vpack.c.bf16 %v4482_v2, %v4438_v30  ;;  %v3647_v30 = vld [vmem:[#allocation12 + $0x60] ss:$12 sps:$4 sm:$0xff]  }
 0x635   :  { %v1130_v31 = vpop.f32.mrf.mxu0  ;;  %v3336_v32 = vpop.f32.mrf.mxu1  ;;  %v3653_v2 = vld [vmem:[#allocation12 + $0x4c] ss:$12 sps:$4 sm:$0xff]  }
 0x636   :  { %3759 = vpow2.f32 %v2958_v33  ;;  %v3641_v32 = vld [vmem:[#allocation12 + $0x94] ss:$12 sps:$4 sm:$0xff]   ;;  %v3639_v33 = vld [vmem:[#allocation12 + $0x90] ss:$12 sps:$4 sm:$0xff]  }
 0x641   :  { %v3758_v43 = vpop.eup %3757 }
 0x642   :  { %v1140_v18 = vadd.f32 1.0, %v3758_v43  ;;  %v3645_v43 = vld [vmem:[#allocation12 + $0x7c] ss:$12 sps:$4 sm:$0xff]  }
 0x643   :  { %v3760_v35 = vpop.eup %3759 }
 0x644   :  { %3761 = vrcp.f32 %v1140_v18  ;;  %v1141_v36 = vadd.f32 1.0, %v3760_v35  ;;  %v3646_v18 = vld [vmem:[#allocation12 + $0x80] ss:$12 sps:$4 sm:$0xff]   ;;  %v3643_v35 = vld [vmem:[#allocation12 + $0x78] ss:$12 sps:$4 sm:$0xff]  }
 0x646   :  { %3763 = vrcp.f32 %v1141_v36  ;;  %v3649_v36 = vld [vmem:[#allocation12 + $0x64] ss:$12 sps:$4 sm:$0xff]  }
 0x651   :  { %v3762_v44 = vpop.eup %3761 }
 0x652   :  { %v1186_v38 = vmul.f32 %v3762_v44, %v1181_v37  ;;  %v3650_v37 = vld [vmem:[#allocation12 + $0x68] ss:$12 sps:$4 sm:$0xff]   ;;  %v3654_v44 = vld [vmem:[#allocation12 + $0x50] ss:$12 sps:$4 sm:$0xff]  }
 0x653   :  { %v3764_v9 = vpop.eup %3763 }
 0x654   :  { %v1187_v22 = vadd.f32 %v1186_v38, %v4423_v6  ;;  %v1189_v10 = vsub.f32 1.0, %v3764_v9  ;;  %v1191_v59 = vmul.f32 %v3764_v9, %v4626_v29  ;;  %v3886_v6 = vld [vmem:[#allocation10 + $0x18] sm:$0xff]   ;;  %v3651_v38 = vld [vmem:[#allocation12 + $0x48] ss:$12 sps:$4 sm:$0xff]  }
 0x655   :  { %v3658_v9 = vld [vmem:[#allocation12 + $0x38] ss:$12 sps:$4 sm:$0xff]  }
 0x656   :  { %3765 = vtanh.f32 %v1187_v22  ;;  %v3657_v22 = vld [vmem:[#allocation12 + $0x34] ss:$12 sps:$4 sm:$0xff]  }
 0x663   :  { %v3766_v11 = vpop.eup %3765 }
 0x664   :  { %v1190_v14 = vmul.f32 %v3766_v11, %v1189_v10  ;;  %v3655_v10 = vld [vmem:[#allocation12 + $0x30] ss:$12 sps:$4 sm:$0xff]  }
 0x665   :  { %v3661_v11 = vld [vmem:[#allocation12 + $0x1c] ss:$12 sps:$4 sm:$0xff]  }
 0x666   :  { %v4696_v17 = vadd.f32 %v1191_v59, %v1190_v14  ;;  %v3662_v14 = vld [vmem:[#allocation12 + $0x20] ss:$12 sps:$4 sm:$0xff]   ;;  %v3659_v59 = vld [vmem:[#allocation12 + $0x18] ss:$12 sps:$4 sm:$0xff]  }
 0x668   :  { %v1199_v16 = vpack.c.bf16 %v4696_v17, %v4696_v17 }
 0x66a   :  { %1233 = vmatmul.mubr.bf16.vlgmr.msra.gmra.mxu0 %v1199_v16  ;;  %3354 = vmatmul.mubr.bf16.vlgmr.msra.gmra.mxu1 %v1199_v16  ;;  %v3665_v16 = vld [vmem:[#allocation12 + $0x4] ss:$12 sps:$4 sm:$0xff]  }
 0x66b   :  { %1310 = vmatpush1.bf16.msra.mxu0 %v4574_v19  ;;  %3358 = vmatpush3.bf16.msra.mxu1 %v4631_v7  ;;  %v3887_v19 = vld [vmem:[#allocation10 + $0x10] sm:$0xff]  }
 0x66c   :  { %1311 = vmatprep.subr.bf16.mxu0 %v4578_v12  ;;  %3359 = vmatprep.subr.bf16.mxu1 %v5251_v45  ;;  %v3888_v12 = vld [vmem:[#allocation10 + $0x8] sm:$0xff]  }
 0x66d   :  { %1341 = vmatprep.mubr.bf16.mxu0 %v5252_v58  ;;  %3373 = vmatprep.mubr.msk.bf16.mxu1 %vm4123_vm2, %v5251_v45 }
 0x66f   :  { %1312 = vmatpush1.bf16.msra.mxu0 %v4585_v0  ;;  %3360 = vmatpush3.bf16.msra.mxu1 %v4640_v47  ;;  %v3889_v0 = vld [vmem:[#allocation9] ss:$8 sps:$4 sm:$0xff]  }
 0x670   :  { %1313 = vmatprep.subr.bf16.mxu0 %v4589_v63  ;;  %3361 = vmatprep.subr.bf16.mxu1 %v5251_v45  ;;  %v3890_v63 = vld [vmem:[#allocation10] sm:$0xff]  }
 0x673   :  { %1314 = vmatpush1.bf16.msra.mxu0 %v4593_v23  ;;  %3362 = vmatpush3.bf16.msra.mxu1 %v4646_v15  ;;  %v3637_v23 = vld [vmem:[#allocation12 + $0xac] ss:$12 sps:$4 sm:$0xff]  }
 0x674   :  { %1315 = vmatprep.subr.bf16.mxu0 %v4649_v55  ;;  %3363 = vmatprep.subr.bf16.mxu1 %v5251_v45  ;;  %v5253_v55 = vld [vmem:[#allocation28_spill] sm:$0xff] }
 0x677   :  { %1316 = vmatpush1.bf16.msra.mxu0 %v4653_v21  ;;  %3364 = vmatpush3.bf16.msra.mxu1 %v4656_v4 }
 0x678   :  { %1317 = vmatprep.subr.bf16.mxu0 %v4659_v34  ;;  %3365 = vmatprep.subr.bf16.mxu1 %v5251_v45 }
 0x67b   :  { %1318 = vmatpush1.bf16.msra.mxu0 %v4663_v3  ;;  %3366 = vmatpush3.bf16.msra.mxu1 %v3886_v6  ;;  %v3666_v6 = vld [vmem:[#allocation12 + $0x8] ss:$12 sps:$4 sm:$0xff]  }
 0x67c   :  { %1319 = vmatprep.subr.bf16.mxu0 %v4667_v62  ;;  %3367 = vmatprep.subr.bf16.mxu1 %v5251_v45 }
 0x67f   :  { %1320 = vmatpush1.bf16.msra.mxu0 %v4671_v60  ;;  %3368 = vmatpush3.bf16.msra.mxu1 %v3887_v19  ;;  %v3663_v19 = vld [vmem:[#allocation12] ss:$12 sps:$4 sm:$0xff]  }
 0x680   :  { %1321 = vmatprep.subr.bf16.mxu0 %v4675_v13  ;;  %3369 = vmatprep.subr.bf16.mxu1 %v5251_v45 }
 0x683   :  { %1322 = vmatpush1.bf16.msra.mxu0 %v4679_v20  ;;  %3370 = vmatpush3.bf16.msra.mxu1 %v3888_v12  ;;  %v1488_v12 = vpack.c.bf16 %v4570_v57, %v4526_v46  ;;  %v4754_v46 = vld [vmem:[#allocation13 + $0x64] ss:$8 sps:$4 sm:$0xff]   ;;  %v4756_v57 = vld [vmem:[#allocation13 + $0x60] ss:$8 sps:$4 sm:$0xff]  }
 0x684   :  { %1323 = vmatprep.subr.bf16.mxu0 %v4683_v39  ;;  %3371 = vmatprep.subr.bf16.mxu1 %v5251_v45  ;;  %v5254_v39 = vld [vmem:[#allocation26_spill] sm:$0xff] }
 0x687   :  { %1324 = vmatpush1.bf16.msra.mxu0 %v3889_v0  ;;  %3372 = vmatpush3.bf16.msra.mxu1 %v3890_v63  ;;  %v1489_v0 = vpack.c.bf16 %v4696_v17, %v4626_v29  ;;  %v4748_v63 = vld [vmem:[#allocation13 + $0x74] ss:$8 sps:$4 sm:$0xff]  }
 0x688   :  { %1635 = vmatprep.subr.bf16.mxu0 %v3637_v23  ;;  %3377 = vmatprep.subr.bf16.mxu1 %v3638_v1  ;;  %v4750_v23 = vld [vmem:[#allocation13 + $0x70] ss:$8 sps:$4 sm:$0xff]   ;;  %v4760_v29 = vld [vmem:[#allocation13 + $0x54] ss:$8 sps:$4 sm:$0xff]  }
 0x72a   :  { %v1234_v56 = vpop.f32.mrf.mxu0  ;;  %v1289_v49 = vpop.f32.mrf.mxu1 }
 0x72b   :  { %v1241_v50 = vadd.f32 %v1234_v56, %v4420_v5  ;;  %v1290_v13 = vadd.f32 %v4434_v51, %v1289_v49  ;;  %v3642_v51 = vld [vmem:[#allocation12 + $0x98] ss:$12 sps:$4 sm:$0xff]   ;;  %v4768_v56 = vld [vmem:[#allocation13 + $0x40] ss:$8 sps:$4 sm:$0xff]   ;;  %v4772_v49 = vld [vmem:[#allocation13 + $0x34] ss:$8 sps:$4 sm:$0xff]  }
 0x72c   :  { %v1236_v52 = vpop.f32.mrf.mxu0  ;;  %v3355_v54 = vpop.f32.mrf.mxu1 }
 0x72d   :  { %v2959_v25 = vmul.f32 -1.442695, %v1241_v50  ;;  %v1242_v21 = vadd.f32 %v1236_v52, %v5253_v55  ;;  %v4774_v50 = vld [vmem:[#allocation13 + $0x30] ss:$8 sps:$4 sm:$0xff]   ;;  %v4778_v52 = vld [vmem:[#allocation13 + $0x24] ss:$8 sps:$4 sm:$0xff]  }
 0x72e   :  { %v1238_v61 = vpop.f32.mrf.mxu0  ;;  %v1292_v7 = vpop.f32.mrf.mxu1  ;;  %v4780_v54 = vld [vmem:[#allocation13 + $0x20] ss:$8 sps:$4 sm:$0xff]   ;;  %v4800_v55 = vld [vmem:[#allocation15 + $0x30] sm:$0xff]  }
 0x72f   :  { %3767 = vpow2.f32 %v2959_v25  ;;  %v2960_v4 = vmul.f32 -1.442695, %v1242_v21  ;;  %v4784_v25 = vld [vmem:[#allocation13 + $0x14] ss:$8 sps:$4 sm:$0xff]   ;;  %v4786_v61 = vld [vmem:[#allocation13 + $0x10] ss:$8 sps:$4 sm:$0xff]  }
 0x730   :  { %v1239_v47 = vpop.f32.mrf.mxu0  ;;  %v3356_v15 = vpop.f32.mrf.mxu1  ;;  %v4788_v7 = vld [vmem:[#allocation13 + $0x4] ss:$8 sps:$4 sm:$0xff]  }
 0x731   :  { %3769 = vpow2.f32 %v2960_v4  ;;  %v4790_v47 = vld [vmem:[#allocation15 + $0x38] sm:$0xff]   ;;  %v4795_v15 = vld [vmem:[#allocation13] ss:$8 sps:$4 sm:$0xff]  }
 0x732   :  { %v4804_v21 = vld [vmem:[#allocation15 + $0x28] sm:$0xff]   ;;  %v4808_v4 = vld [vmem:[#allocation15 + $0x20] sm:$0xff]  }
 0x73c   :  { %v3768_v34 = vpop.eup %3767 }
 0x73d   :  { %v1249_v3 = vadd.f32 1.0, %v3768_v34  ;;  %v4812_v34 = vld [vmem:[#allocation15 + $0x18] sm:$0xff]  }
 0x73e   :  { %v3770_v62 = vpop.eup %3769 }
 0x73f   :  { %3771 = vrcp.f32 %v1249_v3  ;;  %v1250_v60 = vadd.f32 1.0, %v3770_v62  ;;  %v4816_v3 = vld [vmem:[#allocation15 + $0x10] sm:$0xff]   ;;  %v4820_v62 = vld [vmem:[#allocation15 + $0x8] sm:$0xff]  }
 0x741   :  { %3773 = vrcp.f32 %v1250_v60  ;;  %v4824_v60 = vld [vmem:[#allocation15] sm:$0xff]  }
 0x74c   :  { %v3772_v5 = vpop.eup %3771 }
 0x74d   :  { %v1295_v20 = vmul.f32 %v3772_v5, %v1290_v13 }
 0x74e   :  { %v3774_v8 = vpop.eup %3773 }
 0x74f   :  { %v1296_v41 = vadd.f32 %v1295_v20, %v5254_v39  ;;  %v1298_v48 = vsub.f32 1.0, %v3774_v8  ;;  %v1300_v26 = vmul.f32 %v3774_v8, %v4696_v17  ;;  %v4762_v17 = vld [vmem:[#allocation13 + $0x50] ss:$8 sps:$4 sm:$0xff]   ;;  %v5255_v20 = vld [vmem:[#allocation29_spill] sm:$0xff] }
 0x751   :  { %3775 = vtanh.f32 %v1296_v41 }
 0x75e   :  { %v3776_v24 = vpop.eup %3775 }
 0x75f   :  { %v1299_v42 = vmul.f32 %v3776_v24, %v1298_v48 }
 0x761   :  { %v4733_v27 = vadd.f32 %v1300_v26, %v1299_v42 }
 0x763   :  { %v1308_v31 = vpack.c.bf16 %v4733_v27, %v4733_v27 }
 0x765   :  { %1342 = vmatmul.mubr.bf16.vlgmr.msra.gmra.mxu0 %v1308_v31  ;;  %3374 = vmatmul.mubr.bf16.vlgmr.msra.gmra.mxu1 %v1308_v31 }
 0x766   :  { %1636 = vmatpush1.bf16.msra.mxu0 %v3635_v28  ;;  %3378 = vmatpush3.bf16.msra.mxu1 %v3638_v1  ;;  %v4766_v1 = vld [vmem:[#allocation13 + $0x44] ss:$8 sps:$4 sm:$0xff]  }
 0x767   :  { %3393 = vmatprep.mubr.bf16.mxu1 %v1487_v40  ;;  %1637 = vmatprep.subr.bf16.mxu0 %v3641_v32 }
 0x768   :  { %3379 = vmatprep.subr.bf16.mxu1 %v3642_v51  ;;  %1667 = vmatprep.mubr.bf16.mxu0 %v5252_v58 }
 0x76a   :  { %1638 = vmatpush1.bf16.msra.mxu0 %v3639_v33  ;;  %3380 = vmatpush3.bf16.msra.mxu1 %v3642_v51 }
 0x76b   :  { %1639 = vmatprep.subr.bf16.mxu0 %v3645_v43  ;;  %3381 = vmatprep.subr.bf16.mxu1 %v3646_v18 }
 0x76e   :  { %1640 = vmatpush1.bf16.msra.mxu0 %v3643_v35  ;;  %3382 = vmatpush3.bf16.msra.mxu1 %v3646_v18  ;;  %v3891_v18 = vld [vmem:[%s5228_s5] ss:$0 sm:$0xff] }
 0x76f   :  { %1641 = vmatprep.subr.bf16.mxu0 %v3649_v36  ;;  %3383 = vmatprep.subr.bf16.mxu1 %v3650_v37 }
 0x772   :  { %1642 = vmatpush1.bf16.msra.mxu0 %v3647_v30  ;;  %3384 = vmatpush3.bf16.msra.mxu1 %v3650_v37  ;;  %v5256_v30 = vld [vmem:[#allocation27_spill] sm:$0xff] }
 0x773   :  { %1643 = vmatprep.subr.bf16.mxu0 %v3653_v2  ;;  %3385 = vmatprep.subr.bf16.mxu1 %v3654_v44 }
 0x776   :  { %1644 = vmatpush1.bf16.msra.mxu0 %v3651_v38  ;;  %3386 = vmatpush3.bf16.msra.mxu1 %v3654_v44 }
 0x777   :  { %1645 = vmatprep.subr.bf16.mxu0 %v3657_v22  ;;  %3387 = vmatprep.subr.bf16.mxu1 %v3658_v9 }
 0x77a   :  { %1646 = vmatpush1.bf16.msra.mxu0 %v3655_v10  ;;  %3388 = vmatpush3.bf16.msra.mxu1 %v3658_v9 }
 0x77b   :  { %1647 = vmatprep.subr.bf16.mxu0 %v3661_v11  ;;  %3389 = vmatprep.subr.bf16.mxu1 %v3662_v14 }
 0x77e   :  { %1648 = vmatpush1.bf16.msra.mxu0 %v3659_v59  ;;  %3390 = vmatpush3.bf16.msra.mxu1 %v3662_v14 }
 0x77f   :  { %1649 = vmatprep.subr.bf16.mxu0 %v3665_v16  ;;  %3391 = vmatprep.subr.bf16.mxu1 %v3666_v6 }
 0x782   :  { %1650 = vmatpush1.bf16.msra.mxu0 %v3663_v19  ;;  %3392 = vmatpush3.bf16.msra.mxu1 %v3666_v6 }
 0x783   :  { %3401 = vmatprep.subr.bf16.mxu1 %v5251_v45  ;;  %1880 = vmatprep.subr.bf16.mxu0 %v4748_v63 }
 0x785   :  { %1668 = vmatmul.mubr.bf16.vlgmr.msra.gmra.mxu0 %v1487_v40  ;;  %3394 = vmatmul.mubr.bf16.vlgmr.msra.gmra.mxu1 %v1488_v12 }
 0x786   :  { %3397 = vmatprep.mubr.bf16.mxu1 %v1489_v0  ;;  %1677 = vmatprep.mubr.bf16.mxu0 %v5252_v58 }
 0x787   :  { %1881 = vmatpush1.bf16.msra.mxu0 %v4750_v23  ;;  %3402 = vmatpush3.bf16.msra.mxu1 %v4790_v47 }
 0x788   :  { %1882 = vmatprep.subr.bf16.mxu0 %v4754_v46  ;;  %3403 = vmatprep.subr.bf16.mxu1 %v5251_v45 }
 0x78b   :  { %1883 = vmatpush1.bf16.msra.mxu0 %v4756_v57  ;;  %3404 = vmatpush3.bf16.msra.mxu1 %v4800_v55 }
 0x78c   :  { %1884 = vmatprep.subr.bf16.mxu0 %v4760_v29  ;;  %3405 = vmatprep.subr.bf16.mxu1 %v5251_v45 }
 0x78d   :  { %1678 = vmatmul.mubr.bf16.gmra.mxu0 %v1488_v12 }
 0x78e   :  { %1687 = vmatprep.mubr.bf16.mxu0 %v5252_v58 }
 0x78f   :  { %1885 = vmatpush1.bf16.msra.mxu0 %v4762_v17  ;;  %3406 = vmatpush3.bf16.msra.mxu1 %v4804_v21 }
 0x790   :  { %1886 = vmatprep.subr.bf16.mxu0 %v4766_v1  ;;  %3407 = vmatprep.subr.bf16.mxu1 %v5251_v45 }
 0x793   :  { %1887 = vmatpush1.bf16.msra.mxu0 %v4768_v56  ;;  %3408 = vmatpush3.bf16.msra.mxu1 %v4808_v4 }
 0x794   :  { %1888 = vmatprep.subr.bf16.mxu0 %v4772_v49  ;;  %3409 = vmatprep.subr.bf16.mxu1 %v5251_v45 }
 0x795   :  { %1688 = vmatmul.mubr.bf16.gmra.mxu0 %v1489_v0 }
 0x796   :  { %1697 = vmatprep.mubr.bf16.mxu0 %v5252_v58 }
 0x797   :  { %1889 = vmatpush1.bf16.msra.mxu0 %v4774_v50  ;;  %3410 = vmatpush3.bf16.msra.mxu1 %v4812_v34 }
 0x798   :  { %1890 = vmatprep.subr.bf16.mxu0 %v4778_v52  ;;  %3411 = vmatprep.subr.bf16.mxu1 %v5251_v45 }
 0x79b   :  { %1891 = vmatpush1.bf16.msra.mxu0 %v4780_v54  ;;  %3412 = vmatpush3.bf16.msra.mxu1 %v4816_v3 }
 0x79c   :  { %1892 = vmatprep.subr.bf16.mxu0 %v4784_v25  ;;  %3413 = vmatprep.subr.bf16.mxu1 %v5251_v45 }
 0x79f   :  { %1893 = vmatpush1.bf16.msra.mxu0 %v4786_v61  ;;  %3414 = vmatpush3.bf16.msra.mxu1 %v4820_v62 }
 0x7a0   :  { %1894 = vmatprep.subr.bf16.mxu0 %v4788_v7  ;;  %3415 = vmatprep.subr.bf16.mxu1 %v5251_v45 }
 0x7a3   :  { %1895 = vmatpush1.bf16.msra.mxu0 %v4795_v15  ;;  %3416 = vmatpush3.bf16.msra.mxu1 %v4824_v60 }
 0x7a4   :  { %2040 = vmatprep.subr.bf16.mxu0 %v4748_v63  ;;  %3421 = vmatprep.subr.bf16.mxu1 %v5251_v45 }
 0x825   :  { %v1343_v13 = vpop.f32.mrf.mxu0  ;;  %v1398_v5 = vpop.f32.mrf.mxu1 }
 0x826   :  { %v1350_v39 = vadd.f32 %v1343_v13, %v5255_v20  ;;  %v1399_v35 = vadd.f32 %v3891_v18, %v1398_v5 }
 0x827   :  { %v1345_v41 = vpop.f32.mrf.mxu0  ;;  %v3375_v8 = vpop.f32.mrf.mxu1 }
 0x828   :  { %v2961_v48 = vmul.f32 -1.442695, %v1350_v39  ;;  %v1351_v31 = vadd.f32 %v1345_v41, %v4429_v53 }
 0x829   :  { %v1347_v24 = vpop.f32.mrf.mxu0  ;;  %v1401_v42 = vpop.f32.mrf.mxu1 }
 0x82a   :  { %3777 = vpow2.f32 %v2961_v48  ;;  %v2962_v32 = vmul.f32 -1.442695, %v1351_v31  ;;  %v1477_v42 = vld [vmem:[%s5232_s9] sm:$0x7] }
 0x82b   :  { %v1348_v26 = vpop.f32.mrf.mxu0  ;;  %v3376_v28 = vpop.f32.mrf.mxu1 }
 0x82c   :  { %3779 = vpow2.f32 %v2962_v32 }
 0x837   :  { %v3778_v51 = vpop.eup %3777 }
 0x838   :  { %v1358_v40 = vadd.f32 1.0, %v3778_v51  ;;  %v5260_v51 = vld [vmem:[#allocation25_spill] sm:$0xff] }
 0x839   :  { %v3780_v33 = vpop.eup %3779 }
 0x83a   :  { %3781 = vrcp.f32 %v1358_v40  ;;  %v1359_v43 = vadd.f32 1.0, %v3780_v33  ;;  %v5261_v40 = vsub.s32 0, %v5260_v51 }
 0x83c   :  { %3783 = vrcp.f32 %v1359_v43  ;;  %v4916_v33 = vrot.slane %v1477_v42, %v5261_v40 }
 0x845   :  { %v4889_v13 = vpop.f32.mrf.mxu1 }
 0x847   :  { %v3782_v36 = vpop.eup %3781  ;;  %v1742_v20 = vpop.f32.mrf.mxu1 }
 0x848   :  { %v1404_v37 = vmul.f32 %v3782_v36, %v1399_v35 }
 0x849   :  { %v3784_v44 = vpop.eup %3783  ;;  %v4895_v41 = vpop.f32.mrf.mxu1 }
 0x84a   :  { %v1405_v2 = vadd.f32 %v1404_v37, %v5256_v30  ;;  %v1407_v53 = vsub.f32 1.0, %v3784_v44  ;;  %v1409_v9 = vmul.f32 %v3784_v44, %v4733_v27  ;;  %v5266_v44 = vsub.s32 1, %v5260_v51 }
 0x84b   :  { %v4899_v48 = vpop.f32.mrf.mxu1 }
 0x84c   :  { %3785 = vtanh.f32 %v1405_v2 }
 0x859   :  { %v3786_v38 = vpop.eup %3785 }
 0x85a   :  { %v1408_v22 = vmul.f32 %v3786_v38, %v1407_v53  ;;  %v4929_v53 = vrot.slane %v1477_v42, %v5266_v44 }
 0x85c   :  { %v1410_v10 = vadd.f32 %v1409_v9, %v1408_v22 }
 0x85e   :  { %v1490_v11 = vpack.c.bf16 %v1410_v10, %v4733_v27  ;;  %v1669_v27 = vpop.f32.mrf.mxu0 }
 0x85f   :  { %v1670_v37 = vadd.f32 %v1669_v27, %v4916_v33 }
 0x860   :  { %1698 = vmatmul.mubr.bf16.gmra.mxu0 %v1490_v11  ;;  %3398 = vmatmul.mubr.bf16.gmra.mxu1 %v1490_v11  ;;  %v1671_v14 = vpop.f32.mrf.mxu0 }
 0x861   :  { %1912 = vmatprep.mubr.bf16.mxu0 %v5252_v58  ;;  %3417 = vmatprep.mubr.msk.bf16.mxu1 %vm4123_vm2, %v5251_v45 }
 0x862   :  { %v4877_v59 = vpop.f32.mrf.mxu0 }
 0x864   :  { %v4879_v16 = vpop.f32.mrf.mxu0 }
 0x866   :  { %v4881_v6 = vpop.f32.mrf.mxu0 }
 0x868   :  { %1913 = vmatmul.mubr.bf16.vlgmr.msra.gmra.mxu0 %v5252_v58  ;;  %3418 = vmatmul.mubr.bf16.vlgmr.msra.gmra.mxu1 %v5252_v58  ;;  %v4883_v19 = vpop.f32.mrf.mxu0 }
 0x869   :  { %2041 = vmatpush1.bf16.msra.mxu0 %v4750_v23  ;;  %3422 = vmatpush3.bf16.msra.mxu1 %v4790_v47 }
 0x86a   :  { %2042 = vmatprep.subr.bf16.mxu0 %v4754_v46  ;;  %3423 = vmatprep.subr.bf16.mxu1 %v5251_v45  ;;  %v4885_v12 = vpop.f32.mrf.mxu0 }
 0x86b   :  { %2072 = vmatprep.mubr.bf16.mxu0 %v5252_v58  ;;  %3437 = vmatprep.mubr.msk.bf16.mxu1 %vm4123_vm2, %v5251_v45 }
 0x86c   :  { %v4887_v0 = vpop.f32.mrf.mxu0 }
 0x86d   :  { %2043 = vmatpush1.bf16.msra.mxu0 %v4756_v57  ;;  %3424 = vmatpush3.bf16.msra.mxu1 %v4800_v55 }
 0x86e   :  { %2044 = vmatprep.subr.bf16.mxu0 %v4760_v29  ;;  %3425 = vmatprep.subr.bf16.mxu1 %v5251_v45  ;;  %v4891_v5 = vpop.f32.mrf.mxu0 }
 0x870   :  { %v4893_v39 = vpop.f32.mrf.mxu0 }
 0x871   :  { %2045 = vmatpush1.bf16.msra.mxu0 %v4762_v17  ;;  %3426 = vmatpush3.bf16.msra.mxu1 %v4804_v21 }
 0x872   :  { %2046 = vmatprep.subr.bf16.mxu0 %v4766_v1  ;;  %3427 = vmatprep.subr.bf16.mxu1 %v5251_v45  ;;  %v4897_v8 = vpop.f32.mrf.mxu0 }
 0x874   :  { %v4901_v24 = vpop.f32.mrf.mxu0 }
 0x875   :  { %2047 = vmatpush1.bf16.msra.mxu0 %v4768_v56  ;;  %3428 = vmatpush3.bf16.msra.mxu1 %v4808_v4 }
 0x876   :  { %2048 = vmatprep.subr.bf16.mxu0 %v4772_v49  ;;  %3429 = vmatprep.subr.bf16.mxu1 %v5251_v45 }
 0x879   :  { %2049 = vmatpush1.bf16.msra.mxu0 %v4774_v50  ;;  %3430 = vmatpush3.bf16.msra.mxu1 %v4812_v34 }
 0x87a   :  { %2050 = vmatprep.subr.bf16.mxu0 %v4778_v52  ;;  %3431 = vmatprep.subr.bf16.mxu1 %v5251_v45 }
 0x87d   :  { %2051 = vmatpush1.bf16.msra.mxu0 %v4780_v54  ;;  %3432 = vmatpush3.bf16.msra.mxu1 %v4816_v3 }
 0x87e   :  { %2052 = vmatprep.subr.bf16.mxu0 %v4784_v25  ;;  %3433 = vmatprep.subr.bf16.mxu1 %v5251_v45 }
 0x881   :  { %2053 = vmatpush1.bf16.msra.mxu0 %v4786_v61  ;;  %3434 = vmatpush3.bf16.msra.mxu1 %v4820_v62 }
 0x882   :  { %2054 = vmatprep.subr.bf16.mxu0 %v4788_v7  ;;  %3435 = vmatprep.subr.bf16.mxu1 %v5251_v45 }
 0x885   :  { %2055 = vmatpush1.bf16.msra.mxu0 %v4795_v15  ;;  %3436 = vmatpush3.bf16.msra.mxu1 %v4824_v60 }
 0x886   :  { %2146 = vmatprep.subr.bf16.mxu0 %v4748_v63  ;;  %3441 = vmatprep.subr.bf16.mxu1 %v5251_v45 }
 0x920   :  { %v4906_v26 = vpop.f32.mrf.mxu0  ;;  %v4908_v28 = vpop.f32.mrf.mxu1 }
 0x921   :  { %5257 = vst [vmem:[#allocation28_spill] sm:$0xff] %v4906_v26  ;;  %5258 = vst [vmem:[#allocation26_spill] sm:$0xff] %v4908_v28 }
 0x922   :  { %v4910_v31 = vpop.f32.mrf.mxu0  ;;  %v4912_v32 = vpop.f32.mrf.mxu1 }
 0x923   :  { %5259 = vst [vmem:[#allocation29_spill] sm:$0xff] %v4910_v31 }
 0x924   :  { %v4918_v43 = vpop.f32.mrf.mxu0  ;;  %v4920_v18 = vpop.f32.mrf.mxu1 }
 0x925   :  { %5262 = vst [vmem:[#allocation27_spill] sm:$0xff] %v4918_v43  ;;  %5263 = vst [vmem:[#allocation25_spill] sm:$0xff] %v4920_v18  ;;  %v1672_v18 = vadd.f32 %v1671_v14, %v4929_v53  ;;  %v5267_v14 = vsub.s32 2, %v5260_v51 }
 0x926   :  { %v4922_v35 = vpop.f32.mrf.mxu0  ;;  %v4924_v36 = vpop.f32.mrf.mxu1 }
 0x927   :  { %5264 = vst [vmem:[#allocation30_spill] sm:$0xff] %v4922_v35  ;;  %5265 = vst [vmem:[#allocation31_spill] sm:$0xff] %v4924_v36 }
 0x928   :  { %v1914_v30 = vpop.f32.mrf.mxu0  ;;  %v2023_v2 = vpop.f32.mrf.mxu1 }
 0x929   :  { %v1921_v38 = vadd.f32 %v1914_v30, %v1670_v37  ;;  %v4935_v37 = vld [vmem:[%s5233_s10] ss:$0 sm:$0xff] }
 0x92a   :  { %v1916_v22 = vpop.f32.mrf.mxu0  ;;  %v3419_v9 = vpop.f32.mrf.mxu1  ;;  %v2024_v44 = vadd.f32 %v4935_v37, %v2023_v2 }
 0x92b   :  { %v3003_v10 = vmul.f32 -1.442695, %v1921_v38  ;;  %v1922_v28 = vadd.f32 %v1916_v22, %v1672_v18  ;;  %v4940_v38 = vrot.slane %v1477_v42, %v5267_v14 }
 0x92c   :  { %v1918_v11 = vpop.f32.mrf.mxu0  ;;  %v2026_v40 = vpop.f32.mrf.mxu1 }
 0x92d   :  { %3787 = vpow2.f32 %v3003_v10  ;;  %v3004_v31 = vmul.f32 -1.442695, %v1922_v28  ;;  %v1743_v28 = vadd.f32 %v1742_v20, %v4940_v38  ;;  %v1674_v20 = vadd.f32 %v4877_v59, %v4916_v33 }
 0x92e   :  { %v1919_v35 = vpop.f32.mrf.mxu0  ;;  %v3420_v43 = vpop.f32.mrf.mxu1 }
 0x92f   :  { %3789 = vpow2.f32 %v3004_v31 }
 0x93a   :  { %v3788_v27 = vpop.eup %3787 }
 0x93b   :  { %v1929_v26 = vadd.f32 1.0, %v3788_v27 }
 0x93c   :  { %v3790_v36 = vpop.eup %3789 }
 0x93d   :  { %3791 = vrcp.f32 %v1929_v26  ;;  %v1930_v30 = vadd.f32 1.0, %v3790_v36 }
 0x93f   :  { %3793 = vrcp.f32 %v1930_v30 }
 0x94a   :  { %v3792_v43 = vpop.eup %3791 }
 0x94b   :  { %v2029_v31 = vmul.f32 %v3792_v43, %v2024_v44  ;;  %v1676_v43 = vadd.f32 %v4879_v16, %v4929_v53 }
 0x94c   :  { %v3794_v26 = vpop.eup %3793 }
 0x94d   :  { %v2030_v18 = vadd.f32 %v2029_v31, %v1743_v28  ;;  %v2032_v35 = vsub.f32 1.0, %v3794_v26  ;;  %v2034_v10 = vmul.f32 0.0, %v3794_v26 }
 0x94f   :  { %3795 = vtanh.f32 %v2030_v18 }
 0x95c   :  { %v3796_v22 = vpop.eup %3795 }
 0x95d   :  { %v2033_v9 = vmul.f32 %v3796_v22, %v2032_v35 }
 0x95f   :  { %v4943_v11 = vadd.f32 %v2034_v10, %v2033_v9 }
 0x961   :  { %v2039_v36 = vpack.c.bf16 %v4943_v11, %v4943_v11 }
 0x963   :  { %2073 = vmatmul.mubr.bf16.vlgmr.msra.gmra.mxu0 %v2039_v36  ;;  %3438 = vmatmul.mubr.bf16.vlgmr.msra.gmra.mxu1 %v2039_v36 }
 0x964   :  { %2147 = vmatpush1.bf16.msra.mxu0 %v4750_v23  ;;  %3442 = vmatpush3.bf16.msra.mxu1 %v4790_v47 }
 0x965   :  { %2148 = vmatprep.subr.bf16.mxu0 %v4754_v46  ;;  %3443 = vmatprep.subr.bf16.mxu1 %v5251_v45 }
 0x966   :  { %2178 = vmatprep.mubr.bf16.mxu0 %v5252_v58  ;;  %3457 = vmatprep.mubr.msk.bf16.mxu1 %vm4123_vm2, %v5251_v45 }
 0x968   :  { %2149 = vmatpush1.bf16.msra.mxu0 %v4756_v57  ;;  %3444 = vmatpush3.bf16.msra.mxu1 %v4800_v55 }
 0x969   :  { %2150 = vmatprep.subr.bf16.mxu0 %v4760_v29  ;;  %3445 = vmatprep.subr.bf16.mxu1 %v5251_v45 }
 0x96c   :  { %2151 = vmatpush1.bf16.msra.mxu0 %v4762_v17  ;;  %3446 = vmatpush3.bf16.msra.mxu1 %v4804_v21 }
 0x96d   :  { %2152 = vmatprep.subr.bf16.mxu0 %v4766_v1  ;;  %3447 = vmatprep.subr.bf16.mxu1 %v5251_v45 }
 0x970   :  { %2153 = vmatpush1.bf16.msra.mxu0 %v4768_v56  ;;  %3448 = vmatpush3.bf16.msra.mxu1 %v4808_v4 }
 0x971   :  { %2154 = vmatprep.subr.bf16.mxu0 %v4772_v49  ;;  %3449 = vmatprep.subr.bf16.mxu1 %v5251_v45 }
 0x974   :  { %2155 = vmatpush1.bf16.msra.mxu0 %v4774_v50  ;;  %3450 = vmatpush3.bf16.msra.mxu1 %v4812_v34 }
 0x975   :  { %2156 = vmatprep.subr.bf16.mxu0 %v4778_v52  ;;  %3451 = vmatprep.subr.bf16.mxu1 %v5251_v45 }
 0x978   :  { %2157 = vmatpush1.bf16.msra.mxu0 %v4780_v54  ;;  %3452 = vmatpush3.bf16.msra.mxu1 %v4816_v3 }
 0x979   :  { %2158 = vmatprep.subr.bf16.mxu0 %v4784_v25  ;;  %3453 = vmatprep.subr.bf16.mxu1 %v5251_v45 }
 0x97c   :  { %2159 = vmatpush1.bf16.msra.mxu0 %v4786_v61  ;;  %3454 = vmatpush3.bf16.msra.mxu1 %v4820_v62 }
 0x97d   :  { %2160 = vmatprep.subr.bf16.mxu0 %v4788_v7  ;;  %3455 = vmatprep.subr.bf16.mxu1 %v5251_v45 }
 0x980   :  { %2161 = vmatpush1.bf16.msra.mxu0 %v4795_v15  ;;  %3456 = vmatpush3.bf16.msra.mxu1 %v4824_v60 }
 0x981   :  { %2252 = vmatprep.subr.bf16.mxu0 %v4748_v63  ;;  %3461 = vmatprep.subr.bf16.mxu1 %v5251_v45 }
 0xa23   :  { %v2074_v42 = vpop.f32.mrf.mxu0  ;;  %v2129_v51 = vpop.f32.mrf.mxu1 }
 0xa24   :  { %v2081_v2 = vadd.f32 %v2074_v42, %v1674_v20  ;;  %v2130_v10 = vadd.f32 %v4935_v37, %v2129_v51  ;;  %v1746_v20 = vadd.f32 %v4899_v48, %v4940_v38  ;;  %v1680_v48 = vadd.f32 %v4881_v6, %v4916_v33 }
 0xa25   :  { %v2076_v40 = vpop.f32.mrf.mxu0  ;;  %v3439_v27 = vpop.f32.mrf.mxu1 }
 0xa26   :  { %v3014_v30 = vmul.f32 -1.442695, %v2081_v2  ;;  %v2082_v18 = vadd.f32 %v2076_v40, %v1676_v43 }
 0xa27   :  { %v2078_v44 = vpop.f32.mrf.mxu0  ;;  %v2132_v14 = vpop.f32.mrf.mxu1 }
 0xa28   :  { %3797 = vpow2.f32 %v3014_v30  ;;  %v3015_v26 = vmul.f32 -1.442695, %v2082_v18 }
 0xa29   :  { %v2079_v28 = vpop.f32.mrf.mxu0  ;;  %v3440_v31 = vpop.f32.mrf.mxu1 }
 0xa2a   :  { %3799 = vpow2.f32 %v3015_v26 }
 0xa35   :  { %v3798_v35 = vpop.eup %3797 }
 0xa36   :  { %v2089_v22 = vadd.f32 1.0, %v3798_v35 }
 0xa37   :  { %v3800_v59 = vpop.eup %3799 }
 0xa38   :  { %3801 = vrcp.f32 %v2089_v22  ;;  %v2090_v9 = vadd.f32 1.0, %v3800_v59  ;;  %v1682_v59 = vadd.f32 %v4883_v19, %v4929_v53 }
 0xa3a   :  { %3803 = vrcp.f32 %v2090_v9 }
 0xa45   :  { %v3802_v36 = vpop.eup %3801 }
 0xa46   :  { %v2135_v42 = vmul.f32 %v3802_v36, %v2130_v10 }
 0xa47   :  { %v3804_v2 = vpop.eup %3803 }
 0xa48   :  { %v2136_v16 = vadd.f32 %v2135_v42, %v1746_v20  ;;  %v2138_v27 = vsub.f32 1.0, %v3804_v2  ;;  %v2140_v44 = vmul.f32 %v3804_v2, %v4943_v11 }
 0xa4a   :  { %3805 = vtanh.f32 %v2136_v16 }
 0xa57   :  { %v3806_v40 = vpop.eup %3805 }
 0xa58   :  { %v2139_v30 = vmul.f32 %v3806_v40, %v2138_v27 }
 0xa5a   :  { %v4990_v14 = vadd.f32 %v2140_v44, %v2139_v30  ;;  %v1751_v30 = vadd.f32 %v4889_v13, %v4940_v38  ;;  %v1684_v13 = vadd.f32 %v4885_v12, %v4916_v33 }
 0xa5c   :  { %v2145_v43 = vpack.c.bf16 %v4990_v14, %v4990_v14 }
 0xa5e   :  { %2179 = vmatmul.mubr.bf16.vlgmr.msra.gmra.mxu0 %v2145_v43  ;;  %3458 = vmatmul.mubr.bf16.vlgmr.msra.gmra.mxu1 %v2145_v43 }
 0xa5f   :  { %2253 = vmatpush1.bf16.msra.mxu0 %v4750_v23  ;;  %3462 = vmatpush3.bf16.msra.mxu1 %v4790_v47 }
 0xa60   :  { %2254 = vmatprep.subr.bf16.mxu0 %v4754_v46  ;;  %3463 = vmatprep.subr.bf16.mxu1 %v5251_v45 }
 0xa61   :  { %2284 = vmatprep.mubr.bf16.mxu0 %v5252_v58  ;;  %3477 = vmatprep.mubr.msk.bf16.mxu1 %vm4123_vm2, %v5251_v45 }
 0xa63   :  { %2255 = vmatpush1.bf16.msra.mxu0 %v4756_v57  ;;  %3464 = vmatpush3.bf16.msra.mxu1 %v4800_v55 }
 0xa64   :  { %2256 = vmatprep.subr.bf16.mxu0 %v4760_v29  ;;  %3465 = vmatprep.subr.bf16.mxu1 %v5251_v45 }
 0xa67   :  { %2257 = vmatpush1.bf16.msra.mxu0 %v4762_v17  ;;  %3466 = vmatpush3.bf16.msra.mxu1 %v4804_v21 }
 0xa68   :  { %2258 = vmatprep.subr.bf16.mxu0 %v4766_v1  ;;  %3467 = vmatprep.subr.bf16.mxu1 %v5251_v45 }
 0xa6b   :  { %2259 = vmatpush1.bf16.msra.mxu0 %v4768_v56  ;;  %3468 = vmatpush3.bf16.msra.mxu1 %v4808_v4 }
 0xa6c   :  { %2260 = vmatprep.subr.bf16.mxu0 %v4772_v49  ;;  %3469 = vmatprep.subr.bf16.mxu1 %v5251_v45 }
 0xa6f   :  { %2261 = vmatpush1.bf16.msra.mxu0 %v4774_v50  ;;  %3470 = vmatpush3.bf16.msra.mxu1 %v4812_v34 }
 0xa70   :  { %2262 = vmatprep.subr.bf16.mxu0 %v4778_v52  ;;  %3471 = vmatprep.subr.bf16.mxu1 %v5251_v45 }
 0xa73   :  { %2263 = vmatpush1.bf16.msra.mxu0 %v4780_v54  ;;  %3472 = vmatpush3.bf16.msra.mxu1 %v4816_v3 }
 0xa74   :  { %2264 = vmatprep.subr.bf16.mxu0 %v4784_v25  ;;  %3473 = vmatprep.subr.bf16.mxu1 %v5251_v45 }
 0xa77   :  { %2265 = vmatpush1.bf16.msra.mxu0 %v4786_v61  ;;  %3474 = vmatpush3.bf16.msra.mxu1 %v4820_v62 }
 0xa78   :  { %2266 = vmatprep.subr.bf16.mxu0 %v4788_v7  ;;  %3475 = vmatprep.subr.bf16.mxu1 %v5251_v45 }
 0xa7b   :  { %2267 = vmatpush1.bf16.msra.mxu0 %v4795_v15  ;;  %3476 = vmatpush3.bf16.msra.mxu1 %v4824_v60 }
 0xa7c   :  { %2358 = vmatprep.subr.bf16.mxu0 %v4748_v63  ;;  %3481 = vmatprep.subr.bf16.mxu1 %v5251_v45 }
 0xb1e   :  { %v2180_v11 = vpop.f32.mrf.mxu0  ;;  %v2235_v51 = vpop.f32.mrf.mxu1 }
 0xb1f   :  { %v2187_v28 = vadd.f32 %v2180_v11, %v1680_v48  ;;  %v2236_v27 = vadd.f32 %v4935_v37, %v2235_v51 }
 0xb20   :  { %v2182_v31 = vpop.f32.mrf.mxu0  ;;  %v3459_v18 = vpop.f32.mrf.mxu1 }
 0xb21   :  { %v3016_v26 = vmul.f32 -1.442695, %v2187_v28  ;;  %v2188_v36 = vadd.f32 %v2182_v31, %v1682_v59 }
 0xb22   :  { %v2184_v35 = vpop.f32.mrf.mxu0  ;;  %v2238_v22 = vpop.f32.mrf.mxu1 }
 0xb23   :  { %3807 = vpow2.f32 %v3016_v26  ;;  %v3017_v20 = vmul.f32 -1.442695, %v2188_v36 }
 0xb24   :  { %v2185_v9 = vpop.f32.mrf.mxu0  ;;  %v3460_v10 = vpop.f32.mrf.mxu1 }
 0xb25   :  { %3809 = vpow2.f32 %v3017_v20  ;;  %v1686_v20 = vadd.f32 %v4887_v0, %v4929_v53 }
 0xb30   :  { %v3808_v42 = vpop.eup %3807 }
 0xb31   :  { %v2195_v16 = vadd.f32 1.0, %v3808_v42 }
 0xb32   :  { %v3810_v6 = vpop.eup %3809 }
 0xb33   :  { %3811 = vrcp.f32 %v2195_v16  ;;  %v2196_v2 = vadd.f32 1.0, %v3810_v6 }
 0xb35   :  { %3813 = vrcp.f32 %v2196_v2 }
 0xb40   :  { %v3812_v40 = vpop.eup %3811 }
 0xb41   :  { %v2241_v44 = vmul.f32 %v3812_v40, %v2236_v27 }
 0xb42   :  { %v3814_v43 = vpop.eup %3813 }
 0xb43   :  { %v2242_v19 = vadd.f32 %v2241_v44, %v1751_v30  ;;  %v2244_v48 = vsub.f32 1.0, %v3814_v43  ;;  %v2246_v31 = vmul.f32 %v3814_v43, %v4990_v14  ;;  %v1754_v43 = vadd.f32 %v4895_v41, %v4940_v38 }
 0xb44   :  { %v1690_v41 = vadd.f32 %v4891_v5, %v4916_v33 }
 0xb45   :  { %3815 = vtanh.f32 %v2242_v19 }
 0xb52   :  { %v3816_v11 = vpop.eup %3815 }
 0xb53   :  { %v2245_v28 = vmul.f32 %v3816_v11, %v2244_v48 }
 0xb55   :  { %v5037_v18 = vadd.f32 %v2246_v31, %v2245_v28 }
 0xb57   :  { %v2251_v26 = vpack.c.bf16 %v5037_v18, %v5037_v18 }
 0xb59   :  { %2285 = vmatmul.mubr.bf16.vlgmr.msra.gmra.mxu0 %v2251_v26  ;;  %3478 = vmatmul.mubr.bf16.vlgmr.msra.gmra.mxu1 %v2251_v26 }
 0xb5a   :  { %2359 = vmatpush1.bf16.msra.mxu0 %v4750_v23  ;;  %3482 = vmatpush3.bf16.msra.mxu1 %v4790_v47 }
 0xb5b   :  { %2360 = vmatprep.subr.bf16.mxu0 %v4754_v46  ;;  %3483 = vmatprep.subr.bf16.mxu1 %v5251_v45 }
 0xb5c   :  { %2390 = vmatprep.mubr.bf16.mxu0 %v5252_v58  ;;  %3497 = vmatprep.mubr.msk.bf16.mxu1 %vm4123_vm2, %v5251_v45 }
 0xb5e   :  { %2361 = vmatpush1.bf16.msra.mxu0 %v4756_v57  ;;  %3484 = vmatpush3.bf16.msra.mxu1 %v4800_v55 }
 0xb5f   :  { %2362 = vmatprep.subr.bf16.mxu0 %v4760_v29  ;;  %3485 = vmatprep.subr.bf16.mxu1 %v5251_v45 }
 0xb62   :  { %2363 = vmatpush1.bf16.msra.mxu0 %v4762_v17  ;;  %3486 = vmatpush3.bf16.msra.mxu1 %v4804_v21 }
 0xb63   :  { %2364 = vmatprep.subr.bf16.mxu0 %v4766_v1  ;;  %3487 = vmatprep.subr.bf16.mxu1 %v5251_v45 }
 0xb66   :  { %2365 = vmatpush1.bf16.msra.mxu0 %v4768_v56  ;;  %3488 = vmatpush3.bf16.msra.mxu1 %v4808_v4 }
 0xb67   :  { %2366 = vmatprep.subr.bf16.mxu0 %v4772_v49  ;;  %3489 = vmatprep.subr.bf16.mxu1 %v5251_v45 }
 0xb6a   :  { %2367 = vmatpush1.bf16.msra.mxu0 %v4774_v50  ;;  %3490 = vmatpush3.bf16.msra.mxu1 %v4812_v34 }
 0xb6b   :  { %2368 = vmatprep.subr.bf16.mxu0 %v4778_v52  ;;  %3491 = vmatprep.subr.bf16.mxu1 %v5251_v45 }
 0xb6e   :  { %2369 = vmatpush1.bf16.msra.mxu0 %v4780_v54  ;;  %3492 = vmatpush3.bf16.msra.mxu1 %v4816_v3 }
 0xb6f   :  { %2370 = vmatprep.subr.bf16.mxu0 %v4784_v25  ;;  %3493 = vmatprep.subr.bf16.mxu1 %v5251_v45 }
 0xb72   :  { %2371 = vmatpush1.bf16.msra.mxu0 %v4786_v61  ;;  %3494 = vmatpush3.bf16.msra.mxu1 %v4820_v62 }
 0xb73   :  { %2372 = vmatprep.subr.bf16.mxu0 %v4788_v7  ;;  %3495 = vmatprep.subr.bf16.mxu1 %v5251_v45 }
 0xb76   :  { %2373 = vmatpush1.bf16.msra.mxu0 %v4795_v15  ;;  %3496 = vmatpush3.bf16.msra.mxu1 %v4824_v60 }
 0xb77   :  { %2464 = vmatprep.subr.bf16.mxu0 %v4748_v63  ;;  %3501 = vmatprep.subr.bf16.mxu1 %v5251_v45 }
 0xc19   :  { %v2286_v14 = vpop.f32.mrf.mxu0  ;;  %v2341_v51 = vpop.f32.mrf.mxu1 }
 0xc1a   :  { %v2293_v35 = vadd.f32 %v2286_v14, %v1684_v13  ;;  %v2342_v44 = vadd.f32 %v4935_v37, %v2341_v51 }
 0xc1b   :  { %v2288_v22 = vpop.f32.mrf.mxu0  ;;  %v3479_v59 = vpop.f32.mrf.mxu1 }
 0xc1c   :  { %v3018_v9 = vmul.f32 -1.442695, %v2293_v35  ;;  %v2294_v6 = vadd.f32 %v2288_v22, %v1686_v20 }
 0xc1d   :  { %v2290_v10 = vpop.f32.mrf.mxu0  ;;  %v2344_v36 = vpop.f32.mrf.mxu1 }
 0xc1e   :  { %3817 = vpow2.f32 %v3018_v9  ;;  %v3019_v2 = vmul.f32 -1.442695, %v2294_v6 }
 0xc1f   :  { %v2291_v42 = vpop.f32.mrf.mxu0  ;;  %v3480_v16 = vpop.f32.mrf.mxu1 }
 0xc20   :  { %3819 = vpow2.f32 %v3019_v2  ;;  %v1692_v42 = vadd.f32 %v4893_v39, %v4929_v53 }
 0xc2b   :  { %v3818_v27 = vpop.eup %3817 }
 0xc2c   :  { %v2301_v40 = vadd.f32 1.0, %v3818_v27 }
 0xc2d   :  { %v3820_v12 = vpop.eup %3819 }
 0xc2e   :  { %3821 = vrcp.f32 %v2301_v40  ;;  %v2302_v30 = vadd.f32 1.0, %v3820_v12 }
 0xc30   :  { %3823 = vrcp.f32 %v2302_v30 }
 0xc3b   :  { %v3822_v19 = vpop.eup %3821 }
 0xc3c   :  { %v2347_v48 = vmul.f32 %v3822_v19, %v2342_v44 }
 0xc3d   :  { %v3824_v11 = vpop.eup %3823 }
 0xc3e   :  { %v2348_v0 = vadd.f32 %v2347_v48, %v1754_v43  ;;  %v2350_v28 = vsub.f32 1.0, %v3824_v11  ;;  %v2352_v13 = vmul.f32 %v3824_v11, %v5037_v18  ;;  %v1759_v43 = vadd.f32 %v4912_v32, %v4940_v38 }
 0xc40   :  { %3825 = vtanh.f32 %v2348_v0 }
 0xc4d   :  { %v3826_v31 = vpop.eup %3825 }
 0xc4e   :  { %v2351_v26 = vmul.f32 %v3826_v31, %v2350_v28 }
 0xc50   :  { %v5084_v14 = vadd.f32 %v2352_v13, %v2351_v26 }
 0xc52   :  { %v2357_v35 = vpack.c.bf16 %v5084_v14, %v5084_v14 }
 0xc54   :  { %2391 = vmatmul.mubr.bf16.vlgmr.msra.gmra.mxu0 %v2357_v35  ;;  %3498 = vmatmul.mubr.bf16.vlgmr.msra.gmra.mxu1 %v2357_v35 }
 0xc55   :  { %2465 = vmatpush1.bf16.msra.mxu0 %v4750_v23  ;;  %3502 = vmatpush3.bf16.msra.mxu1 %v4790_v47 }
 0xc56   :  { %2466 = vmatprep.subr.bf16.mxu0 %v4754_v46  ;;  %3503 = vmatprep.subr.bf16.mxu1 %v5251_v45 }
 0xc57   :  { %2496 = vmatprep.mubr.bf16.mxu0 %v5252_v58  ;;  %3517 = vmatprep.mubr.msk.bf16.mxu1 %vm4123_vm2, %v5251_v45 }
 0xc59   :  { %2467 = vmatpush1.bf16.msra.mxu0 %v4756_v57  ;;  %3504 = vmatpush3.bf16.msra.mxu1 %v4800_v55 }
 0xc5a   :  { %2468 = vmatprep.subr.bf16.mxu0 %v4760_v29  ;;  %3505 = vmatprep.subr.bf16.mxu1 %v5251_v45 }
 0xc5d   :  { %2469 = vmatpush1.bf16.msra.mxu0 %v4762_v17  ;;  %3506 = vmatpush3.bf16.msra.mxu1 %v4804_v21 }
 0xc5e   :  { %2470 = vmatprep.subr.bf16.mxu0 %v4766_v1  ;;  %3507 = vmatprep.subr.bf16.mxu1 %v5251_v45 }
 0xc61   :  { %2471 = vmatpush1.bf16.msra.mxu0 %v4768_v56  ;;  %3508 = vmatpush3.bf16.msra.mxu1 %v4808_v4 }
 0xc62   :  { %2472 = vmatprep.subr.bf16.mxu0 %v4772_v49  ;;  %3509 = vmatprep.subr.bf16.mxu1 %v5251_v45 }
 0xc65   :  { %2473 = vmatpush1.bf16.msra.mxu0 %v4774_v50  ;;  %3510 = vmatpush3.bf16.msra.mxu1 %v4812_v34 }
 0xc66   :  { %2474 = vmatprep.subr.bf16.mxu0 %v4778_v52  ;;  %3511 = vmatprep.subr.bf16.mxu1 %v5251_v45 }
 0xc69   :  { %2475 = vmatpush1.bf16.msra.mxu0 %v4780_v54  ;;  %3512 = vmatpush3.bf16.msra.mxu1 %v4816_v3 }
 0xc6a   :  { %2476 = vmatprep.subr.bf16.mxu0 %v4784_v25  ;;  %3513 = vmatprep.subr.bf16.mxu1 %v5251_v45 }
 0xc6d   :  { %2477 = vmatpush1.bf16.msra.mxu0 %v4786_v61  ;;  %3514 = vmatpush3.bf16.msra.mxu1 %v4820_v62 }
 0xc6e   :  { %2478 = vmatprep.subr.bf16.mxu0 %v4788_v7  ;;  %3515 = vmatprep.subr.bf16.mxu1 %v5251_v45 }
 0xc71   :  { %2479 = vmatpush1.bf16.msra.mxu0 %v4795_v15  ;;  %3516 = vmatpush3.bf16.msra.mxu1 %v4824_v60 }
 0xc72   :  { %2570 = vmatprep.subr.bf16.mxu0 %v4748_v63  ;;  %3521 = vmatprep.subr.bf16.mxu1 %v5251_v45 }
 0xd14   :  { %v2392_v18 = vpop.f32.mrf.mxu0  ;;  %v2447_v51 = vpop.f32.mrf.mxu1 }
 0xd15   :  { %v2399_v22 = vadd.f32 %v2392_v18, %v1690_v41  ;;  %v2448_v44 = vadd.f32 %v4935_v37, %v2447_v51 }
 0xd16   :  { %v2394_v59 = vpop.f32.mrf.mxu0  ;;  %v3499_v9 = vpop.f32.mrf.mxu1 }
 0xd17   :  { %v3020_v10 = vmul.f32 -1.442695, %v2399_v22  ;;  %v2400_v2 = vadd.f32 %v2394_v59, %v1692_v42  ;;  %v3892_v22 = vld [vmem:[#allocation13 + $0x70] ss:$8 sps:$4 sm:$0xff]   ;;  %v3894_v9 = vld [vmem:[#allocation13 + $0x64] ss:$8 sps:$4 sm:$0xff]  }
 0xd18   :  { %v2396_v36 = vpop.f32.mrf.mxu0  ;;  %v2450_v20 = vpop.f32.mrf.mxu1  ;;  %v3893_v59 = vld [vmem:[#allocation15 + $0x38] sm:$0xff]  }
 0xd19   :  { %3827 = vpow2.f32 %v3020_v10  ;;  %v3021_v27 = vmul.f32 -1.442695, %v2400_v2  ;;  %v3895_v10 = vld [vmem:[#allocation13 + $0x60] ss:$8 sps:$4 sm:$0xff]   ;;  %v3896_v36 = vld [vmem:[#allocation15 + $0x30] sm:$0xff]  }
 0xd1a   :  { %v2397_v16 = vpop.f32.mrf.mxu0  ;;  %v3500_v6 = vpop.f32.mrf.mxu1  ;;  %v3897_v20 = vld [vmem:[#allocation13 + $0x54] ss:$8 sps:$4 sm:$0xff]   ;;  %v3898_v42 = vld [vmem:[#allocation13 + $0x50] ss:$8 sps:$4 sm:$0xff]   ;;  %v3902_v2 = vld [vmem:[#allocation15 + $0x20] sm:$0xff]  }
 0xd1b   :  { %3829 = vpow2.f32 %v3021_v27  ;;  %v3899_v16 = vld [vmem:[#allocation15 + $0x28] sm:$0xff]   ;;  %v3903_v27 = vld [vmem:[#allocation13 + $0x34] ss:$8 sps:$4 sm:$0xff]  }
 0xd1c   :  { %v3900_v6 = vld [vmem:[#allocation13 + $0x44] ss:$8 sps:$4 sm:$0xff]  }
 0xd26   :  { %v3828_v40 = vpop.eup %3827 }
 0xd27   :  { %v2407_v12 = vadd.f32 1.0, %v3828_v40  ;;  %v3904_v40 = vld [vmem:[#allocation13 + $0x30] ss:$8 sps:$4 sm:$0xff]  }
 0xd28   :  { %v3830_v5 = vpop.eup %3829 }
 0xd29   :  { %3831 = vrcp.f32 %v2407_v12  ;;  %v2408_v30 = vadd.f32 1.0, %v3830_v5  ;;  %v3905_v12 = vld [vmem:[#allocation15 + $0x18] sm:$0xff]   ;;  %v3906_v5 = vld [vmem:[#allocation13 + $0x24] ss:$8 sps:$4 sm:$0xff]  }
 0xd2b   :  { %3833 = vrcp.f32 %v2408_v30  ;;  %v3907_v30 = vld [vmem:[#allocation13 + $0x20] ss:$8 sps:$4 sm:$0xff]  }
 0xd36   :  { %v3832_v19 = vpop.eup %3831 }
 0xd37   :  { %v2453_v48 = vmul.f32 %v3832_v19, %v2448_v44  ;;  %v3908_v44 = vld [vmem:[#allocation15 + $0x10] sm:$0xff]  }
 0xd38   :  { %v3834_v0 = vpop.eup %3833  ;;  %v3909_v19 = vld [vmem:[#allocation13 + $0x14] ss:$8 sps:$4 sm:$0xff]  }
 0xd39   :  { %v2454_v39 = vadd.f32 %v2453_v48, %v1759_v43  ;;  %v2456_v11 = vsub.f32 1.0, %v3834_v0  ;;  %v2458_v26 = vmul.f32 %v3834_v0, %v5084_v14  ;;  %v3910_v43 = vld [vmem:[#allocation13 + $0x10] ss:$8 sps:$4 sm:$0xff]   ;;  %v3911_v48 = vld [vmem:[#allocation15 + $0x8] sm:$0xff]  }
 0xd3a   :  { %v3913_v0 = vld [vmem:[#allocation13] ss:$8 sps:$4 sm:$0xff]  }
 0xd3b   :  { %3835 = vtanh.f32 %v2454_v39  ;;  %v3912_v39 = vld [vmem:[#allocation13 + $0x4] ss:$8 sps:$4 sm:$0xff]  }
 0xd48   :  { %v3836_v28 = vpop.eup %3835 }
 0xd49   :  { %v2457_v31 = vmul.f32 %v3836_v28, %v2456_v11  ;;  %v3914_v11 = vld [vmem:[#allocation15] sm:$0xff]  }
 0xd4a   :  { %v5269_v28 = vld [vmem:[#allocation28_spill] sm:$0xff] }
 0xd4b   :  { %v5131_v13 = vadd.f32 %v2458_v26, %v2457_v31  ;;  %v1700_v31 = vadd.f32 %v5269_v28, %v4916_v33 }
 0xd4d   :  { %v2463_v35 = vpack.c.bf16 %v5131_v13, %v5131_v13 }
 0xd4f   :  { %2497 = vmatmul.mubr.bf16.vlgmr.msra.gmra.mxu0 %v2463_v35  ;;  %3518 = vmatmul.mubr.bf16.vlgmr.msra.gmra.mxu1 %v2463_v35 }
 0xd50   :  { %2571 = vmatpush1.bf16.msra.mxu0 %v4750_v23  ;;  %3522 = vmatpush3.bf16.msra.mxu1 %v4790_v47  ;;  %v1694_v23 = vadd.f32 %v4897_v8, %v4916_v33 }
 0xd51   :  { %2572 = vmatprep.subr.bf16.mxu0 %v4754_v46  ;;  %3523 = vmatprep.subr.bf16.mxu1 %v5251_v45 }
 0xd52   :  { %2602 = vmatprep.mubr.bf16.mxu0 %v5252_v58  ;;  %3537 = vmatprep.mubr.msk.bf16.mxu1 %vm4123_vm2, %v5251_v45 }
 0xd54   :  { %2573 = vmatpush1.bf16.msra.mxu0 %v4756_v57  ;;  %3524 = vmatpush3.bf16.msra.mxu1 %v4800_v55 }
 0xd55   :  { %2574 = vmatprep.subr.bf16.mxu0 %v4760_v29  ;;  %3525 = vmatprep.subr.bf16.mxu1 %v5251_v45 }
 0xd58   :  { %2575 = vmatpush1.bf16.msra.mxu0 %v4762_v17  ;;  %3526 = vmatpush3.bf16.msra.mxu1 %v4804_v21 }
 0xd59   :  { %2576 = vmatprep.subr.bf16.mxu0 %v4766_v1  ;;  %3527 = vmatprep.subr.bf16.mxu1 %v5251_v45 }
 0xd5c   :  { %2577 = vmatpush1.bf16.msra.mxu0 %v4768_v56  ;;  %3528 = vmatpush3.bf16.msra.mxu1 %v4808_v4 }
 0xd5d   :  { %2578 = vmatprep.subr.bf16.mxu0 %v4772_v49  ;;  %3529 = vmatprep.subr.bf16.mxu1 %v5251_v45 }
 0xd60   :  { %2579 = vmatpush1.bf16.msra.mxu0 %v4774_v50  ;;  %3530 = vmatpush3.bf16.msra.mxu1 %v4812_v34  ;;  %v5268_v34 = vld [vmem:[#allocation31_spill] sm:$0xff] }
 0xd61   :  { %2580 = vmatprep.subr.bf16.mxu0 %v4778_v52  ;;  %3531 = vmatprep.subr.bf16.mxu1 %v5251_v45  ;;  %v1696_v52 = vadd.f32 %v4901_v24, %v4929_v53 }
 0xd64   :  { %2581 = vmatpush1.bf16.msra.mxu0 %v4780_v54  ;;  %3532 = vmatpush3.bf16.msra.mxu1 %v4816_v3  ;;  %v1762_v3 = vadd.f32 %v5268_v34, %v4940_v38 }
 0xd65   :  { %2582 = vmatprep.subr.bf16.mxu0 %v4784_v25  ;;  %3533 = vmatprep.subr.bf16.mxu1 %v5251_v45 }
 0xd68   :  { %2583 = vmatpush1.bf16.msra.mxu0 %v4786_v61  ;;  %3534 = vmatpush3.bf16.msra.mxu1 %v4820_v62 }
 0xd69   :  { %2584 = vmatprep.subr.bf16.mxu0 %v4788_v7  ;;  %3535 = vmatprep.subr.bf16.mxu1 %v5251_v45 }
 0xd6c   :  { %2585 = vmatpush1.bf16.msra.mxu0 %v4795_v15  ;;  %3536 = vmatpush3.bf16.msra.mxu1 %v4824_v60 }
 0xd6d   :  { %2676 = vmatprep.subr.bf16.mxu0 %v4748_v63  ;;  %3541 = vmatprep.subr.bf16.mxu1 %v5251_v45 }
 0xe0f   :  { %v2498_v46 = vpop.f32.mrf.mxu0  ;;  %v2553_v57 = vpop.f32.mrf.mxu1 }
 0xe10   :  { %v2505_v29 = vadd.f32 %v2498_v46, %v1694_v23  ;;  %v2554_v21 = vadd.f32 %v4935_v37, %v2553_v57 }
 0xe11   :  { %v2500_v17 = vpop.f32.mrf.mxu0  ;;  %v3519_v1 = vpop.f32.mrf.mxu1 }
 0xe12   :  { %v3022_v56 = vmul.f32 -1.442695, %v2505_v29  ;;  %v2506_v63 = vadd.f32 %v2500_v17, %v1696_v52  ;;  %v5270_v1 = vld [vmem:[#allocation29_spill] sm:$0xff] }
 0xe13   :  { %v2502_v49 = vpop.f32.mrf.mxu0  ;;  %v2556_v50 = vpop.f32.mrf.mxu1 }
 0xe14   :  { %3837 = vpow2.f32 %v3022_v56  ;;  %v3023_v61 = vmul.f32 -1.442695, %v2506_v63  ;;  %v1702_v56 = vadd.f32 %v5270_v1, %v4929_v53 }
 0xe15   :  { %v2503_v54 = vpop.f32.mrf.mxu0  ;;  %v3520_v25 = vpop.f32.mrf.mxu1 }
 0xe16   :  { %3839 = vpow2.f32 %v3023_v61 }
 0xe21   :  { %v3838_v7 = vpop.eup %3837 }
 0xe22   :  { %v2513_v47 = vadd.f32 1.0, %v3838_v7 }
 0xe23   :  { %v3840_v15 = vpop.eup %3839 }
 0xe24   :  { %3841 = vrcp.f32 %v2513_v47  ;;  %v2514_v55 = vadd.f32 1.0, %v3840_v15 }
 0xe26   :  { %3843 = vrcp.f32 %v2514_v55  ;;  %v5271_v55 = vld [vmem:[#allocation26_spill] sm:$0xff] }
 0xe31   :  { %v3842_v4 = vpop.eup %3841 }
 0xe32   :  { %v2559_v62 = vmul.f32 %v3842_v4, %v2554_v21  ;;  %v1767_v21 = vadd.f32 %v5271_v55, %v4940_v38 }
 0xe33   :  { %v3844_v8 = vpop.eup %3843 }
 0xe34   :  { %v2560_v60 = vadd.f32 %v2559_v62, %v1762_v3  ;;  %v2562_v24 = vsub.f32 1.0, %v3844_v8  ;;  %v2564_v41 = vmul.f32 %v3844_v8, %v5131_v13 }
 0xe36   :  { %3845 = vtanh.f32 %v2560_v60 }
 0xe43   :  { %v3846_v32 = vpop.eup %3845 }
 0xe44   :  { %v2563_v14 = vmul.f32 %v3846_v32, %v2562_v24 }
 0xe46   :  { %v5178_v18 = vadd.f32 %v2564_v41, %v2563_v14  ;;  %v3699_v41 = vld [vmem:[#allocation16 + $0x38] sm:$0xff]  }
 0xe48   :  { %v2569_v51 = vpack.c.bf16 %v5178_v18, %v5178_v18 }
 0xe4a   :  { %2603 = vmatmul.mubr.bf16.vlgmr.msra.gmra.mxu0 %v2569_v51  ;;  %3538 = vmatmul.mubr.bf16.vlgmr.msra.gmra.mxu1 %v2569_v51  ;;  %v3700_v51 = vld [vmem:[#allocation16 + $0x30] sm:$0xff]  }
 0xe4b   :  { %2677 = vmatpush1.bf16.msra.mxu0 %v3892_v22  ;;  %3542 = vmatpush3.bf16.msra.mxu1 %v3893_v59  ;;  %v3701_v22 = vld [vmem:[#allocation16 + $0x28] sm:$0xff]   ;;  %v3703_v59 = vld [vmem:[#allocation16 + $0x18] sm:$0xff]  }
 0xe4c   :  { %2678 = vmatprep.subr.bf16.mxu0 %v3894_v9  ;;  %3543 = vmatprep.subr.bf16.mxu1 %v5251_v45  ;;  %v3704_v9 = vld [vmem:[#allocation16 + $0x10] sm:$0xff]  }
 0xe4d   :  { %2708 = vmatprep.mubr.bf16.mxu0 %v5252_v58  ;;  %3557 = vmatprep.mubr.msk.bf16.mxu1 %vm4123_vm2, %v5251_v45  ;;  %v3901_v58 = vld [vmem:[#allocation13 + $0x40] ss:$8 sps:$4 sm:$0xff]  }
 0xe4f   :  { %2679 = vmatpush1.bf16.msra.mxu0 %v3895_v10  ;;  %3544 = vmatpush3.bf16.msra.mxu1 %v3896_v36  ;;  %v3705_v10 = vld [vmem:[#allocation16 + $0x8] sm:$0xff]   ;;  %v3706_v36 = vld [vmem:[#allocation16] sm:$0xff]  }
 0xe50   :  { %2680 = vmatprep.subr.bf16.mxu0 %v3897_v20  ;;  %3545 = vmatprep.subr.bf16.mxu1 %v5251_v45  ;;  %v5272_v20 = vld [vmem:[#allocation27_spill] sm:$0xff] }
 0xe53   :  { %2681 = vmatpush1.bf16.msra.mxu0 %v3898_v42  ;;  %3546 = vmatpush3.bf16.msra.mxu1 %v3899_v16  ;;  %v1704_v42 = vadd.f32 %v5272_v20, %v4916_v33 }
 0xe54   :  { %2682 = vmatprep.subr.bf16.mxu0 %v3900_v6  ;;  %3547 = vmatprep.subr.bf16.mxu1 %v5251_v45 }
 0xe57   :  { %2683 = vmatpush1.bf16.msra.mxu0 %v3901_v58  ;;  %3548 = vmatpush3.bf16.msra.mxu1 %v3902_v2 }
 0xe58   :  { %2684 = vmatprep.subr.bf16.mxu0 %v3903_v27  ;;  %3549 = vmatprep.subr.bf16.mxu1 %v5251_v45 }
 0xe5b   :  { %2685 = vmatpush1.bf16.msra.mxu0 %v3904_v40  ;;  %3550 = vmatpush3.bf16.msra.mxu1 %v3905_v12 }
 0xe5c   :  { %2686 = vmatprep.subr.bf16.mxu0 %v3906_v5  ;;  %3551 = vmatprep.subr.bf16.mxu1 %v5251_v45 }
 0xe5f   :  { %2687 = vmatpush1.bf16.msra.mxu0 %v3907_v30  ;;  %3552 = vmatpush3.bf16.msra.mxu1 %v3908_v44  ;;  %v5273_v30 = vld [vmem:[#allocation30_spill] sm:$0xff] }
 0xe60   :  { %2688 = vmatprep.subr.bf16.mxu0 %v3909_v19  ;;  %3553 = vmatprep.subr.bf16.mxu1 %v5251_v45  ;;  %v1706_v44 = vadd.f32 %v5273_v30, %v4929_v53 }
 0xe63   :  { %2689 = vmatpush1.bf16.msra.mxu0 %v3910_v43  ;;  %3554 = vmatpush3.bf16.msra.mxu1 %v3911_v48 }
 0xe64   :  { %2690 = vmatprep.subr.bf16.mxu0 %v3912_v39  ;;  %3555 = vmatprep.subr.bf16.mxu1 %v5251_v45 }
 0xe67   :  { %2691 = vmatpush1.bf16.msra.mxu0 %v3913_v0  ;;  %3556 = vmatpush3.bf16.msra.mxu1 %v3914_v11 }
 0xe68   :  { %3561 = vmatprep.subr.bf16.mxu0 %v5251_v45 }
 0xf0a   :  { %v2604_v26 = vpop.f32.mrf.mxu0  ;;  %v2659_v13 = vpop.f32.mrf.mxu1 }
 0xf0b   :  { %v2611_v35 = vadd.f32 %v2604_v26, %v1700_v31  ;;  %v2660_v47 = vadd.f32 %v4935_v37, %v2659_v13  ;;  %v5274_v26 = vld [vmem:[#allocation25_spill] sm:$0xff] }
 0xf0c   :  { %v2606_v23 = vpop.f32.mrf.mxu0  ;;  %v3539_v46 = vpop.f32.mrf.mxu1  ;;  %v1770_v13 = vadd.f32 %v5274_v26, %v4940_v38 }
 0xf0d   :  { %v3024_v57 = vmul.f32 -1.442695, %v2611_v35  ;;  %v2612_v52 = vadd.f32 %v2606_v23, %v1702_v56 }
 0xf0e   :  { %v2608_v29 = vpop.f32.mrf.mxu0  ;;  %v2662_v17 = vpop.f32.mrf.mxu1 }
 0xf0f   :  { %3847 = vpow2.f32 %v3024_v57  ;;  %v3025_v54 = vmul.f32 -1.442695, %v2612_v52 }
 0xf10   :  { %v2609_v49 = vpop.f32.mrf.mxu0  ;;  %v3540_v50 = vpop.f32.mrf.mxu1 }
 0xf11   :  { %3849 = vpow2.f32 %v3025_v54 }
 0xf1c   :  { %v3848_v25 = vpop.eup %3847 }
 0xf1d   :  { %v2619_v63 = vadd.f32 1.0, %v3848_v25 }
 0xf1e   :  { %v3850_v61 = vpop.eup %3849 }
 0xf1f   :  { %3851 = vrcp.f32 %v2619_v63  ;;  %v2620_v7 = vadd.f32 1.0, %v3850_v61 }
 0xf21   :  { %3853 = vrcp.f32 %v2620_v7 }
 0xf2c   :  { %v3852_v15 = vpop.eup %3851 }
 0xf2d   :  { %v2665_v4 = vmul.f32 %v3852_v15, %v2660_v47 }
 0xf2e   :  { %v3854_v3 = vpop.eup %3853 }
 0xf2f   :  { %v2666_v34 = vadd.f32 %v2665_v4, %v1767_v21  ;;  %v2668_v62 = vsub.f32 1.0, %v3854_v3  ;;  %v2670_v24 = vmul.f32 %v3854_v3, %v5178_v18  ;;  %v3702_v18 = vld [vmem:[#allocation16 + $0x20] sm:$0xff]  }
 0xf31   :  { %3855 = vtanh.f32 %v2666_v34 }
 0xf3e   :  { %v3856_v60 = vpop.eup %3855 }
 0xf3f   :  { %v2669_v8 = vmul.f32 %v3856_v60, %v2668_v62 }
 0xf41   :  { %v2671_v32 = vadd.f32 %v2670_v24, %v2669_v8 }
 0xf43   :  { %v2675_v14 = vpack.c.bf16 %v2671_v32, %v2671_v32 }
 0xf45   :  { %2709 = vmatmul.mubr.bf16.vlgmr.msra.gmra.mxu0 %v2675_v14  ;;  %3558 = vmatmul.mubr.bf16.vlgmr.msra.gmra.mxu1 %v2675_v14 }
 0xf46   :  { %3577 = vmatprep.mubr.msk.bf16.mxu0 %vm4123_vm2, %v5251_v45  ;;  %3562 = vmatpush3.bf16.msra.mxu0 %v3699_v41 }
 0xf47   :  { %3563 = vmatprep.subr.bf16.mxu0 %v5251_v45 }
 0xf4a   :  { %3564 = vmatpush3.bf16.msra.mxu0 %v3700_v51 }
 0xf4b   :  { %3565 = vmatprep.subr.bf16.mxu0 %v5251_v45 }
 0xf4e   :  { %3566 = vmatpush3.bf16.msra.mxu0 %v3701_v22 }
 0xf4f   :  { %3567 = vmatprep.subr.bf16.mxu0 %v5251_v45 }
 0xf52   :  { %3568 = vmatpush3.bf16.msra.mxu0 %v3702_v18 }
 0xf53   :  { %3569 = vmatprep.subr.bf16.mxu0 %v5251_v45 }
 0xf56   :  { %3570 = vmatpush3.bf16.msra.mxu0 %v3703_v59 }
 0xf57   :  { %3571 = vmatprep.subr.bf16.mxu0 %v5251_v45 }
 0xf5a   :  { %3572 = vmatpush3.bf16.msra.mxu0 %v3704_v9 }
 0xf5b   :  { %3573 = vmatprep.subr.bf16.mxu0 %v5251_v45 }
 0xf5e   :  { %3574 = vmatpush3.bf16.msra.mxu0 %v3705_v10 }
 0xf5f   :  { %3575 = vmatprep.subr.bf16.mxu0 %v5251_v45 }
 0xf62   :  { %3576 = vmatpush3.bf16.msra.mxu0 %v3706_v36 }
0x1005   :  { %v2710_v16 = vpop.f32.mrf.mxu0  ;;  %v2765_v6 = vpop.f32.mrf.mxu1 }
0x1006   :  { %v2717_v58 = vadd.f32 %v2710_v16, %v1704_v42  ;;  %v2766_v28 = vadd.f32 %v4935_v37, %v2765_v6  ;;  %v3028_v37 = vld [vmem:[%s5235_s12] ss:$0 sm:$0xff] }
0x1007   :  { %v2712_v2 = vpop.f32.mrf.mxu0  ;;  %v3559_v27 = vpop.f32.mrf.mxu1 }
0x1008   :  { %v3026_v40 = vmul.f32 -1.442695, %v2717_v58  ;;  %v2718_v48 = vadd.f32 %v2712_v2, %v1706_v44 }
0x1009   :  { %v2714_v12 = vpop.f32.mrf.mxu0  ;;  %v2768_v5 = vpop.f32.mrf.mxu1 }
0x100a   :  { %3857 = vpow2.f32 %v3026_v40  ;;  %v3027_v45 = vmul.f32 -1.442695, %v2718_v48 }
0x100b   :  { %v2715_v19 = vpop.f32.mrf.mxu0  ;;  %v3560_v43 = vpop.f32.mrf.mxu1 }
0x100c   :  { %3859 = vpow2.f32 %v3027_v45 }
0x1017   :  { %v3858_v39 = vpop.eup %3857 }
0x1018   :  { %v2725_v0 = vadd.f32 1.0, %v3858_v39 }
0x1019   :  { %v3860_v33 = vpop.eup %3859 }
0x101a   :  { %3861 = vrcp.f32 %v2725_v0  ;;  %v2726_v11 = vadd.f32 1.0, %v3860_v33 }
0x101c   :  { %3863 = vrcp.f32 %v2726_v11 }
0x1027   :  { %v3862_v31 = vpop.eup %3861 }
0x1028   :  { %v2771_v35 = vmul.f32 %v3862_v31, %v2766_v28 }
0x1029   :  { %v3864_v23 = vpop.eup %3863 }
0x102a   :  { %v2772_v53 = vadd.f32 %v2771_v35, %v1770_v13  ;;  %v2774_v46 = vsub.f32 1.0, %v3864_v23  ;;  %v2776_v17 = vmul.f32 %v3864_v23, %v2671_v32 }
0x102c   :  { %3865 = vtanh.f32 %v2772_v53 }
0x1039   :  { %v3866_v57 = vpop.eup %3865 }
0x103a   :  { %v2775_v29 = vmul.f32 %v3866_v57, %v2774_v46 }
0x103c   :  { %v2777_v1 = vadd.f32 %v2776_v17, %v2775_v29 }
0x103e   :  { %v2778_v56 = vpack.c.bf16 %v2777_v1, %v2777_v1 }
0x1040   :  { %3578 = vmatmul.mubr.bf16.vlgmr.msra.gmra.mxu0 %v2778_v56 }
0x1100   :  { %v2884_v49 = vpop.f32.mrf.mxu0 }
0x1101   :  { %v2885_v38 = vadd.f32 %v3028_v37, %v2884_v49 }
0x1102   :  { %v3579_v50 = vpop.f32.mrf.mxu0 }
0x1103   :  { %2890 = vst [vmem:[#allocation18] sm:$0xff] %v2885_v38 }
0x1104   :  { %v2887_v52 = vpop.f32.mrf.mxu0 }
0x1105   :  { %4086 = shalt.err (!%p4083_p2)
}
0x1106   :  { %2900 = dma.vmem_to_hbm [thread:$0]  %s2898_s20, 128, %s5236_s13, [#allocation6]   ;;  %v3580_v54 = vpop.f32.mrf.mxu0 }
0x1107   :  { %4105 = dma.done.wait [#allocation6], 128  }
0x1108   :  { %4106 = vsyncadd [#allocation6], 4294967168 }
0x1109   :  { %2904 = vsyncpa [#allocation5], 1 }
0x110a   :  { %2905 = vsyncpa [#allocation8], 1 }
0x110b   :  { %2906 = vsyncpa [#allocation11], 1 }
0x110c   :  { %2907 = vsyncpa [#allocation14], 1 }
0x110d   :  { %2908 = vsyncpa [#allocation17], 1 }
0x110e   :  { %2909 = vsyncpa [#allocation6], 1 }

</bundles_post_ra>
